<compile_context>
chip_gen: v6e
topology: v6e:2x2x1
jax: 0.10.0
libtpu: 0.0.40
codegen_flags: <defaults>
</compile_context>

<pallas_src>
import jax
import jax.numpy as jnp
from jax.experimental import pallas as pl
from jax.experimental.pallas import tpu as pltpu

# ----- synthetic config (TPU-friendly small shapes) -----
B = 4             # waveforms per batched call
K = 128           # frame size == stride (non-overlapping 1-D "conv"), lane-dense
F = 256           # latent frames per waveform
T = F * K         # samples per waveform (32768 ~ 1.4 s @ 24 kHz)
D = 128           # latent dim
G = 2             # VQ groups (HiFiCodec-style group VQ)
DG = D // G       # dim per group (64)
N = 64            # codebook entries per group
GN = G * N        # packed codebook width (128)
_PEAK_EPS = 1e-9  # floor for the inf-norm peak (silent-input guard)

assert K == GN == 128, "packed-parameter layout assumes K == GN == 128"

# packed parameter buffer layout (rows, all sections 8-sublane aligned)
_ROW_WSCORE = 0            # (K, GN)  = w_enc @ (-2*cb_e)
_ROW_BSCORE = K            # (1, GN)  = b_enc @ (-2*cb_e) + ||c||^2
_ROW_WDEC = K + 8          # (GN, K)  = cb_d @ w_dec
_ROW_BDEC = K + 8 + GN     # (1, K)
P_ROWS = K + 8 + GN + 8    # 272


# ---------------- fused Pallas kernel (one waveform per grid step) ----------------

def _vqvae_fused_kernel(patch_ref, params_ref, codes_ref, recon_ref):
    # --- librosa.util.normalize(wav) * 0.95 (per-waveform inf-norm) ---
    x = patch_ref[...]                                    # (F, K)
    peak = jnp.max(jnp.abs(x))
    x = x * (0.95 / jnp.maximum(peak, _PEAK_EPS))

    # --- pre-folded parameters: one packed VMEM buffer, static aligned slices ---
    w_score = params_ref[_ROW_WSCORE:_ROW_WSCORE + K, :]  # (K, GN)
    b_score = params_ref[_ROW_BSCORE:_ROW_BSCORE + 1, :]  # (1, GN)
    w_dec = params_ref[_ROW_WDEC:_ROW_WDEC + GN, :]       # (GN, K)
    b_dec = params_ref[_ROW_BDEC:_ROW_BDEC + 1, :]        # (1, K)

    # --- encoder + VQ distances fused: scores = ||c||^2 - 2 <enc(x), c>.
    #     The per-row ||z_g||^2 term is constant within a group, so it never
    #     affects the argmin and is dropped (exact for the linear encoder). ---
    scores = jnp.dot(x, w_score, preferred_element_type=jnp.float32) + b_score

    # --- per-group argmin via full-width masked reductions (no lane slices) ---
    lane = jax.lax.broadcasted_iota(jnp.int32, (F, GN), 1)
    grp_iota = jax.lax.broadcasted_iota(jnp.int32, (F, G), 1)
    onehot = jnp.zeros((F, GN), jnp.float32)
    codes = jnp.zeros((F, G), jnp.int32)
    for g in range(G):                                    # G=2, unrolled at trace
        in_g = jnp.logical_and(lane >= g * N, lane < (g + 1) * N)
        sg = jnp.where(in_g, scores, jnp.inf)
        dmin = jnp.min(sg, axis=-1, keepdims=True)
        # first lane achieving the minimum (torch argmin tie behavior)
        gidx = jnp.min(jnp.where(sg <= dmin, lane, GN), axis=-1, keepdims=True)
        onehot = onehot + (lane == gidx).astype(jnp.float32)
        codes = jnp.where(grp_iota == g, gidx - g * N, codes)
    codes_ref[...] = codes                                # single full-array store

    # --- one-hot gather + decoder fused: recon = onehot @ (cb_d @ w_dec) + b ---
    recon_ref[...] = (jnp.dot(onehot, w_dec, preferred_element_type=jnp.float32)
                      + b_dec)                            # (F, K) lane-dense


# ---------------- wrappers ----------------

@jax.jit
def _vqvae_run(wavs, packed_params):
    """Single compiled call: normalize -> encode -> group-VQ -> decode, batched."""
    # Framing is a contiguous reshape (metadata only); the per-wav inf-norm peak
    # is computed inside the kernel on that waveform's frames.
    patches = wavs.astype(jnp.float32).reshape(B, F, K)
    codes, recon = pl.pallas_call(
        _vqvae_fused_kernel,
        out_shape=(jax.ShapeDtypeStruct((B, F, G), jnp.int32),
                   jax.ShapeDtypeStruct((B, F, K), jnp.float32)),
        grid_spec=pltpu.PrefetchScalarGridSpec(
            num_scalar_prefetch=0,
            grid=(B,),
            in_specs=[
                pl.BlockSpec((None, F, K), lambda b: (b, 0, 0)),   # one wav/step
                pl.BlockSpec((P_ROWS, GN), lambda b: (0, 0)),      # params: 1 DMA
            ],
            out_specs=(
                pl.BlockSpec((None, F, G), lambda b: (b, 0, 0)),
                pl.BlockSpec((None, F, K), lambda b: (b, 0, 0)),
            ),
        ),
        compiler_params=pltpu.CompilerParams(
            dimension_semantics=("parallel",)),           # v7x: shard over 2 TCs
    )(patches, packed_params)
    syn = recon.reshape(B, 1, T)                          # NCL, like the torch generator
    return codes, syn


def init_params():
    """Deterministic synthetic VQVAE params, pre-folded + packed into one buffer."""
    keys = jax.random.split(jax.random.PRNGKey(42), 5)
    w_enc = 0.1 * jax.random.normal(keys[0], (K, D), jnp.float32)
    b_enc = 0.01 * jax.random.normal(keys[1], (1, D), jnp.float32)
    codebooks = jax.random.normal(keys[2], (G, N, DG), jnp.float32)
    w_dec = 0.1 * jax.random.normal(keys[3], (D, K), jnp.float32)
    b_dec = 0.01 * jax.random.normal(keys[4], (1, K), jnp.float32)
    raw = (w_enc, b_enc, codebooks, w_dec, b_dec)

    # Block-diagonal packed codebook (D, GN): both groups in one MXU-wide matrix.
    cb_e = jnp.zeros((D, GN), jnp.float32)
    for g in range(G):
        cb_e = cb_e.at[g * DG:(g + 1) * DG, g * N:(g + 1) * N].set(codebooks[g].T)
    cb_sq = jnp.sum(codebooks ** 2, axis=-1).reshape(1, GN)   # per-code ||c||^2

    # Init-time algebraic folds (exact for the linear synthetic encoder/decoder).
    w_score = w_enc @ (-2.0 * cb_e)                 # (K, GN)
    b_score = b_enc @ (-2.0 * cb_e) + cb_sq         # (1, GN)
    w_dec_c = cb_e.T @ w_dec                        # (GN, K)

    packed = jnp.zeros((P_ROWS, GN), jnp.float32)
    packed = packed.at[_ROW_WSCORE:_ROW_WSCORE + K, :].set(w_score)
    packed = packed.at[_ROW_BSCORE, :].set(b_score[0])
    packed = packed.at[_ROW_WDEC:_ROW_WDEC + GN, :].set(w_dec_c)
    packed = packed.at[_ROW_BDEC, :].set(b_dec[0])
    # `packed` stays device-resident; it is re-used (not rebuilt) across calls.
    return packed, raw


def vqvae_tester_run(fids, wavs, packed_params):
    """One compiled call returning both VQ codes and the reconstruction."""
    codes, syn = _vqvae_run(wavs, packed_params)
    return fids, codes, syn


def vqvae_tester_forward(fids, wavs, packed_params):
    """Mirrors VqvaeTester.forward: returns (fids, syn) with syn (B, 1, T)."""
    _, syn = _vqvae_run(wavs, packed_params)
    return fids, syn


def vqvae_tester_vq(fids, wavs, packed_params):
    """Mirrors VqvaeTester.vq: returns (fids, vq_codes) with codes (B, F, G)."""
    codes, _ = _vqvae_run(wavs, packed_params)
    return fids, codes


# ---------------- pure-JAX reference (unfolded params) ----------------

def _reference(wavs, raw_params):
    w_enc, b_enc, codebooks, w_dec, b_dec = raw_params
    x = wavs.reshape(B, F, K).astype(jnp.float32)
    peak = jnp.max(jnp.abs(x), axis=(1, 2), keepdims=True)
    x = x * (0.95 / jnp.maximum(peak, _PEAK_EPS))
    z = jnp.einsum('bfk,kd->bfd', x, w_enc) + b_enc
    codes, zq_parts = [], []
    for g in range(G):
        zg = z[..., g * DG:(g + 1) * DG]
        cb = codebooks[g]
        d = (jnp.sum(zg * zg, -1, keepdims=True)
             - 2.0 * jnp.einsum('bfd,nd->bfn', zg, cb)
             + jnp.sum(cb * cb, -1))
        idx = jnp.argmin(d, axis=-1)
        codes.append(idx.astype(jnp.int32))
        zq_parts.append(cb[idx])
    codes = jnp.stack(codes, axis=-1)                     # (B, F, G)
    zq = jnp.concatenate(zq_parts, axis=-1)               # (B, F, D)
    recon = jnp.einsum('bfd,dk->bfk', zq, w_dec) + b_dec  # (B, F, K)
    return codes, recon


if __name__ == "__main__":
    key = jax.random.PRNGKey(0)
    wavs = jax.random.normal(key, (B, T), jnp.float32)    # stands in for librosa.load
    fids = [f"example_{i:04d}" for i in range(B)]
    packed_params, raw_params = init_params()

    out_fids, codes, syn = vqvae_tester_run(fids, wavs, packed_params)
    jax.block_until_ready((codes, syn))

    assert syn.shape == (B, 1, T) and syn.dtype == jnp.float32
    assert codes.shape == (B, F, G) and codes.dtype == jnp.int32
    assert bool(jnp.all(codes >= 0)) and bool(jnp.all(codes < N))
    assert bool(jnp.all(jnp.isfinite(syn)))

    # Cross-check against the unfolded pure-JAX reference (validates the folds).
    ref_codes, ref_recon = _reference(wavs, raw_params)
    agree = (codes == ref_codes)
    # tolerate exceedingly rare f32 argmin ties flipped by fold-order rounding
    assert float(jnp.mean(agree.astype(jnp.float32))) >= 0.999
    frame_ok = jnp.all(agree, axis=-1, keepdims=True)
    diff = jnp.where(frame_ok, jnp.abs(syn.reshape(B, F, K) - ref_recon), 0.0)
    assert float(jnp.max(diff)) < 1e-3

    print("KERNEL_OK")
</pallas_src>

<mosaic_0001>
module attributes {stable_mosaic.version = 11 : i64} {
  func.func @_vqvae_fused_kernel(%arg0: i32, %arg1: memref<1x256x128xf32, #tpu.memory_space<vmem>>, %arg2: memref<272x128xf32, #tpu.memory_space<vmem>>, %arg3: memref<1x256x2xi32, #tpu.memory_space<vmem>>, %arg4: memref<1x256x128xf32, #tpu.memory_space<vmem>>) attributes {dimension_semantics = [#tpu.dimension_semantics<parallel>], iteration_bounds = array<i64: 4>, scalar_prefetch = 0 : i64, scratch_operands = 0 : i64, tpu.core_type = #tpu.core_type<tc>, window_params = [{transform_indices = @transform_0, window_bounds = array<i64: 1, 256, 128>}, {pipeline_mode = #tpu.pipeline_mode<synchronous>, transform_indices = @transform_1, window_bounds = array<i64: 272, 128>}, {transform_indices = @transform_2, window_bounds = array<i64: 1, 256, 2>}, {transform_indices = @transform_3, window_bounds = array<i64: 1, 256, 128>}]} {
    %c0 = arith.constant 0 : index
    %c0_0 = arith.constant 0 : index
    %c0_1 = arith.constant 0 : index
    %0 = vector.load %arg1[%c0, %c0_0, %c0_1] : memref<1x256x128xf32, #tpu.memory_space<vmem>>, vector<1x256x128xf32>
    %1 = vector.shape_cast %0 : vector<1x256x128xf32> to vector<256x128xf32>
    %2 = math.absf %1 : vector<256x128xf32>
    %3 = vector.shape_cast %2 : vector<256x128xf32> to vector<1x256x128xf32>
    %cst = arith.constant dense<0xFF800000> : vector<1xf32>
    %4 = vector.multi_reduction <maximumf>, %3, %cst [1, 2] : vector<1x256x128xf32> to vector<1xf32>
    %5 = vector.shape_cast %4 : vector<1xf32> to vector<1x1x1xf32>
    %6 = vector.extract %5[0, 0, 0] : f32 from vector<1x1x1xf32>
    %cst_2 = arith.constant 9.99999971E-10 : f32
    %7 = arith.maximumf %6, %cst_2 : f32
    %cst_3 = arith.constant 0.949999988 : f32
    %8 = arith.divf %cst_3, %7 : f32
    %9 = vector.broadcast %8 : f32 to vector<256x128xf32>
    %10 = arith.mulf %1, %9 : vector<256x128xf32>
    %c0_4 = arith.constant 0 : index
    %c0_5 = arith.constant 0 : index
    %11 = vector.load %arg2[%c0_4, %c0_5] : memref<272x128xf32, #tpu.memory_space<vmem>>, vector<128x128xf32>
    %c128 = arith.constant 128 : index
    %c0_6 = arith.constant 0 : index
    %12 = vector.load %arg2[%c128, %c0_6] : memref<272x128xf32, #tpu.memory_space<vmem>>, vector<1x128xf32>
    %c136 = arith.constant 136 : index
    %c0_7 = arith.constant 0 : index
    %13 = vector.load %arg2[%c136, %c0_7] : memref<272x128xf32, #tpu.memory_space<vmem>>, vector<128x128xf32>
    %c264 = arith.constant 264 : index
    %c0_8 = arith.constant 0 : index
    %14 = vector.load %arg2[%c264, %c0_8] : memref<272x128xf32, #tpu.memory_space<vmem>>, vector<1x128xf32>
    %cst_9 = arith.constant dense<0.000000e+00> : vector<256x128xf32>
    %15 = tpu.matmul %10, %11, %cst_9 {dimension_numbers = #tpu.dot_dimension_numbers<[1], [0], [0], [1], [0, 0, 1, 1], [], []>} : vector<256x128xf32>, vector<128x128xf32>, vector<256x128xf32> -> vector<256x128xf32>
    %16 = vector.broadcast %12 : vector<1x128xf32> to vector<256x128xf32>
    %17 = arith.addf %15, %16 : vector<256x128xf32>
    %18 = tpu.iota {dimensions = array<i32: 1>} : vector<256x128xi32>
    %19 = tpu.iota {dimensions = array<i32: 1>} : vector<256x2xi32>
    %cst_10 = arith.constant 0.000000e+00 : f32
    %20 = vector.broadcast %cst_10 : f32 to vector<256x128xf32>
    %c0_i32 = arith.constant 0 : i32
    %21 = vector.broadcast %c0_i32 : i32 to vector<256x2xi32>
    %c0_i32_11 = arith.constant 0 : i32
    %22 = vector.broadcast %c0_i32_11 : i32 to vector<256x128xi32>
    %23 = arith.cmpi sge, %18, %22 : vector<256x128xi32>
    %c64_i32 = arith.constant 64 : i32
    %24 = vector.broadcast %c64_i32 : i32 to vector<256x128xi32>
    %25 = arith.cmpi slt, %18, %24 : vector<256x128xi32>
    %26 = arith.andi %23, %25 : vector<256x128xi1>
    %cst_12 = arith.constant 0x7F800000 : f32
    %27 = vector.broadcast %cst_12 : f32 to vector<256x128xf32>
    %28 = arith.select %26, %17, %27 : vector<256x128xi1>, vector<256x128xf32>
    %cst_13 = arith.constant dense<0x7F800000> : vector<256xf32>
    %29 = vector.multi_reduction <minimumf>, %28, %cst_13 [1] : vector<256x128xf32> to vector<256xf32>
    %30 = vector.shape_cast %29 : vector<256xf32> to vector<256x1xf32>
    %31 = vector.broadcast %30 : vector<256x1xf32> to vector<256x128xf32>
    %32 = arith.cmpf ole, %28, %31 : vector<256x128xf32>
    %c128_i32 = arith.constant 128 : i32
    %33 = vector.broadcast %c128_i32 : i32 to vector<256x128xi32>
    %34 = arith.select %32, %18, %33 : vector<256x128xi1>, vector<256x128xi32>
    %cst_14 = arith.constant dense<2147483647> : vector<256xi32>
    %35 = vector.multi_reduction <minsi>, %34, %cst_14 [1] : vector<256x128xi32> to vector<256xi32>
    %36 = vector.shape_cast %35 : vector<256xi32> to vector<256x1xi32>
    %37 = vector.broadcast %36 : vector<256x1xi32> to vector<256x128xi32>
    %38 = arith.cmpi eq, %18, %37 : vector<256x128xi32>
    %39 = arith.extui %38 : vector<256x128xi1> to vector<256x128xi32>
    %40 = arith.sitofp %39 : vector<256x128xi32> to vector<256x128xf32>
    %41 = arith.addf %20, %40 : vector<256x128xf32>
    %c0_i32_15 = arith.constant 0 : i32
    %42 = vector.broadcast %c0_i32_15 : i32 to vector<256x2xi32>
    %43 = arith.cmpi eq, %19, %42 : vector<256x2xi32>
    %c0_i32_16 = arith.constant 0 : i32
    %44 = vector.broadcast %c0_i32_16 : i32 to vector<256x1xi32>
    %45 = arith.subi %36, %44 : vector<256x1xi32>
    %46 = vector.shape_cast %45 : vector<256x1xi32> to vector<256x1xi32>
    %47 = vector.broadcast %46 : vector<256x1xi32> to vector<256x2xi32>
    %48 = arith.select %43, %47, %21 : vector<256x2xi1>, vector<256x2xi32>
    %c64_i32_17 = arith.constant 64 : i32
    %49 = vector.broadcast %c64_i32_17 : i32 to vector<256x128xi32>
    %50 = arith.cmpi sge, %18, %49 : vector<256x128xi32>
    %c128_i32_18 = arith.constant 128 : i32
    %51 = vector.broadcast %c128_i32_18 : i32 to vector<256x128xi32>
    %52 = arith.cmpi slt, %18, %51 : vector<256x128xi32>
    %53 = arith.andi %50, %52 : vector<256x128xi1>
    %cst_19 = arith.constant 0x7F800000 : f32
    %54 = vector.broadcast %cst_19 : f32 to vector<256x128xf32>
    %55 = arith.select %53, %17, %54 : vector<256x128xi1>, vector<256x128xf32>
    %cst_20 = arith.constant dense<0x7F800000> : vector<256xf32>
    %56 = vector.multi_reduction <minimumf>, %55, %cst_20 [1] : vector<256x128xf32> to vector<256xf32>
    %57 = vector.shape_cast %56 : vector<256xf32> to vector<256x1xf32>
    %58 = vector.broadcast %57 : vector<256x1xf32> to vector<256x128xf32>
    %59 = arith.cmpf ole, %55, %58 : vector<256x128xf32>
    %c128_i32_21 = arith.constant 128 : i32
    %60 = vector.broadcast %c128_i32_21 : i32 to vector<256x128xi32>
    %61 = arith.select %59, %18, %60 : vector<256x128xi1>, vector<256x128xi32>
    %cst_22 = arith.constant dense<2147483647> : vector<256xi32>
    %62 = vector.multi_reduction <minsi>, %61, %cst_22 [1] : vector<256x128xi32> to vector<256xi32>
    %63 = vector.shape_cast %62 : vector<256xi32> to vector<256x1xi32>
    %64 = vector.broadcast %63 : vector<256x1xi32> to vector<256x128xi32>
    %65 = arith.cmpi eq, %18, %64 : vector<256x128xi32>
    %66 = arith.extui %65 : vector<256x128xi1> to vector<256x128xi32>
    %67 = arith.sitofp %66 : vector<256x128xi32> to vector<256x128xf32>
    %68 = arith.addf %41, %67 : vector<256x128xf32>
    %c1_i32 = arith.constant 1 : i32
    %69 = vector.broadcast %c1_i32 : i32 to vector<256x2xi32>
    %70 = arith.cmpi eq, %19, %69 : vector<256x2xi32>
    %c64_i32_23 = arith.constant 64 : i32
    %71 = vector.broadcast %c64_i32_23 : i32 to vector<256x1xi32>
    %72 = arith.subi %63, %71 : vector<256x1xi32>
    %73 = vector.shape_cast %72 : vector<256x1xi32> to vector<256x1xi32>
    %74 = vector.broadcast %73 : vector<256x1xi32> to vector<256x2xi32>
    %75 = arith.select %70, %74, %48 : vector<256x2xi1>, vector<256x2xi32>
    %c0_24 = arith.constant 0 : index
    %c0_25 = arith.constant 0 : index
    %c0_26 = arith.constant 0 : index
    %76 = vector.load %arg3[%c0_24, %c0_25, %c0_26] : memref<1x256x2xi32, #tpu.memory_space<vmem>>, vector<1x256x2xi32>
    %77 = vector.shape_cast %76 : vector<1x256x2xi32> to vector<256x2xi32>
    %78 = vector.shape_cast %75 : vector<256x2xi32> to vector<1x256x2xi32>
    tpu.vector_store %arg3[%c0_24, %c0_25, %c0_26], %78 {strides = array<i32>} : memref<1x256x2xi32, #tpu.memory_space<vmem>>, vector<1x256x2xi32>,
    %cst_27 = arith.constant dense<0.000000e+00> : vector<256x128xf32>
    %79 = tpu.matmul %68, %13, %cst_27 {dimension_numbers = #tpu.dot_dimension_numbers<[1], [0], [0], [1], [0, 0, 1, 1], [], []>} : vector<256x128xf32>, vector<128x128xf32>, vector<256x128xf32> -> vector<256x128xf32>
    %80 = vector.broadcast %14 : vector<1x128xf32> to vector<256x128xf32>
    %81 = arith.addf %79, %80 : vector<256x128xf32>
    %c0_28 = arith.constant 0 : index
    %c0_29 = arith.constant 0 : index
    %c0_30 = arith.constant 0 : index
    %82 = vector.load %arg4[%c0_28, %c0_29, %c0_30] : memref<1x256x128xf32, #tpu.memory_space<vmem>>, vector<1x256x128xf32>
    %83 = vector.shape_cast %82 : vector<1x256x128xf32> to vector<256x128xf32>
    %84 = vector.shape_cast %81 : vector<256x128xf32> to vector<1x256x128xf32>
    tpu.vector_store %arg4[%c0_28, %c0_29, %c0_30], %84 {strides = array<i32>} : memref<1x256x128xf32, #tpu.memory_space<vmem>>, vector<1x256x128xf32>,
    return
  }
  func.func @transform_0(%arg0: i32) -> (i32, i32, i32) {
    %c0_i32 = arith.constant 0 : i32
    %c0_i32_0 = arith.constant 0 : i32
    %c0_i32_1 = arith.constant 0 : i32
    return %arg0, %c0_i32, %c0_i32_0 : i32, i32, i32
  }
  func.func @transform_1(%arg0: i32) -> (i32, i32) {
    %c0_i32 = arith.constant 0 : i32
    %c0_i32_0 = arith.constant 0 : i32
    %c0_i32_1 = arith.constant 0 : i32
    return %c0_i32, %c0_i32_0 : i32, i32
  }
  func.func @transform_2(%arg0: i32) -> (i32, i32, i32) {
    %c0_i32 = arith.constant 0 : i32
    %c0_i32_0 = arith.constant 0 : i32
    %c0_i32_1 = arith.constant 0 : i32
    return %arg0, %c0_i32, %c0_i32_0 : i32, i32, i32
  }
  func.func @transform_3(%arg0: i32) -> (i32, i32, i32) {
    %c0_i32 = arith.constant 0 : i32
    %c0_i32_0 = arith.constant 0 : i32
    %c0_i32_1 = arith.constant 0 : i32
    return %arg0, %c0_i32, %c0_i32_0 : i32, i32, i32
  }
}

</mosaic_0001>

<bundles_post_ra>
// kernel: _vqvae_run.1
= control target key start
LH: loop header
LB: loop body
LE: loop exit
PB: predicated region body
PF: predicated region fallthrough
CT: control target
= control target key end

     0   :  { %9 = vsyncpa [#allocation3], 0  ;;  %s5177_s0 = inlined_call_operand.vmem [shape: f32[4,256,128], index: 0, kind: input, shape index: {}]   ;;  %s5178_s1 = inlined_call_operand.vmem [shape: f32[272,128], index: 1, kind: input, shape index: {}]   ;;  %s5179_s2 = inlined_call_operand.vmem [shape: s32[4,256,2], index: 2, kind: output, shape index: {0}]   ;;  %s5180_s3 = inlined_call_operand.hbm [shape: f32[4,256,128], index: 3, kind: output, shape index: {1}]  }
   0x1   :  { %11 = vsyncpa [#allocation3 + $0x1], 0  ;;  %s3075_s12 = smov 0   ;;  %s3077_s13 = smov 0  }
   0x2   :  { %s3079_s14 = smov 0   ;;  %s3081_s15 = smov 0  }
   0x3 LB: > { %s3096_s16 = sadd.s32 4294967295, %s3048_s15   ;;  %s2568_s17 = sadd.s32 4294967294, %s3048_s15   ;;  %s3048_s15 = sphi %s3081_s15, %s5508_s15   ;;  %s3044_s14 = sphi %s3079_s14, %s5507_s14   ;;  %s3040_s13 = sphi %s3077_s13, %s5506_s13   ;;  %s3036_s12 = sphi %s3075_s12, %s5505_s12  }
   0x4   : > { %s3100_s18 = sadd.s32 1, %s3048_s15   ;;  %s97_s19 = sadd.s32 1, %s3044_s14 }
   0x5   : > { %s94_s20 = ssub.s32 %s3048_s15, %s3100_s18  ;;  %p107_p0 = scmp.ne.s32.totalorder %s3044_s14, %s3040_s13 }
   0x6   : > { %p95_p1 = scmp.eq.s32.totalorder %s94_s20, 0  ;;  %p108_p2 = scmp.eq.s32.totalorder %s3096_s16, 3 }
   0x7   : > { %p113_p3 = scmp.ne.s32.totalorder %s3040_s13, %s3036_s12  ;;  %p114_p4 = scmp.eq.s32.totalorder %s2568_s17, 3 }
   0x8   : > { %s3111_s21 = scalar_select %p95_p1, %s3044_s14, %s97_s19  }
   0x9   : > { %p3113_p5 = por %p108_p2, %p107_p0  ;;  %p3117_p6 = por %p114_p4, %p113_p3 }
   0xa   : > { %p2571_p7 = scmp.ge.s32.totalorder %s3048_s15, 1  ;;  %p143_p8 = scmp.lt.s32.totalorder %s3048_s15, 5 }
   0xc   : > { %p144_p9 = pnand %p2571_p7, %p143_p8 }
   0xe   : > { %147 = sbr.rel (%p144_p9) target bundleno = 1290 (0x50a), region = 28 }
  0x13   : > { %p172_p10 = scmp.lt.s32.totalorder %s3096_s16, 3  ;;  %s3050_s30 = smov 1e-09  }
  0x14   : > { %s2682_s26 = sshll.u32 %s3096_s16, 12 }
  0x15   : > { %s3125_s24 = scalar_select %p172_p10, %s3096_s16, 3 }
  0x17   : > { %s2680_s25 = sshll.u32 %s3125_s24, 8  ;;  %s169_s24 = sand.u32 1, %s3040_s13  }
  0x18   : > { %s3133_s28 = scalar_lea.vmem %s5177_s0, %s2680_s25  ;;  %s4642_s11 = scalar_lea.vmem %s5179_s2, %s2680_s25 }
  0x19   : > { %v3136_v0 = vld [vmem:[%s3133_s28] sm:$0xff]  ;;  %v3139_v1 = vld [vmem:[%s3133_s28 + $0x8] sm:$0xff]  ;;  %v3142_v2 = vld [vmem:[%s3133_s28 + $0x10] sm:$0xff]  ;;  %s2572_s25 = sshll.u32 %s169_s24, 8  ;;  %s5137_s16 = scalar_lea.sflag [#allocation3], %s169_s24 }
  0x1a   : > { %v3145_v3 = vld [vmem:[%s3133_s28 + $0x20] sm:$0xff]  ;;  %v3148_v4 = vld [vmem:[%s3133_s28 + $0x18] sm:$0xff]  ;;  %v3151_v5 = vld [vmem:[%s3133_s28 + $0x28] sm:$0xff]  ;;  %v214_v6 = vand.u32 2147483647, %v3136_v0  ;;  %s5061_s20 = scalar_lea.vmem [#allocation2], %s2572_s25 }
  0x1b   : > { %v3155_v7 = vld [vmem:[%s3133_s28 + $0x30] sm:$0xff]  ;;  %v215_v8 = vand.u32 2147483647, %v3139_v1  ;;  %v3159_v9 = vld [vmem:[%s3133_s28 + $0x38] sm:$0xff]  ;;  %v216_v10 = vand.u32 2147483647, %v3142_v2 }
  0x1c   : > { %v218_v11 = vand.u32 2147483647, %v3145_v3  ;;  %v3164_v12 = vld [vmem:[%s3133_s28 + $0x40] sm:$0xff]  ;;  %v217_v13 = vand.u32 2147483647, %v3148_v4  ;;  %v3169_v15 = vld [vmem:[%s3133_s28 + $0x48] sm:$0xff] }
  0x1d   : > { %v219_v14 = vand.u32 2147483647, %v3151_v5  ;;  %v3172_v16 = vld [vmem:[%s3133_s28 + $0x50] sm:$0xff]  ;;  %v220_v17 = vand.u32 2147483647, %v3155_v7  ;;  %v3176_v19 = vld [vmem:[%s3133_s28 + $0x58] sm:$0xff] }
  0x1e   : > { %v246_v18 = vmax.f32.f32 %v214_v6, %v218_v11  ;;  %v3179_v20 = vld [vmem:[%s3133_s28 + $0x60] sm:$0xff]  ;;  %v221_v21 = vand.u32 2147483647, %v3159_v9  ;;  %v3183_v23 = vld [vmem:[%s3133_s28 + $0x68] sm:$0xff]  ;;  %v3186_v24 = vld [vmem:[%s3133_s28 + $0x70] sm:$0xff]  ;;  %s2481_s27 = sshll.u32 %s5061_s20, 4  ;;  %s5130_s27 = int_to_ptr.vmem [resolvable:$true] %s2481_s27 }
  0x1f   : > { %v247_v22 = vmax.f32.f32 %v215_v8, %v219_v14  ;;  %v3189_v25 = vld [vmem:[%s3133_s28 + $0x78] sm:$0xff]  ;;  %v222_v26 = vand.u32 2147483647, %v3164_v12  ;;  %v248_v27 = vmax.f32.f32 %v216_v10, %v220_v17  ;;  %v3193_v28 = vld [vmem:[%s3133_s28 + $0x80] sm:$0xff]  ;;  %v3196_v29 = vld [vmem:[%s3133_s28 + $0x88] sm:$0xff] }
  0x20   : > { %v223_v30 = vand.u32 2147483647, %v3169_v15  ;;  %v224_v31 = vand.u32 2147483647, %v3172_v16  ;;  %v249_v32 = vmax.f32.f32 %v217_v13, %v221_v21  ;;  %v3201_v33 = vld [vmem:[%s3133_s28 + $0x90] sm:$0xff]  ;;  %v3204_v34 = vld [vmem:[%s3133_s28 + $0x98] sm:$0xff] }
  0x21   : > { %v225_v35 = vand.u32 2147483647, %v3176_v19  ;;  %v226_v36 = vand.u32 2147483647, %v3179_v20  ;;  %v250_v37 = vmax.f32.f32 %v246_v18, %v222_v26  ;;  %v3209_v38 = vld [vmem:[%s3133_s28 + $0xa0] sm:$0xff]  ;;  %v3212_v39 = vld [vmem:[%s3133_s28 + $0xa8] sm:$0xff] }
  0x22   : > { %v3215_v40 = vld [vmem:[%s3133_s28 + $0xb0] sm:$0xff]  ;;  %v227_v41 = vand.u32 2147483647, %v3183_v23  ;;  %v251_v42 = vmax.f32.f32 %v247_v22, %v223_v30  ;;  %v3219_v43 = vld [vmem:[%s3133_s28 + $0xb8] sm:$0xff]  ;;  %v3222_v44 = vld [vmem:[%s3133_s28 + $0xc0] sm:$0xff]  ;;  %v252_v47 = vmax.f32.f32 %v248_v27, %v224_v31 }
  0x23   : > { %v3225_v45 = vld [vmem:[%s3133_s28 + $0xc8] sm:$0xff]  ;;  %v228_v46 = vand.u32 2147483647, %v3186_v24  ;;  %v3229_v48 = vld [vmem:[%s3133_s28 + $0xd0] sm:$0xff]  ;;  %v229_v49 = vand.u32 2147483647, %v3189_v25  ;;  %v253_v52 = vmax.f32.f32 %v249_v32, %v225_v35  ;;  %v254_v57 = vmax.f32.f32 %v250_v37, %v226_v36 }
  0x24   : > { %v230_v50 = vand.u32 2147483647, %v3193_v28  ;;  %v231_v51 = vand.u32 2147483647, %v3196_v29  ;;  %v3235_v53 = vld [vmem:[%s3133_s28 + $0xd8] sm:$0xff]  ;;  %v3238_v54 = vld [vmem:[%s3133_s28 + $0xe0] sm:$0xff]  ;;  %v255_v61 = vmax.f32.f32 %v251_v42, %v227_v41 }
  0x25   : > { %v3241_v55 = vld [vmem:[%s3133_s28 + $0xe8] sm:$0xff]  ;;  %v232_v56 = vand.u32 2147483647, %v3201_v33  ;;  %v233_v58 = vand.u32 2147483647, %v3204_v34  ;;  %v256_v8 = vmax.f32.f32 %v252_v47, %v228_v46  ;;  %v3251_v10 = vld [vmem:[%s3133_s28 + $0xf0] sm:$0xff]  ;;  %v257_v14 = vmax.f32.f32 %v253_v52, %v229_v49 }
  0x26   : > { %5291 = vst [vmem:[#allocation5_spill] sm:$0xff] %v3241_v55  ;;  %v234_v59 = vand.u32 2147483647, %v3209_v38  ;;  %v235_v60 = vand.u32 2147483647, %v3212_v39  ;;  %v3254_v11 = vld [vmem:[%s3133_s28 + $0xf8] sm:$0xff]  ;;  %v258_v17 = vmax.f32.f32 %v254_v57, %v230_v50  ;;  %v259_v18 = vmax.f32.f32 %v255_v61, %v231_v51 }
  0x27   : > { %v236_v62 = vand.u32 2147483647, %v3215_v40  ;;  %v237_v63 = vand.u32 2147483647, %v3219_v43  ;;  %v238_v6 = vand.u32 2147483647, %v3222_v44  ;;  %v260_v27 = vmax.f32.f32 %v256_v8, %v232_v56 }
  0x28   : > { %v239_v13 = vand.u32 2147483647, %v3225_v45  ;;  %v240_v21 = vand.u32 2147483647, %v3229_v48  ;;  %v241_v22 = vand.u32 2147483647, %v3235_v53  ;;  %v261_v31 = vmax.f32.f32 %v257_v14, %v233_v58 }
  0x29   : > { %v242_v26 = vand.u32 2147483647, %v3238_v54  ;;  %v243_v30 = vand.u32 2147483647, %v3241_v55  ;;  %v262_v32 = vmax.f32.f32 %v258_v17, %v234_v59  ;;  %v263_v35 = vmax.f32.f32 %v259_v18, %v235_v60  ;;  %v339_v58 = vld [vmem:[%s5178_s1 + $0x78] sm:$0xff]  ;;  %v338_v59 = vld [vmem:[%s5178_s1 + $0x70] sm:$0xff] }
  0x2a   : > { %v244_v36 = vand.u32 2147483647, %v3251_v10  ;;  %v264_v37 = vmax.f32.f32 %v260_v27, %v236_v62  ;;  %v245_v41 = vand.u32 2147483647, %v3254_v11  ;;  %v265_v42 = vmax.f32.f32 %v261_v31, %v237_v63  ;;  %2779 = vmatprep.subr.mxu0 %v339_v58  ;;  %v337_v60 = vld [vmem:[%s5178_s1 + $0x68] sm:$0xff]  ;;  %v335_v62 = vld [vmem:[%s5178_s1 + $0x58] sm:$0xff] }
  0x2b   : > { %v266_v46 = vmax.f32.f32 %v262_v32, %v238_v6  ;;  %v267_v47 = vmax.f32.f32 %v263_v35, %v239_v13  ;;  %2780 = vmatpush3.msra.mxu0 %v339_v58  ;;  %v334_v63 = vld [vmem:[%s5178_s1 + $0x50] sm:$0xff]  ;;  %v333_v6 = vld [vmem:[%s5178_s1 + $0x48] sm:$0xff]  ;;  %v332_v13 = vld [vmem:[%s5178_s1 + $0x40] sm:$0xff] }
  0x2c   : > { %v268_v49 = vmax.f32.f32 %v264_v37, %v240_v21  ;;  %v269_v50 = vmax.f32.f32 %v265_v42, %v241_v22  ;;  %2781 = vmatprep.subr.mxu0 %v338_v59  ;;  %v331_v14 = vld [vmem:[%s5178_s1 + $0x38] sm:$0xff]  ;;  %v330_v17 = vld [vmem:[%s5178_s1 + $0x30] sm:$0xff]  ;;  %v329_v18 = vld [vmem:[%s5178_s1 + $0x28] sm:$0xff] }
  0x2d   : > { %v270_v51 = vmax.f32.f32 %v266_v46, %v242_v26  ;;  %v271_v52 = vmax.f32.f32 %v267_v47, %v243_v30  ;;  %2782 = vmatpush3.msra.mxu0 %v338_v59  ;;  %v328_v21 = vld [vmem:[%s5178_s1 + $0x20] sm:$0xff]  ;;  %v327_v22 = vld [vmem:[%s5178_s1 + $0x18] sm:$0xff]  ;;  %v326_v27 = vld [vmem:[%s5178_s1 + $0x10] sm:$0xff] }
  0x2e   : > { %v272_v57 = vmax.f32.f32 %v268_v49, %v244_v36  ;;  %v273_v61 = vmax.f32.f32 %v269_v50, %v245_v41  ;;  %2783 = vmatprep.subr.mxu0 %v337_v60  ;;  %v325_v31 = vld [vmem:[%s5178_s1 + $0x8] sm:$0xff]  ;;  %v324_v35 = vld [vmem:[%s5178_s1] sm:$0xff] }
  0x2f   : > { %v274_v56 = vmax.f32.f32 %v270_v51, %v271_v52  ;;  %2784 = vmatpush3.msra.mxu0 %v337_v60 }
  0x30   : > { %v275_v8 = vmax.f32.f32 %v272_v57, %v273_v61 }
  0x32   : > { %v276_v55 = vmax.f32.f32 %v274_v56, %v275_v8 }
  0x34   : > { %277 = vmax.xlane.f32.xlu0 %v276_v55  ;;  %v336_v55 = vld [vmem:[%s5178_s1 + $0x60] sm:$0xff] }
  0x35   : > { %2785 = vmatprep.subr.mxu0 %v336_v55 }
  0x36   : > { %2786 = vmatpush3.msra.mxu0 %v336_v55 }
  0x37   : > { %2787 = vmatprep.subr.mxu0 %v335_v62 }
  0x38   : > { %2788 = vmatpush3.msra.mxu0 %v335_v62 }
  0x39   : > { %2789 = vmatprep.subr.mxu0 %v334_v63 }
  0x3a   : > { %2790 = vmatpush3.msra.mxu0 %v334_v63 }
  0x3b   : > { %2791 = vmatprep.subr.mxu0 %v333_v6 }
  0x3c   : > { %2792 = vmatpush3.msra.mxu0 %v333_v6 }
  0x3d   : > { %2793 = vmatprep.subr.mxu0 %v332_v13 }
  0x3e   : > { %2794 = vmatpush3.msra.mxu0 %v332_v13 }
  0x3f   : > { %2795 = vmatprep.subr.mxu0 %v331_v14 }
  0x40   : > { %2796 = vmatpush3.msra.mxu0 %v331_v14 }
  0x41   : > { %2797 = vmatprep.subr.mxu0 %v330_v17 }
  0x42   : > { %2798 = vmatpush3.msra.mxu0 %v330_v17 }
  0x43   : > { %2799 = vmatprep.subr.mxu0 %v329_v18 }
  0x44   : > { %2800 = vmatpush3.msra.mxu0 %v329_v18 }
  0x45   : > { %2801 = vmatprep.subr.mxu0 %v328_v21 }
  0x46   : > { %2802 = vmatpush3.msra.mxu0 %v328_v21 }
  0x47   : > { %2803 = vmatprep.subr.mxu0 %v327_v22 }
  0x48   : > { %2804 = vmatpush3.msra.mxu0 %v327_v22 }
  0x49   : > { %2805 = vmatprep.subr.mxu0 %v326_v27 }
  0x4a   : > { %2806 = vmatpush3.msra.mxu0 %v326_v27 }
  0x4b   : > { %2807 = vmatprep.subr.mxu0 %v325_v31 }
  0x4c   : > { %2808 = vmatpush3.msra.mxu0 %v325_v31 }
  0x4d   : > { %2809 = vmatprep.subr.mxu0 %v324_v35 }
  0x4e   : > { %2810 = vmatpush3.msra.mxu0 %v324_v35 }
  0xbd   : > { %v278_v26 = vpop.xlane.xlu0 %277 }
  0xbe   : > { %v279_v30 = vrot.slane %v278_v26, 4 }
  0xc0   : > { %v280_v32 = vmax.f32 %v278_v26, %v279_v30 }
  0xc2   : > { %v281_v36 = vrot.slane %v280_v32, 2 }
  0xc4   : > { %v282_v37 = vmax.f32 %v280_v32, %v281_v36 }
  0xc6   : > { %v283_v41 = vrot.slane %v282_v37, 1 }
  0xc8   : > { %v284_v42 = vmax.f32 %v282_v37, %v283_v41 }
  0xca   : > { %2939 = vpush %v284_v42 }
  0xfb   : > { %s2940_s29 = spop %2939 }
  0xfc   : > { %s286_s4 = smax.f32 %s3050_s30, %s2940_s29  ;;  %s5128_s30 = scalar_lea.hbm %s5180_s3, %s2682_s26 }
  0xfd   : > { %v287_v46 = vstv %s286_s4  ;;  %s2988_s4 = scalar_lea.vmem %s5130_s27, 4096 }
  0xfe   : > { %2986 = vrcp.f32 %v287_v46  ;;  %p2989_p11 = scmp.ne.s32.totalorder %s5130_s27, %s2988_s4 }
 0x100   : > { %p2990_p12 = pnand %p2989_p11, %p3113_p5 }
 0x102   : > { %p2991_p13 = pneg %p2990_p12 }
 0x10b   : > { %v2987_v47 = vpop.eup %2986 }
 0x10c   : > { %2941 = vpush %v2987_v47 }
 0x13d   : > { %s2942_s5 = spop %2941 }
 0x13e   : > { %s290_s6 = smul.f32 0.95, %s2942_s5  ;;  %s3052_s5 = smov [#allocation2]  }
 0x140   : > { %v3311_v49 = vstv %s290_s6  ;;  %s2992_s6 = sshll.u32 %s3052_s5, 4  ;;  %s2993_s6 = int_to_ptr.vmem [resolvable:$false] %s2992_s6 }
 0x141   : > { %v292_v50 = vmul.f32 %v3311_v49, %v3136_v0  ;;  %v293_v51 = vmul.f32 %v3311_v49, %v3139_v1  ;;  %v294_v52 = vmul.f32 %v3311_v49, %v3142_v2  ;;  %v295_v57 = vmul.f32 %v3311_v49, %v3148_v4  ;;  %s2994_s7 = scalar_lea.vmem %s2993_s6, 8192  ;;  %p2995_p0 = scmp.lt.s32.totalorder %s5130_s27, %s2993_s6 }
 0x142   : > { %v296_v61 = vmul.f32 %v3311_v49, %v3145_v3  ;;  %v297_v0 = vmul.f32 %v3311_v49, %v3151_v5  ;;  %v298_v1 = vmul.f32 %v3311_v49, %v3155_v7  ;;  %v299_v2 = vmul.f32 %v3311_v49, %v3159_v9  ;;  %p2996_p1 = scmp.lt.s32.totalorder %s2994_s7, %s2988_s4 }
 0x143   : > { %2811 = vmatprep.mubr.f32.mxu0 %v292_v50  ;;  %v300_v56 = vmul.f32 %v3311_v49, %v3164_v12  ;;  %v301_v3 = vmul.f32 %v3311_v49, %v3169_v15  ;;  %v302_v4 = vmul.f32 %v3311_v49, %v3172_v16  ;;  %v303_v5 = vmul.f32 %v3311_v49, %v3176_v19 }
 0x144   : > { %2812 = vmatmul.mubr.f32.vlgmr.msra.gmra.mxu0 %v293_v51  ;;  %v304_v7 = vmul.f32 %v3311_v49, %v3179_v20  ;;  %v305_v9 = vmul.f32 %v3311_v49, %v3183_v23  ;;  %v306_v12 = vmul.f32 %v3311_v49, %v3186_v24  ;;  %v307_v15 = vmul.f32 %v3311_v49, %v3189_v25  ;;  %p2997_p2 = por %p2996_p1, %p2995_p0 }
 0x145   : > { %2814 = vmatprep.mubr.f32.mxu0 %v294_v52  ;;  %v308_v16 = vmul.f32 %v3311_v49, %v3193_v28  ;;  %v309_v19 = vmul.f32 %v3311_v49, %v3196_v29  ;;  %v310_v20 = vmul.f32 %v3311_v49, %v3201_v33  ;;  %v311_v23 = vmul.f32 %v3311_v49, %v3204_v34 }
 0x146   : > { %v312_v24 = vmul.f32 %v3311_v49, %v3209_v38  ;;  %v313_v25 = vmul.f32 %v3311_v49, %v3212_v39  ;;  %v314_v28 = vmul.f32 %v3311_v49, %v3215_v40  ;;  %v315_v29 = vmul.f32 %v3311_v49, %v3219_v43  ;;  %v5292_v43 = vld [vmem:[#allocation5_spill] sm:$0xff]  ;;  %p2998_p3 = pnand %p2997_p2, %p2991_p13 }
 0x147   : > { %v316_v33 = vmul.f32 %v3311_v49, %v3222_v44  ;;  %v317_v34 = vmul.f32 %v3311_v49, %v3225_v45  ;;  %v318_v38 = vmul.f32 %v3311_v49, %v3229_v48  ;;  %v319_v39 = vmul.f32 %v3311_v49, %v3235_v53  ;;  %v3382_v53 = vld [vmem:[%s5178_s1 + $0x80] ss:$0 sm:$0xff] }
 0x148   : > { %2815 = vmatmul.mubr.f32.gmra.mxu0 %v295_v57  ;;  %v320_v40 = vmul.f32 %v3311_v49, %v3238_v54  ;;  %v321_v44 = vmul.f32 %v3311_v49, %v5292_v43  ;;  %v322_v8 = vmul.f32 %v3311_v49, %v3251_v10  ;;  %v323_v45 = vmul.f32 %v3311_v49, %v3254_v11 }
 0x149   : > { %2817 = vmatprep.mubr.f32.mxu0 %v296_v61  ;;  %v587_v48 = vlaneseq }
 0x14b   : > { %v3377_v58 = vand.u32 127, %v587_v48 }
 0x14c   : > { %2818 = vmatmul.mubr.f32.gmra.mxu0 %v297_v0 }
 0x14d   : > { %2820 = vmatprep.mubr.f32.mxu0 %v298_v1  ;;  %5293 = vst [vmem:[#allocation5_spill] sm:$0xff] %v3377_v58  ;;  %vm1361_vm0 = vcmp.ge.s32.totalorder %v3377_v58, 64  ;;  %vm590_vm1 = vcmp.lt.s32.totalorder %v3377_v58, 64 }
 0x150   : > { %2821 = vmatmul.mubr.f32.gmra.mxu0 %v299_v2 }
 0x151   : > { %2823 = vmatprep.mubr.f32.mxu0 %v300_v56 }
 0x154   : > { %2824 = vmatmul.mubr.f32.gmra.mxu0 %v301_v3 }
 0x155   : > { %2826 = vmatprep.mubr.f32.mxu0 %v302_v4 }
 0x158   : > { %2827 = vmatmul.mubr.f32.gmra.mxu0 %v303_v5 }
 0x159   : > { %2829 = vmatprep.mubr.f32.mxu0 %v304_v7 }
 0x15c   : > { %2830 = vmatmul.mubr.f32.gmra.mxu0 %v305_v9 }
 0x15d   : > { %2832 = vmatprep.mubr.f32.mxu0 %v306_v12 }
 0x160   : > { %2833 = vmatmul.mubr.f32.gmra.mxu0 %v307_v15 }
 0x161   : > { %2835 = vmatprep.mubr.f32.mxu0 %v308_v16 }
 0x164   : > { %2836 = vmatmul.mubr.f32.gmra.mxu0 %v309_v19 }
 0x165   : > { %2838 = vmatprep.mubr.f32.mxu0 %v310_v20 }
 0x168   : > { %2839 = vmatmul.mubr.f32.gmra.mxu0 %v311_v23 }
 0x169   : > { %2841 = vmatprep.mubr.f32.mxu0 %v312_v24 }
 0x16c   : > { %2842 = vmatmul.mubr.f32.gmra.mxu0 %v313_v25 }
 0x16d   : > { %2844 = vmatprep.mubr.f32.mxu0 %v314_v28 }
 0x170   : > { %2845 = vmatmul.mubr.f32.gmra.mxu0 %v315_v29 }
 0x171   : > { %2847 = vmatprep.mubr.f32.mxu0 %v316_v33 }
 0x174   : > { %2848 = vmatmul.mubr.f32.gmra.mxu0 %v317_v34 }
 0x175   : > { %2850 = vmatprep.mubr.f32.mxu0 %v318_v38 }
 0x178   : > { %2851 = vmatmul.mubr.f32.gmra.mxu0 %v319_v39 }
 0x179   : > { %2853 = vmatprep.mubr.f32.mxu0 %v320_v40 }
 0x17c   : > { %2854 = vmatmul.mubr.f32.gmra.mxu0 %v321_v44 }
 0x17d   : > { %2856 = vmatprep.mubr.f32.mxu0 %v322_v8 }
 0x180   : > { %2857 = vmatmul.mubr.f32.gmra.mxu0 %v323_v45 }
 0x204   : > { %v2813_v54 = vpop.f32.mrf.mxu0 }
 0x205   : > { %v434_v10 = vadd.f32 %v2813_v54, %v3382_v53 }
 0x206   : > { %v428_v59 = vpop.f32.mrf.mxu0 }
 0x207   : > { %v429_v60 = vadd.f32 %v3382_v53, %v428_v59  ;;  %v3390_v11 = vsel %vm1361_vm0, %v434_v10, inf  ;;  %v3394_v55 = vsel %vm590_vm1, %v434_v10, inf }
 0x208   : > { %1398 = vmin.xlane.f32.xlu0 %v3390_v11  ;;  %626 = vmin.xlane.f32.xlu1 %v3394_v55  ;;  %v2816_v62 = vpop.f32.mrf.mxu0 }
 0x209   : > { %v444_v6 = vadd.f32 %v2816_v62, %v3382_v53  ;;  %v3401_v13 = vsel %vm1361_vm0, %v429_v60, inf  ;;  %v3405_v14 = vsel %vm590_vm1, %v429_v60, inf }
 0x20a   : > { %v438_v63 = vpop.f32.mrf.mxu0 }
 0x20b   : > { %v439_v21 = vadd.f32 %v3382_v53, %v438_v63  ;;  %v3412_v22 = vsel %vm590_vm1, %v444_v6, inf  ;;  %v3416_v26 = vsel %vm1361_vm0, %v444_v6, inf }
 0x20c   : > { %v2819_v17 = vpop.f32.mrf.mxu0  ;;  %1396 = vmin.xlane.f32.xlu1 %v3401_v13  ;;  %624 = vmin.xlane.f32.xlu0 %v3405_v14 }
 0x20d   : > { %v454_v31 = vadd.f32 %v2819_v17, %v3382_v53  ;;  %v3423_v32 = vsel %vm590_vm1, %v439_v21, inf  ;;  %v3427_v35 = vsel %vm1361_vm0, %v439_v21, inf }
 0x20e   : > { %v448_v18 = vpop.f32.mrf.mxu0 }
 0x20f   : > { %v449_v41 = vadd.f32 %v3382_v53, %v448_v18  ;;  %v3434_v42 = vsel %vm590_vm1, %v454_v31, inf  ;;  %v3438_v46 = vsel %vm1361_vm0, %v454_v31, inf }
 0x210   : > { %v2822_v27 = vpop.f32.mrf.mxu0  ;;  %630 = vmin.xlane.f32.xlu1 %v3412_v22  ;;  %1402 = vmin.xlane.f32.xlu0 %v3416_v26 }
 0x211   : > { %v464_v50 = vadd.f32 %v2822_v27, %v3382_v53  ;;  %v3445_v51 = vsel %vm590_vm1, %v449_v41, inf  ;;  %v3449_v52 = vsel %vm1361_vm0, %v449_v41, inf }
 0x212   : > { %v458_v30 = vpop.f32.mrf.mxu0 }
 0x213   : > { %v459_v0 = vadd.f32 %v3382_v53, %v458_v30  ;;  %v3458_v1 = vsel %vm590_vm1, %v464_v50, inf  ;;  %v3462_v2 = vsel %vm1361_vm0, %v464_v50, inf }
 0x214   : > { %v2825_v36 = vpop.f32.mrf.mxu0  ;;  %628 = vmin.xlane.f32.xlu1 %v3423_v32  ;;  %1400 = vmin.xlane.f32.xlu0 %v3427_v35 }
 0x215   : > { %v474_v3 = vadd.f32 %v2825_v36, %v3382_v53  ;;  %v3473_v5 = vsel %vm590_vm1, %v459_v0, inf  ;;  %v3477_v7 = vsel %vm1361_vm0, %v459_v0, inf }
 0x216   : > { %v468_v37 = vpop.f32.mrf.mxu0 }
 0x217   : > { %v469_v15 = vadd.f32 %v3382_v53, %v468_v37  ;;  %v3485_v19 = vsel %vm590_vm1, %v474_v3, inf  ;;  %v3490_v23 = vsel %vm1361_vm0, %v474_v3, inf }
 0x218   : > { %v2828_v47 = vpop.f32.mrf.mxu0  ;;  %634 = vmin.xlane.f32.xlu1 %v3434_v42  ;;  %1406 = vmin.xlane.f32.xlu0 %v3438_v46 }
 0x219   : > { %v484_v38 = vadd.f32 %v2828_v47, %v3382_v53  ;;  %v3514_v40 = vsel %vm590_vm1, %v469_v15, inf  ;;  %v3519_v44 = vsel %vm1361_vm0, %v469_v15, inf }
 0x21a   : > { %v478_v49 = vpop.f32.mrf.mxu0 }
 0x21b   : > { %v479_v60 = vadd.f32 %v3382_v53, %v478_v49  ;;  %v3543_v63 = vsel %vm590_vm1, %v484_v38, inf  ;;  %v3548_v17 = vsel %vm1361_vm0, %v484_v38, inf }
 0x21c   : > { %v2831_v57 = vpop.f32.mrf.mxu0  ;;  %632 = vmin.xlane.f32.xlu1 %v3445_v51  ;;  %1404 = vmin.xlane.f32.xlu0 %v3449_v52 }
 0x21d   : > { %v494_v37 = vadd.f32 %v2831_v57, %v3382_v53  ;;  %v3572_v47 = vsel %vm590_vm1, %v479_v60, inf  ;;  %v3577_v50 = vsel %vm1361_vm0, %v479_v60, inf }
 0x21e   : > { %v3453_v61 = vpop.f32.mrf.mxu0 }
 0x21f   : > { %v3607_v38 = vsel %vm1361_vm0, %v494_v37, inf }
 0x220   : > { %v3464_v56 = vpop.f32.mrf.mxu0  ;;  %638 = vmin.xlane.f32.xlu1 %v3458_v1  ;;  %1410 = vmin.xlane.f32.xlu0 %v3462_v2  ;;  %5294 = vst [vmem:[#allocation6_spill] sm:$0xff] %v3607_v38 }
 0x222   : > { %v3469_v4 = vpop.f32.mrf.mxu0 }
 0x224   : > { %v2837_v9 = vpop.f32.mrf.mxu0  ;;  %636 = vmin.xlane.f32.xlu1 %v3473_v5  ;;  %1408 = vmin.xlane.f32.xlu0 %v3477_v7 }
 0x225   : > { %v514_v12 = vadd.f32 %v2837_v9, %v3382_v53 }
 0x226   : > { %v508_v16 = vpop.f32.mrf.mxu0 }
 0x227   : > { %v509_v20 = vadd.f32 %v3382_v53, %v508_v16  ;;  %v3494_v24 = vsel %vm590_vm1, %v514_v12, inf  ;;  %v3498_v25 = vsel %vm1361_vm0, %v514_v12, inf  ;;  %v489_v16 = vadd.f32 %v3382_v53, %v3453_v61 }
 0x228   : > { %v2840_v28 = vpop.f32.mrf.mxu0  ;;  %642 = vmin.xlane.f32.xlu1 %v3485_v19  ;;  %1414 = vmin.xlane.f32.xlu0 %v3490_v23 }
 0x229   : > { %v524_v29 = vadd.f32 %v2840_v28, %v3382_v53  ;;  %v3505_v33 = vsel %vm590_vm1, %v509_v20, inf  ;;  %v3509_v34 = vsel %vm1361_vm0, %v509_v20, inf  ;;  %v3602_v28 = vsel %vm590_vm1, %v494_v37, inf }
 0x22a   : > { %v518_v39 = vpop.f32.mrf.mxu0  ;;  %v3637_v37 = vsel %vm1361_vm0, %v489_v16, inf }
 0x22b   : > { %v519_v43 = vadd.f32 %v3382_v53, %v518_v39  ;;  %v3523_v8 = vsel %vm590_vm1, %v524_v29, inf  ;;  %v3527_v45 = vsel %vm1361_vm0, %v524_v29, inf  ;;  %5296 = vst [vmem:[#allocation8_spill] sm:$0xff] %v3637_v37 }
 0x22c   : > { %v2843_v48 = vpop.f32.mrf.mxu0  ;;  %640 = vmin.xlane.f32.xlu1 %v3514_v40  ;;  %1412 = vmin.xlane.f32.xlu0 %v3519_v44 }
 0x22d   : > { %v534_v54 = vadd.f32 %v2843_v48, %v3382_v53  ;;  %v3534_v10 = vsel %vm590_vm1, %v519_v43, inf  ;;  %v3538_v59 = vsel %vm1361_vm0, %v519_v43, inf }
 0x22e   : > { %v528_v62 = vpop.f32.mrf.mxu0 }
 0x22f   : > { %v529_v6 = vadd.f32 %v3382_v53, %v528_v62  ;;  %v3552_v18 = vsel %vm590_vm1, %v534_v54, inf  ;;  %v3556_v21 = vsel %vm1361_vm0, %v534_v54, inf  ;;  %v504_v62 = vadd.f32 %v3464_v56, %v3382_v53 }
 0x230   : > { %v2846_v27 = vpop.f32.mrf.mxu0  ;;  %646 = vmin.xlane.f32.xlu1 %v3543_v63  ;;  %1418 = vmin.xlane.f32.xlu0 %v3548_v17 }
 0x231   : > { %v544_v30 = vadd.f32 %v2846_v27, %v3382_v53  ;;  %v3563_v31 = vsel %vm590_vm1, %v529_v6, inf  ;;  %v3567_v36 = vsel %vm1361_vm0, %v529_v6, inf  ;;  %v3632_v27 = vsel %vm590_vm1, %v489_v16, inf }
 0x232   : > { %v538_v41 = vpop.f32.mrf.mxu0  ;;  %5295 = vst [vmem:[#allocation7_spill] sm:$0xff] %v3632_v27 }
 0x233   : > { %v539_v49 = vadd.f32 %v3382_v53, %v538_v41  ;;  %v3581_v0 = vsel %vm590_vm1, %v544_v30, inf  ;;  %v3585_v3 = vsel %vm1361_vm0, %v544_v30, inf }
 0x234   : > { %v2849_v57 = vpop.f32.mrf.mxu0  ;;  %644 = vmin.xlane.f32.xlu1 %v3572_v47  ;;  %1416 = vmin.xlane.f32.xlu0 %v3577_v50 }
 0x235   : > { %v554_v9 = vadd.f32 %v2849_v57, %v3382_v53  ;;  %v3592_v12 = vsel %vm590_vm1, %v539_v49, inf  ;;  %v3596_v15 = vsel %vm1361_vm0, %v539_v49, inf }
 0x236   : > { %v548_v20 = vpop.f32.mrf.mxu0 }
 0x237   : > { %v549_v29 = vadd.f32 %v3382_v53, %v548_v20  ;;  %v3611_v39 = vsel %vm590_vm1, %v554_v9, inf  ;;  %v3615_v43 = vsel %vm1361_vm0, %v554_v9, inf  ;;  %v499_v20 = vadd.f32 %v3382_v53, %v3469_v4 }
 0x238   : > { %v2852_v61 = vpop.f32.mrf.mxu0  ;;  %650 = vmin.xlane.f32.xlu1 %v3602_v28  ;;  %1422 = vmin.xlane.f32.xlu0 %v3607_v38 }
 0x239   : > { %v564_v48 = vadd.f32 %v2852_v61, %v3382_v53  ;;  %v3622_v54 = vsel %vm590_vm1, %v549_v29, inf  ;;  %v3626_v60 = vsel %vm1361_vm0, %v549_v29, inf  ;;  %v3662_v61 = vsel %vm590_vm1, %v504_v62, inf }
 0x23a   : > { %v558_v6 = vpop.f32.mrf.mxu0  ;;  %5297 = vst [vmem:[#allocation9_spill] sm:$0xff] %v3662_v61 }
 0x23b   : > { %v559_v30 = vadd.f32 %v3382_v53, %v558_v6  ;;  %v3641_v41 = vsel %vm590_vm1, %v564_v48, inf  ;;  %v3645_v49 = vsel %vm1361_vm0, %v564_v48, inf  ;;  %v3667_v6 = vsel %vm1361_vm0, %v504_v62, inf }
 0x23c   : > { %v2855_v56 = vpop.f32.mrf.mxu0  ;;  %648 = vmin.xlane.f32.xlu1 %v3632_v27  ;;  %1420 = vmin.xlane.f32.xlu0 %v3637_v37  ;;  %5298 = vst [vmem:[#allocation10_spill] sm:$0xff] %v3667_v6 }
 0x23d   : > { %v574_v57 = vadd.f32 %v2855_v56, %v3382_v53  ;;  %v3652_v9 = vsel %vm590_vm1, %v559_v30, inf  ;;  %v3656_v16 = vsel %vm1361_vm0, %v559_v30, inf }
 0x23e   : > { %v568_v29 = vpop.f32.mrf.mxu0 }
 0x23f   : > { %v569_v48 = vadd.f32 %v3382_v53, %v568_v29  ;;  %v3671_v56 = vsel %vm590_vm1, %v574_v57, inf  ;;  %v3675_v30 = vsel %vm1361_vm0, %v574_v57, inf  ;;  %v3690_v57 = vsel %vm590_vm1, %v499_v20, inf }
 0x240   : > { %v2858_v4 = vpop.f32.mrf.mxu0  ;;  %654 = vmin.xlane.f32.xlu1 %v3662_v61  ;;  %1426 = vmin.xlane.f32.xlu0 %v3667_v6  ;;  %v3695_v6 = vsel %vm1361_vm0, %v499_v20, inf }
 0x241   : > { %v584_v37 = vadd.f32 %v2858_v4, %v3382_v53  ;;  %v3682_v29 = vsel %vm590_vm1, %v569_v48, inf  ;;  %v3686_v62 = vsel %vm1361_vm0, %v569_v48, inf }
 0x242   : > { %5299 = vst [vmem:[#allocation11_spill] sm:$0xff] %v3686_v62  ;;  %v578_v27 = vpop.f32.mrf.mxu0 }
 0x243   : > { %v579_v38 = vadd.f32 %v3382_v53, %v578_v27  ;;  %v3699_v4 = vsel %vm590_vm1, %v584_v37, inf  ;;  %v3703_v61 = vsel %vm1361_vm0, %v584_v37, inf }
 0x244   : > { %5300 = vst [vmem:[#allocation12_spill] sm:$0xff] %v3699_v4  ;;  %5301 = vst [vmem:[#allocation13_spill] sm:$0xff] %v3703_v61  ;;  %652 = vmin.xlane.f32.xlu1 %v3690_v57  ;;  %1424 = vmin.xlane.f32.xlu0 %v3695_v6 }
 0x245   : > { %v3709_v48 = vsel %vm590_vm1, %v579_v38, inf  ;;  %v3713_v53 = vsel %vm1361_vm0, %v579_v38, inf }
 0x246   : > { %5302 = vst [vmem:[#allocation14_spill] sm:$0xff] %v3709_v48  ;;  %5303 = vst [vmem:[#allocation15_spill] sm:$0xff] %v3713_v53 }
 0x248   : > { %658 = vmin.xlane.f32.xlu1 %v3494_v24  ;;  %1430 = vmin.xlane.f32.xlu0 %v3498_v25 }
 0x24c   : > { %656 = vmin.xlane.f32.xlu1 %v3505_v33  ;;  %1428 = vmin.xlane.f32.xlu0 %v3509_v34 }
 0x250   : > { %662 = vmin.xlane.f32.xlu1 %v3523_v8  ;;  %1434 = vmin.xlane.f32.xlu0 %v3527_v45 }
 0x254   : > { %660 = vmin.xlane.f32.xlu1 %v3534_v10  ;;  %1432 = vmin.xlane.f32.xlu0 %v3538_v59 }
 0x258   : > { %666 = vmin.xlane.f32.xlu1 %v3552_v18  ;;  %1438 = vmin.xlane.f32.xlu0 %v3556_v21 }
 0x25c   : > { %664 = vmin.xlane.f32.xlu1 %v3563_v31  ;;  %1436 = vmin.xlane.f32.xlu0 %v3567_v36 }
 0x260   : > { %670 = vmin.xlane.f32.xlu1 %v3581_v0  ;;  %1442 = vmin.xlane.f32.xlu0 %v3585_v3 }
 0x264   : > { %668 = vmin.xlane.f32.xlu1 %v3592_v12  ;;  %1440 = vmin.xlane.f32.xlu0 %v3596_v15 }
 0x268   : > { %674 = vmin.xlane.f32.xlu1 %v3611_v39  ;;  %1446 = vmin.xlane.f32.xlu0 %v3615_v43 }
 0x26c   : > { %672 = vmin.xlane.f32.xlu1 %v3622_v54  ;;  %1444 = vmin.xlane.f32.xlu0 %v3626_v60 }
 0x270   : > { %678 = vmin.xlane.f32.xlu1 %v3641_v41  ;;  %1450 = vmin.xlane.f32.xlu0 %v3645_v49 }
 0x274   : > { %676 = vmin.xlane.f32.xlu1 %v3652_v9  ;;  %1448 = vmin.xlane.f32.xlu0 %v3656_v16 }
 0x278   : > { %682 = vmin.xlane.f32.xlu1 %v3671_v56  ;;  %1454 = vmin.xlane.f32.xlu0 %v3675_v30 }
 0x27c   : > { %680 = vmin.xlane.f32.xlu1 %v3682_v29  ;;  %1452 = vmin.xlane.f32.xlu0 %v3686_v62 }
 0x280   : > { %686 = vmin.xlane.f32.xlu1 %v3699_v4  ;;  %1458 = vmin.xlane.f32.xlu0 %v3703_v61 }
 0x284   : > { %684 = vmin.xlane.f32.xlu1 %v3709_v48  ;;  %1456 = vmin.xlane.f32.xlu0 %v3713_v53 }
 0x291   : > { %v1399_v38 = vpop.xlane.xlu0 %1398  ;;  %v627_v27 = vpop.xlane.xlu1 %626 }
 0x292   : > { %vm1461_vm2 = vcmp.le.f32.partialorder %v3390_v11, %v1399_v38  ;;  %vm689_vm3 = vcmp.le.f32.partialorder %v3394_v55, %v627_v27 }
 0x293   : > { %v3750_v37 = vsel %vm1461_vm2, %v3377_v58, 128  ;;  %v3753_v20 = vsel %vm689_vm3, %v3377_v58, 128 }
 0x294   : > { %v767_v4 = vshra.s32 %v3753_v20, 16  ;;  %v1539_v61 = vshra.s32 %v3750_v37, 16 }
 0x295   : > { %v1397_v62 = vpop.xlane.xlu1 %1396  ;;  %v625_v48 = vpop.xlane.xlu0 %624 }
 0x296   : > { %vm1460_vm4 = vcmp.le.f32.partialorder %v3401_v13, %v1397_v62  ;;  %vm688_vm5 = vcmp.le.f32.partialorder %v3405_v14, %v625_v48  ;;  %v3759_v53 = vcvt.s32.f32 %v767_v4  ;;  %v3761_v11 = vcvt.s32.f32 %v1539_v61 }
 0x297   : > { %v3764_v55 = vsel %vm1460_vm4, %v3377_v58, 128  ;;  %v3767_v38 = vsel %vm688_vm5, %v3377_v58, 128 }
 0x298   : > { %5304 = vst [vmem:[#allocation16_spill] sm:$0xff] %v3759_v53  ;;  %5305 = vst [vmem:[#allocation17_spill] sm:$0xff] %v3761_v11  ;;  %770 = vmin.xlane.f32.xlu1 %v3759_v53  ;;  %1542 = vmin.xlane.f32.xlu0 %v3761_v11  ;;  %v1525_v27 = vshra.s32 %v3764_v55, 16  ;;  %v753_v13 = vshra.s32 %v3767_v38, 16 }
 0x299   : > { %v631_v62 = vpop.xlane.xlu1 %630  ;;  %v1403_v14 = vpop.xlane.xlu0 %1402 }
 0x29a   : > { %vm691_vm6 = vcmp.le.f32.partialorder %v3412_v22, %v631_v62  ;;  %vm1463_vm7 = vcmp.le.f32.partialorder %v3416_v26, %v1403_v14  ;;  %v3775_v61 = vcvt.s32.f32 %v1525_v27  ;;  %v3777_v4 = vcvt.s32.f32 %v753_v13 }
 0x29b   : > { %v3780_v48 = vsel %vm691_vm6, %v3377_v58, 128  ;;  %v3783_v53 = vsel %vm1463_vm7, %v3377_v58, 128 }
 0x29c   : > { %5306 = vst [vmem:[#allocation18_spill] sm:$0xff] %v3775_v61  ;;  %5307 = vst [vmem:[#allocation19_spill] sm:$0xff] %v3777_v4  ;;  %1528 = vmin.xlane.f32.xlu0 %v3775_v61  ;;  %756 = vmin.xlane.f32.xlu1 %v3777_v4  ;;  %v795_v11 = vshra.s32 %v3780_v48, 16  ;;  %v1567_v22 = vshra.s32 %v3783_v53, 16 }
 0x29d   : > { %v629_v62 = vpop.xlane.xlu1 %628  ;;  %v1401_v26 = vpop.xlane.xlu0 %1400 }
 0x29e   : > { %vm690_vm8 = vcmp.le.f32.partialorder %v3423_v32, %v629_v62  ;;  %vm1462_vm9 = vcmp.le.f32.partialorder %v3427_v35, %v1401_v26  ;;  %v3791_v27 = vcvt.s32.f32 %v795_v11  ;;  %v3793_v13 = vcvt.s32.f32 %v1567_v22 }
 0x29f   : > { %v3796_v14 = vsel %vm690_vm8, %v3377_v58, 128  ;;  %v3799_v61 = vsel %vm1462_vm9, %v3377_v58, 128 }
 0x2a0   : > { %5308 = vst [vmem:[#allocation20_spill] sm:$0xff] %v3791_v27  ;;  %5309 = vst [vmem:[#allocation21_spill] sm:$0xff] %v3793_v13  ;;  %798 = vmin.xlane.f32.xlu1 %v3791_v27  ;;  %1570 = vmin.xlane.f32.xlu0 %v3793_v13  ;;  %v781_v4 = vshra.s32 %v3796_v14, 16  ;;  %v1553_v32 = vshra.s32 %v3799_v61, 16 }
 0x2a1   : > { %v635_v62 = vpop.xlane.xlu1 %634  ;;  %v1407_v35 = vpop.xlane.xlu0 %1406 }
 0x2a2   : > { %vm693_vm10 = vcmp.le.f32.partialorder %v3434_v42, %v635_v62  ;;  %vm1465_vm11 = vcmp.le.f32.partialorder %v3438_v46, %v1407_v35  ;;  %v3807_v11 = vcvt.s32.f32 %v781_v4  ;;  %v3809_v22 = vcvt.s32.f32 %v1553_v32 }
 0x2a3   : > { %v3812_v26 = vsel %vm693_vm10, %v3377_v58, 128  ;;  %v3815_v27 = vsel %vm1465_vm11, %v3377_v58, 128 }
 0x2a4   : > { %5310 = vst [vmem:[#allocation22_spill] sm:$0xff] %v3807_v11  ;;  %5311 = vst [vmem:[#allocation23_spill] sm:$0xff] %v3809_v22  ;;  %784 = vmin.xlane.f32.xlu1 %v3807_v11  ;;  %1556 = vmin.xlane.f32.xlu0 %v3809_v22  ;;  %v823_v13 = vshra.s32 %v3812_v26, 16  ;;  %v1595_v42 = vshra.s32 %v3815_v27, 16 }
 0x2a5   : > { %v633_v62 = vpop.xlane.xlu1 %632  ;;  %v1405_v46 = vpop.xlane.xlu0 %1404 }
 0x2a6   : > { %vm692_vm12 = vcmp.le.f32.partialorder %v3445_v51, %v633_v62  ;;  %vm1464_vm13 = vcmp.le.f32.partialorder %v3449_v52, %v1405_v46  ;;  %v3823_v4 = vcvt.s32.f32 %v823_v13  ;;  %v3825_v32 = vcvt.s32.f32 %v1595_v42 }
 0x2a7   : > { %v3828_v35 = vsel %vm692_vm12, %v3377_v58, 128  ;;  %v3831_v11 = vsel %vm1464_vm13, %v3377_v58, 128 }
 0x2a8   : > { %5312 = vst [vmem:[#allocation24_spill] sm:$0xff] %v3823_v4  ;;  %5313 = vst [vmem:[#allocation25_spill] sm:$0xff] %v3825_v32  ;;  %826 = vmin.xlane.f32.xlu1 %v3823_v4  ;;  %1598 = vmin.xlane.f32.xlu0 %v3825_v32  ;;  %v809_v22 = vshra.s32 %v3828_v35, 16  ;;  %v1581_v51 = vshra.s32 %v3831_v11, 16 }
 0x2a9   : > { %v639_v62 = vpop.xlane.xlu1 %638  ;;  %v1411_v52 = vpop.xlane.xlu0 %1410 }
 0x2aa   : > { %vm695_vm14 = vcmp.le.f32.partialorder %v3458_v1, %v639_v62  ;;  %vm1467_vm15 = vcmp.le.f32.partialorder %v3462_v2, %v1411_v52  ;;  %v3839_v13 = vcvt.s32.f32 %v809_v22  ;;  %v3841_v42 = vcvt.s32.f32 %v1581_v51 }
 0x2ab   : > { %v3844_v46 = vsel %vm695_vm14, %v3377_v58, 128  ;;  %v3847_v4 = vsel %vm1467_vm15, %v3377_v58, 128 }
 0x2ac   : > { %5314 = vst [vmem:[#allocation26_spill] sm:$0xff] %v3839_v13  ;;  %5315 = vst [vmem:[#allocation27_spill] sm:$0xff] %v3841_v42  ;;  %812 = vmin.xlane.f32.xlu1 %v3839_v13  ;;  %1584 = vmin.xlane.f32.xlu0 %v3841_v42  ;;  %v851_v32 = vshra.s32 %v3844_v46, 16  ;;  %v1623_v1 = vshra.s32 %v3847_v4, 16 }
 0x2ad   : > { %v637_v62 = vpop.xlane.xlu1 %636  ;;  %v1409_v2 = vpop.xlane.xlu0 %1408 }
 0x2ae   : > { %vm694_vm0 = vcmp.le.f32.partialorder %v3473_v5, %v637_v62  ;;  %vm1466_vm1 = vcmp.le.f32.partialorder %v3477_v7, %v1409_v2  ;;  %v3855_v22 = vcvt.s32.f32 %v851_v32  ;;  %v3857_v51 = vcvt.s32.f32 %v1623_v1 }
 0x2af   : > { %v3860_v52 = vsel %vm694_vm0, %v3377_v58, 128  ;;  %v3863_v13 = vsel %vm1466_vm1, %v3377_v58, 128 }
 0x2b0   : > { %5316 = vst [vmem:[#allocation28_spill] sm:$0xff] %v3855_v22  ;;  %5317 = vst [vmem:[#allocation29_spill] sm:$0xff] %v3857_v51  ;;  %854 = vmin.xlane.f32.xlu1 %v3855_v22  ;;  %1626 = vmin.xlane.f32.xlu0 %v3857_v51  ;;  %v837_v42 = vshra.s32 %v3860_v52, 16  ;;  %v1609_v5 = vshra.s32 %v3863_v13, 16 }
 0x2b1   : > { %v643_v62 = vpop.xlane.xlu1 %642  ;;  %v1415_v7 = vpop.xlane.xlu0 %1414 }
 0x2b2   : > { %vm697_vm2 = vcmp.le.f32.partialorder %v3485_v19, %v643_v62  ;;  %vm1469_vm3 = vcmp.le.f32.partialorder %v3490_v23, %v1415_v7  ;;  %v3871_v32 = vcvt.s32.f32 %v837_v42  ;;  %v3873_v1 = vcvt.s32.f32 %v1609_v5 }
 0x2b3   : > { %v3876_v2 = vsel %vm697_vm2, %v3377_v58, 128  ;;  %v3879_v22 = vsel %vm1469_vm3, %v3377_v58, 128 }
 0x2b4   : > { %5318 = vst [vmem:[#allocation30_spill] sm:$0xff] %v3871_v32  ;;  %5319 = vst [vmem:[#allocation31_spill] sm:$0xff] %v3873_v1  ;;  %840 = vmin.xlane.f32.xlu1 %v3871_v32  ;;  %1612 = vmin.xlane.f32.xlu0 %v3873_v1  ;;  %v879_v51 = vshra.s32 %v3876_v2, 16  ;;  %v1651_v19 = vshra.s32 %v3879_v22, 16 }
 0x2b5   : > { %v641_v62 = vpop.xlane.xlu1 %640  ;;  %v1413_v23 = vpop.xlane.xlu0 %1412 }
 0x2b6   : > { %vm696_vm4 = vcmp.le.f32.partialorder %v3514_v40, %v641_v62  ;;  %vm1468_vm5 = vcmp.le.f32.partialorder %v3519_v44, %v1413_v23  ;;  %v3887_v42 = vcvt.s32.f32 %v879_v51  ;;  %v3889_v5 = vcvt.s32.f32 %v1651_v19 }
 0x2b7   : > { %v3892_v7 = vsel %vm696_vm4, %v3377_v58, 128  ;;  %v3895_v32 = vsel %vm1468_vm5, %v3377_v58, 128 }
 0x2b8   : > { %5320 = vst [vmem:[#allocation32_spill] sm:$0xff] %v3887_v42  ;;  %5321 = vst [vmem:[#allocation33_spill] sm:$0xff] %v3889_v5  ;;  %882 = vmin.xlane.f32.xlu1 %v3887_v42  ;;  %1654 = vmin.xlane.f32.xlu0 %v3889_v5  ;;  %v865_v1 = vshra.s32 %v3892_v7, 16  ;;  %v1637_v40 = vshra.s32 %v3895_v32, 16 }
 0x2b9   : > { %v647_v62 = vpop.xlane.xlu1 %646  ;;  %v1419_v44 = vpop.xlane.xlu0 %1418 }
 0x2ba   : > { %vm699_vm6 = vcmp.le.f32.partialorder %v3543_v63, %v647_v62  ;;  %vm1471_vm7 = vcmp.le.f32.partialorder %v3548_v17, %v1419_v44  ;;  %v3903_v51 = vcvt.s32.f32 %v865_v1  ;;  %v3905_v19 = vcvt.s32.f32 %v1637_v40 }
 0x2bb   : > { %v3908_v23 = vsel %vm699_vm6, %v3377_v58, 128  ;;  %v3911_v42 = vsel %vm1471_vm7, %v3377_v58, 128 }
 0x2bc   : > { %5322 = vst [vmem:[#allocation34_spill] sm:$0xff] %v3903_v51  ;;  %5323 = vst [vmem:[#allocation35_spill] sm:$0xff] %v3905_v19  ;;  %868 = vmin.xlane.f32.xlu1 %v3903_v51  ;;  %1640 = vmin.xlane.f32.xlu0 %v3905_v19  ;;  %v907_v5 = vshra.s32 %v3908_v23, 16  ;;  %v1679_v63 = vshra.s32 %v3911_v42, 16 }
 0x2bd   : > { %5324 = vst [vmem:[#allocation36_spill] sm:$0xff] %v3911_v42  ;;  %v645_v62 = vpop.xlane.xlu1 %644  ;;  %v1417_v17 = vpop.xlane.xlu0 %1416 }
 0x2be   : > { %vm698_vm8 = vcmp.le.f32.partialorder %v3572_v47, %v645_v62  ;;  %vm1470_vm9 = vcmp.le.f32.partialorder %v3577_v50, %v1417_v17  ;;  %v3919_v1 = vcvt.s32.f32 %v907_v5  ;;  %v3921_v40 = vcvt.s32.f32 %v1679_v63  ;;  %v5329_v5 = vld [vmem:[#allocation6_spill] sm:$0xff] }
 0x2bf   : > { %v3924_v44 = vsel %vm698_vm8, %v3377_v58, 128  ;;  %v3927_v51 = vsel %vm1470_vm9, %v3377_v58, 128 }
 0x2c0   : > { %5325 = vst [vmem:[#allocation37_spill] sm:$0xff] %v3919_v1  ;;  %5326 = vst [vmem:[#allocation38_spill] sm:$0xff] %v3921_v40  ;;  %910 = vmin.xlane.f32.xlu1 %v3919_v1  ;;  %1682 = vmin.xlane.f32.xlu0 %v3921_v40  ;;  %v893_v19 = vshra.s32 %v3924_v44, 16  ;;  %v1665_v47 = vshra.s32 %v3927_v51, 16 }
 0x2c1   : > { %5327 = vst [vmem:[#allocation39_spill] sm:$0xff] %v3924_v44  ;;  %5328 = vst [vmem:[#allocation40_spill] sm:$0xff] %v3927_v51  ;;  %v651_v62 = vpop.xlane.xlu1 %650  ;;  %v1423_v50 = vpop.xlane.xlu0 %1422 }
 0x2c2   : > { %vm701_vm10 = vcmp.le.f32.partialorder %v3602_v28, %v651_v62  ;;  %vm1473_vm11 = vcmp.le.f32.partialorder %v5329_v5, %v1423_v50  ;;  %v3935_v63 = vcvt.s32.f32 %v893_v19  ;;  %v3937_v17 = vcvt.s32.f32 %v1665_v47  ;;  %v5334_v19 = vld [vmem:[#allocation7_spill] sm:$0xff]  ;;  %v5335_v47 = vld [vmem:[#allocation8_spill] sm:$0xff] }
 0x2c3   : > { %v3940_v42 = vsel %vm701_vm10, %v3377_v58, 128  ;;  %v3943_v1 = vsel %vm1473_vm11, %v3377_v58, 128 }
 0x2c4   : > { %5330 = vst [vmem:[#allocation6_spill] sm:$0xff] %v3935_v63  ;;  %5331 = vst [vmem:[#allocation41_spill] sm:$0xff] %v3937_v17  ;;  %896 = vmin.xlane.f32.xlu1 %v3935_v63  ;;  %1668 = vmin.xlane.f32.xlu0 %v3937_v17  ;;  %v935_v40 = vshra.s32 %v3940_v42, 16  ;;  %v1707_v28 = vshra.s32 %v3943_v1, 16 }
 0x2c5   : > { %5332 = vst [vmem:[#allocation42_spill] sm:$0xff] %v3940_v42  ;;  %5333 = vst [vmem:[#allocation43_spill] sm:$0xff] %v3943_v1  ;;  %v649_v62 = vpop.xlane.xlu1 %648  ;;  %v1421_v50 = vpop.xlane.xlu0 %1420 }
 0x2c6   : > { %vm700_vm12 = vcmp.le.f32.partialorder %v5334_v19, %v649_v62  ;;  %vm1472_vm13 = vcmp.le.f32.partialorder %v5335_v47, %v1421_v50  ;;  %v3951_v5 = vcvt.s32.f32 %v935_v40  ;;  %v3953_v51 = vcvt.s32.f32 %v1707_v28  ;;  %v5338_v40 = vld [vmem:[#allocation9_spill] sm:$0xff]  ;;  %v5339_v28 = vld [vmem:[#allocation10_spill] sm:$0xff] }
 0x2c7   : > { %v3956_v44 = vsel %vm700_vm12, %v3377_v58, 128  ;;  %v3959_v63 = vsel %vm1472_vm13, %v3377_v58, 128 }
 0x2c8   : > { %5336 = vst [vmem:[#allocation7_spill] sm:$0xff] %v3951_v5  ;;  %5337 = vst [vmem:[#allocation8_spill] sm:$0xff] %v3953_v51  ;;  %938 = vmin.xlane.f32.xlu1 %v3951_v5  ;;  %1710 = vmin.xlane.f32.xlu0 %v3953_v51  ;;  %v921_v17 = vshra.s32 %v3956_v44, 16  ;;  %v1693_v62 = vshra.s32 %v3959_v63, 16 }
 0x2c9   : > { %v655_v19 = vpop.xlane.xlu1 %654  ;;  %v1427_v50 = vpop.xlane.xlu0 %1426 }
 0x2ca   : > { %vm703_vm14 = vcmp.le.f32.partialorder %v5338_v40, %v655_v19  ;;  %vm1475_vm15 = vcmp.le.f32.partialorder %v5339_v28, %v1427_v50  ;;  %v3967_v47 = vcvt.s32.f32 %v921_v17  ;;  %v3969_v1 = vcvt.s32.f32 %v1693_v62 }
 0x2cb   : > { %v3972_v42 = vsel %vm703_vm14, %v3377_v58, 128  ;;  %v3975_v5 = vsel %vm1475_vm15, %v3377_v58, 128 }
 0x2cc   : > { %5340 = vst [vmem:[#allocation9_spill] sm:$0xff] %v3967_v47  ;;  %5341 = vst [vmem:[#allocation10_spill] sm:$0xff] %v3969_v1  ;;  %924 = vmin.xlane.f32.xlu1 %v3967_v47  ;;  %1696 = vmin.xlane.f32.xlu0 %v3969_v1  ;;  %v963_v51 = vshra.s32 %v3972_v42, 16  ;;  %v1735_v19 = vshra.s32 %v3975_v5, 16 }
 0x2cd   : > { %v653_v40 = vpop.xlane.xlu1 %652  ;;  %v1425_v50 = vpop.xlane.xlu0 %1424 }
 0x2ce   : > { %vm702_vm0 = vcmp.le.f32.partialorder %v3690_v57, %v653_v40  ;;  %vm1474_vm1 = vcmp.le.f32.partialorder %v3695_v6, %v1425_v50  ;;  %v3983_v17 = vcvt.s32.f32 %v963_v51  ;;  %v3985_v62 = vcvt.s32.f32 %v1735_v19 }
 0x2cf   : > { %v3988_v28 = vsel %vm702_vm0, %v3377_v58, 128  ;;  %v3991_v47 = vsel %vm1474_vm1, %v3377_v58, 128 }
 0x2d0   : > { %5342 = vst [vmem:[#allocation44_spill] sm:$0xff] %v3983_v17  ;;  %5343 = vst [vmem:[#allocation45_spill] sm:$0xff] %v3985_v62  ;;  %966 = vmin.xlane.f32.xlu1 %v3983_v17  ;;  %1738 = vmin.xlane.f32.xlu0 %v3985_v62  ;;  %v949_v1 = vshra.s32 %v3988_v28, 16  ;;  %v1721_v57 = vshra.s32 %v3991_v47, 16 }
 0x2d1   : > { %v659_v40 = vpop.xlane.xlu1 %658  ;;  %v1431_v6 = vpop.xlane.xlu0 %1430 }
 0x2d2   : > { %vm705_vm2 = vcmp.le.f32.partialorder %v3494_v24, %v659_v40  ;;  %vm1477_vm3 = vcmp.le.f32.partialorder %v3498_v25, %v1431_v6  ;;  %v3999_v51 = vcvt.s32.f32 %v949_v1  ;;  %v4001_v19 = vcvt.s32.f32 %v1721_v57 }
 0x2d3   : > { %v4004_v50 = vsel %vm705_vm2, %v3377_v58, 128  ;;  %v4007_v17 = vsel %vm1477_vm3, %v3377_v58, 128 }
 0x2d4   : > { %5344 = vst [vmem:[#allocation46_spill] sm:$0xff] %v3999_v51  ;;  %5345 = vst [vmem:[#allocation47_spill] sm:$0xff] %v4001_v19  ;;  %v1763_v62 = vshra.s32 %v4007_v17, 16  ;;  %952 = vmin.xlane.f32.xlu1 %v3999_v51  ;;  %1724 = vmin.xlane.f32.xlu0 %v4001_v19  ;;  %v991_v24 = vshra.s32 %v4004_v50, 16 }
 0x2d5   : > { %5346 = vst [vmem:[#allocation48_spill] sm:$0xff] %v4007_v17  ;;  %v657_v40 = vpop.xlane.xlu1 %656  ;;  %v1429_v25 = vpop.xlane.xlu0 %1428 }
 0x2d6   : > { %vm704_vm4 = vcmp.le.f32.partialorder %v3505_v33, %v657_v40  ;;  %vm1476_vm5 = vcmp.le.f32.partialorder %v3509_v34, %v1429_v25  ;;  %v4015_v1 = vcvt.s32.f32 %v991_v24  ;;  %v4017_v57 = vcvt.s32.f32 %v1763_v62 }
 0x2d7   : > { %v4020_v6 = vsel %vm704_vm4, %v3377_v58, 128  ;;  %v4023_v17 = vsel %vm1476_vm5, %v3377_v58, 128 }
 0x2d8   : > { %5347 = vst [vmem:[#allocation49_spill] sm:$0xff] %v4015_v1  ;;  %5348 = vst [vmem:[#allocation50_spill] sm:$0xff] %v4017_v57  ;;  %v977_v19 = vshra.s32 %v4020_v6, 16  ;;  %v1749_v51 = vshra.s32 %v4023_v17, 16  ;;  %994 = vmin.xlane.f32.xlu1 %v4015_v1  ;;  %1766 = vmin.xlane.f32.xlu0 %v4017_v57 }
 0x2d9   : > { %v663_v33 = vpop.xlane.xlu1 %662  ;;  %v1435_v34 = vpop.xlane.xlu0 %1434 }
 0x2da   : > { %vm707_vm6 = vcmp.le.f32.partialorder %v3523_v8, %v663_v33  ;;  %vm1479_vm7 = vcmp.le.f32.partialorder %v3527_v45, %v1435_v34  ;;  %v4031_v62 = vcvt.s32.f32 %v977_v19  ;;  %v4033_v24 = vcvt.s32.f32 %v1749_v51 }
 0x2db   : > { %v4036_v40 = vsel %vm707_vm6, %v3377_v58, 128  ;;  %v4039_v25 = vsel %vm1479_vm7, %v3377_v58, 128 }
 0x2dc   : > { %5349 = vst [vmem:[#allocation51_spill] sm:$0xff] %v4031_v62  ;;  %5350 = vst [vmem:[#allocation52_spill] sm:$0xff] %v4033_v24  ;;  %v1019_v1 = vshra.s32 %v4036_v40, 16  ;;  %v1791_v57 = vshra.s32 %v4039_v25, 16  ;;  %980 = vmin.xlane.f32.xlu1 %v4031_v62  ;;  %1752 = vmin.xlane.f32.xlu0 %v4033_v24 }
 0x2dd   : > { %v661_v8 = vpop.xlane.xlu1 %660  ;;  %v1433_v45 = vpop.xlane.xlu0 %1432 }
 0x2de   : > { %vm706_vm8 = vcmp.le.f32.partialorder %v3534_v10, %v661_v8  ;;  %vm1478_vm9 = vcmp.le.f32.partialorder %v3538_v59, %v1433_v45  ;;  %v4047_v51 = vcvt.s32.f32 %v1019_v1  ;;  %v4049_v19 = vcvt.s32.f32 %v1791_v57 }
 0x2df   : > { %v4052_v33 = vsel %vm706_vm8, %v3377_v58, 128  ;;  %v4055_v34 = vsel %vm1478_vm9, %v3377_v58, 128 }
 0x2e0   : > { %5351 = vst [vmem:[#allocation53_spill] sm:$0xff] %v4047_v51  ;;  %5352 = vst [vmem:[#allocation54_spill] sm:$0xff] %v4049_v19  ;;  %v1005_v62 = vshra.s32 %v4052_v33, 16  ;;  %v1777_v24 = vshra.s32 %v4055_v34, 16  ;;  %1022 = vmin.xlane.f32.xlu1 %v4047_v51  ;;  %1794 = vmin.xlane.f32.xlu0 %v4049_v19 }
 0x2e1   : > { %v667_v10 = vpop.xlane.xlu1 %666  ;;  %v1439_v59 = vpop.xlane.xlu0 %1438 }
 0x2e2   : > { %vm709_vm10 = vcmp.le.f32.partialorder %v3552_v18, %v667_v10  ;;  %vm1481_vm11 = vcmp.le.f32.partialorder %v3556_v21, %v1439_v59  ;;  %v4063_v1 = vcvt.s32.f32 %v1005_v62  ;;  %v4065_v57 = vcvt.s32.f32 %v1777_v24 }
 0x2e3   : > { %v4068_v8 = vsel %vm709_vm10, %v3377_v58, 128  ;;  %v4071_v45 = vsel %vm1481_vm11, %v3377_v58, 128 }
 0x2e4   : > { %5353 = vst [vmem:[#allocation55_spill] sm:$0xff] %v4063_v1  ;;  %5354 = vst [vmem:[#allocation56_spill] sm:$0xff] %v4065_v57  ;;  %v1047_v51 = vshra.s32 %v4068_v8, 16  ;;  %v1819_v19 = vshra.s32 %v4071_v45, 16  ;;  %1008 = vmin.xlane.f32.xlu1 %v4063_v1  ;;  %1780 = vmin.xlane.f32.xlu0 %v4065_v57 }
 0x2e5   : > { %v665_v18 = vpop.xlane.xlu1 %664  ;;  %v1437_v21 = vpop.xlane.xlu0 %1436 }
 0x2e6   : > { %vm708_vm12 = vcmp.le.f32.partialorder %v3563_v31, %v665_v18  ;;  %vm1480_vm13 = vcmp.le.f32.partialorder %v3567_v36, %v1437_v21  ;;  %v4079_v62 = vcvt.s32.f32 %v1047_v51  ;;  %v4081_v24 = vcvt.s32.f32 %v1819_v19 }
 0x2e7   : > { %v4084_v10 = vsel %vm708_vm12, %v3377_v58, 128  ;;  %v4087_v59 = vsel %vm1480_vm13, %v3377_v58, 128 }
 0x2e8   : > { %5355 = vst [vmem:[#allocation57_spill] sm:$0xff] %v4079_v62  ;;  %5356 = vst [vmem:[#allocation58_spill] sm:$0xff] %v4081_v24  ;;  %v1033_v1 = vshra.s32 %v4084_v10, 16  ;;  %v1805_v57 = vshra.s32 %v4087_v59, 16  ;;  %1050 = vmin.xlane.f32.xlu1 %v4079_v62  ;;  %1822 = vmin.xlane.f32.xlu0 %v4081_v24 }
 0x2e9   : > { %v671_v31 = vpop.xlane.xlu1 %670  ;;  %v1443_v36 = vpop.xlane.xlu0 %1442 }
 0x2ea   : > { %vm711_vm14 = vcmp.le.f32.partialorder %v3581_v0, %v671_v31  ;;  %vm1483_vm15 = vcmp.le.f32.partialorder %v3585_v3, %v1443_v36  ;;  %v4095_v51 = vcvt.s32.f32 %v1033_v1  ;;  %v4097_v19 = vcvt.s32.f32 %v1805_v57 }
 0x2eb   : > { %v4100_v18 = vsel %vm711_vm14, %v3377_v58, 128  ;;  %v4103_v21 = vsel %vm1483_vm15, %v3377_v58, 128 }
 0x2ec   : > { %5357 = vst [vmem:[#allocation59_spill] sm:$0xff] %v4095_v51  ;;  %5358 = vst [vmem:[#allocation60_spill] sm:$0xff] %v4097_v19  ;;  %v1075_v62 = vshra.s32 %v4100_v18, 16  ;;  %v1847_v24 = vshra.s32 %v4103_v21, 16  ;;  %1036 = vmin.xlane.f32.xlu1 %v4095_v51  ;;  %1808 = vmin.xlane.f32.xlu0 %v4097_v19 }
 0x2ed   : > { %v669_v0 = vpop.xlane.xlu1 %668  ;;  %v1441_v3 = vpop.xlane.xlu0 %1440 }
 0x2ee   : > { %vm710_vm0 = vcmp.le.f32.partialorder %v3592_v12, %v669_v0  ;;  %vm1482_vm1 = vcmp.le.f32.partialorder %v3596_v15, %v1441_v3  ;;  %v4111_v1 = vcvt.s32.f32 %v1075_v62  ;;  %v4113_v57 = vcvt.s32.f32 %v1847_v24 }
 0x2ef   : > { %v4116_v31 = vsel %vm710_vm0, %v3377_v58, 128  ;;  %v4119_v36 = vsel %vm1482_vm1, %v3377_v58, 128 }
 0x2f0   : > { %5359 = vst [vmem:[#allocation61_spill] sm:$0xff] %v4111_v1  ;;  %5360 = vst [vmem:[#allocation62_spill] sm:$0xff] %v4113_v57  ;;  %v1061_v51 = vshra.s32 %v4116_v31, 16  ;;  %v1833_v19 = vshra.s32 %v4119_v36, 16  ;;  %1078 = vmin.xlane.f32.xlu1 %v4111_v1  ;;  %1850 = vmin.xlane.f32.xlu0 %v4113_v57 }
 0x2f1   : > { %v675_v12 = vpop.xlane.xlu1 %674  ;;  %v1447_v15 = vpop.xlane.xlu0 %1446 }
 0x2f2   : > { %vm713_vm2 = vcmp.le.f32.partialorder %v3611_v39, %v675_v12  ;;  %vm1485_vm3 = vcmp.le.f32.partialorder %v3615_v43, %v1447_v15  ;;  %v4127_v62 = vcvt.s32.f32 %v1061_v51  ;;  %v4129_v24 = vcvt.s32.f32 %v1833_v19 }
 0x2f3   : > { %v4132_v0 = vsel %vm713_vm2, %v3377_v58, 128  ;;  %v4135_v3 = vsel %vm1485_vm3, %v3377_v58, 128 }
 0x2f4   : > { %5361 = vst [vmem:[#allocation63_spill] sm:$0xff] %v4127_v62  ;;  %5362 = vst [vmem:[#allocation64_spill] sm:$0xff] %v4129_v24  ;;  %v1103_v1 = vshra.s32 %v4132_v0, 16  ;;  %v1875_v57 = vshra.s32 %v4135_v3, 16  ;;  %1064 = vmin.xlane.f32.xlu1 %v4127_v62  ;;  %1836 = vmin.xlane.f32.xlu0 %v4129_v24 }
 0x2f5   : > { %v673_v39 = vpop.xlane.xlu1 %672  ;;  %v1445_v43 = vpop.xlane.xlu0 %1444 }
 0x2f6   : > { %vm712_vm4 = vcmp.le.f32.partialorder %v3622_v54, %v673_v39  ;;  %vm1484_vm5 = vcmp.le.f32.partialorder %v3626_v60, %v1445_v43  ;;  %v4143_v51 = vcvt.s32.f32 %v1103_v1  ;;  %v4145_v19 = vcvt.s32.f32 %v1875_v57 }
 0x2f7   : > { %v4148_v12 = vsel %vm712_vm4, %v3377_v58, 128  ;;  %v4151_v15 = vsel %vm1484_vm5, %v3377_v58, 128 }
 0x2f8   : > { %5363 = vst [vmem:[#allocation65_spill] sm:$0xff] %v4143_v51  ;;  %5364 = vst [vmem:[#allocation66_spill] sm:$0xff] %v4145_v19  ;;  %v1089_v62 = vshra.s32 %v4148_v12, 16  ;;  %v1861_v24 = vshra.s32 %v4151_v15, 16  ;;  %1106 = vmin.xlane.f32.xlu1 %v4143_v51  ;;  %1878 = vmin.xlane.f32.xlu0 %v4145_v19 }
 0x2f9   : > { %v679_v54 = vpop.xlane.xlu1 %678  ;;  %v1451_v60 = vpop.xlane.xlu0 %1450 }
 0x2fa   : > { %vm715_vm6 = vcmp.le.f32.partialorder %v3641_v41, %v679_v54  ;;  %vm1487_vm7 = vcmp.le.f32.partialorder %v3645_v49, %v1451_v60  ;;  %v4159_v1 = vcvt.s32.f32 %v1089_v62  ;;  %v4161_v57 = vcvt.s32.f32 %v1861_v24 }
 0x2fb   : > { %v4164_v39 = vsel %vm715_vm6, %v3377_v58, 128  ;;  %v4167_v43 = vsel %vm1487_vm7, %v3377_v58, 128 }
 0x2fc   : > { %5365 = vst [vmem:[#allocation67_spill] sm:$0xff] %v4159_v1  ;;  %5366 = vst [vmem:[#allocation68_spill] sm:$0xff] %v4161_v57  ;;  %v1131_v51 = vshra.s32 %v4164_v39, 16  ;;  %v1903_v19 = vshra.s32 %v4167_v43, 16  ;;  %1092 = vmin.xlane.f32.xlu1 %v4159_v1  ;;  %1864 = vmin.xlane.f32.xlu0 %v4161_v57 }
 0x2fd   : > { %v677_v41 = vpop.xlane.xlu1 %676  ;;  %v1449_v49 = vpop.xlane.xlu0 %1448 }
 0x2fe   : > { %vm714_vm8 = vcmp.le.f32.partialorder %v3652_v9, %v677_v41  ;;  %vm1486_vm9 = vcmp.le.f32.partialorder %v3656_v16, %v1449_v49  ;;  %v4175_v62 = vcvt.s32.f32 %v1131_v51  ;;  %v4177_v24 = vcvt.s32.f32 %v1903_v19 }
 0x2ff   : > { %v4180_v54 = vsel %vm714_vm8, %v3377_v58, 128  ;;  %v4183_v60 = vsel %vm1486_vm9, %v3377_v58, 128 }
 0x300   : > { %5367 = vst [vmem:[#allocation69_spill] sm:$0xff] %v4175_v62  ;;  %5368 = vst [vmem:[#allocation70_spill] sm:$0xff] %v4177_v24  ;;  %v1117_v1 = vshra.s32 %v4180_v54, 16  ;;  %v1889_v57 = vshra.s32 %v4183_v60, 16  ;;  %1134 = vmin.xlane.f32.xlu1 %v4175_v62  ;;  %1906 = vmin.xlane.f32.xlu0 %v4177_v24 }
 0x301   : > { %v683_v9 = vpop.xlane.xlu1 %682  ;;  %v1455_v16 = vpop.xlane.xlu0 %1454 }
 0x302   : > { %vm717_vm10 = vcmp.le.f32.partialorder %v3671_v56, %v683_v9  ;;  %vm1489_vm11 = vcmp.le.f32.partialorder %v3675_v30, %v1455_v16  ;;  %v4191_v51 = vcvt.s32.f32 %v1117_v1  ;;  %v4193_v19 = vcvt.s32.f32 %v1889_v57  ;;  %v5373_v1 = vld [vmem:[#allocation11_spill] sm:$0xff] }
 0x303   : > { %v4196_v41 = vsel %vm717_vm10, %v3377_v58, 128  ;;  %v4199_v49 = vsel %vm1489_vm11, %v3377_v58, 128 }
 0x304   : > { %5369 = vst [vmem:[#allocation71_spill] sm:$0xff] %v4191_v51  ;;  %5370 = vst [vmem:[#allocation72_spill] sm:$0xff] %v4193_v19  ;;  %v1159_v62 = vshra.s32 %v4196_v41, 16  ;;  %v1931_v24 = vshra.s32 %v4199_v49, 16  ;;  %1120 = vmin.xlane.f32.xlu1 %v4191_v51  ;;  %1892 = vmin.xlane.f32.xlu0 %v4193_v19 }
 0x305   : > { %5371 = vst [vmem:[#allocation73_spill] sm:$0xff] %v4196_v41  ;;  %5372 = vst [vmem:[#allocation74_spill] sm:$0xff] %v4199_v49  ;;  %v681_v56 = vpop.xlane.xlu1 %680  ;;  %v1453_v30 = vpop.xlane.xlu0 %1452 }
 0x306   : > { %vm716_vm12 = vcmp.le.f32.partialorder %v3682_v29, %v681_v56  ;;  %vm1488_vm13 = vcmp.le.f32.partialorder %v5373_v1, %v1453_v30  ;;  %v4207_v57 = vcvt.s32.f32 %v1159_v62  ;;  %v4209_v9 = vcvt.s32.f32 %v1931_v24  ;;  %v5378_v62 = vld [vmem:[#allocation12_spill] sm:$0xff]  ;;  %v5379_v24 = vld [vmem:[#allocation13_spill] sm:$0xff] }
 0x307   : > { %v4212_v16 = vsel %vm716_vm12, %v3377_v58, 128  ;;  %v4215_v41 = vsel %vm1488_vm13, %v3377_v58, 128 }
 0x308   : > { %5374 = vst [vmem:[#allocation11_spill] sm:$0xff] %v4207_v57  ;;  %5375 = vst [vmem:[#allocation75_spill] sm:$0xff] %v4209_v9  ;;  %v1145_v51 = vshra.s32 %v4212_v16, 16  ;;  %v1917_v19 = vshra.s32 %v4215_v41, 16  ;;  %1162 = vmin.xlane.f32.xlu1 %v4207_v57  ;;  %1934 = vmin.xlane.f32.xlu0 %v4209_v9 }
 0x309   : > { %5376 = vst [vmem:[#allocation76_spill] sm:$0xff] %v4212_v16  ;;  %5377 = vst [vmem:[#allocation77_spill] sm:$0xff] %v4215_v41  ;;  %v687_v29 = vpop.xlane.xlu1 %686  ;;  %v1459_v56 = vpop.xlane.xlu0 %1458 }
 0x30a   : > { %vm719_vm14 = vcmp.le.f32.partialorder %v5378_v62, %v687_v29  ;;  %vm1491_vm15 = vcmp.le.f32.partialorder %v5379_v24, %v1459_v56  ;;  %v4223_v30 = vcvt.s32.f32 %v1145_v51  ;;  %v4225_v1 = vcvt.s32.f32 %v1917_v19  ;;  %v5383_v51 = vld [vmem:[#allocation14_spill] sm:$0xff]  ;;  %v5384_v19 = vld [vmem:[#allocation15_spill] sm:$0xff] }
 0x30b   : > { %v4228_v49 = vsel %vm719_vm14, %v3377_v58, 128  ;;  %v4231_v16 = vsel %vm1491_vm15, %v3377_v58, 128 }
 0x30c   : > { %5380 = vst [vmem:[#allocation12_spill] sm:$0xff] %v4225_v1  ;;  %5381 = vst [vmem:[#allocation13_spill] sm:$0xff] %v4228_v49  ;;  %v1187_v57 = vshra.s32 %v4228_v49, 16  ;;  %v1959_v9 = vshra.s32 %v4231_v16, 16  ;;  %1148 = vmin.xlane.f32.xlu1 %v4223_v30  ;;  %1920 = vmin.xlane.f32.xlu0 %v4225_v1 }
 0x30d   : > { %5382 = vst [vmem:[#allocation78_spill] sm:$0xff] %v4231_v16  ;;  %v685_v29 = vpop.xlane.xlu1 %684  ;;  %v1457_v56 = vpop.xlane.xlu0 %1456 }
 0x30e   : > { %vm718_vm0 = vcmp.le.f32.partialorder %v5383_v51, %v685_v29  ;;  %vm1490_vm1 = vcmp.le.f32.partialorder %v5384_v19, %v1457_v56  ;;  %v4239_v62 = vcvt.s32.f32 %v1187_v57  ;;  %v4241_v24 = vcvt.s32.f32 %v1959_v9  ;;  %v356_v9 = vld [vmem:[%s5178_s1 + $0x100] sm:$0xff]  ;;  %v355_v56 = vld [vmem:[%s5178_s1 + $0xf8] sm:$0xff] }
 0x30f   : > { %v4244_v41 = vsel %vm718_vm0, %v3377_v58, 128  ;;  %v4247_v49 = vsel %vm1490_vm1, %v3377_v58, 128  ;;  %v1538_v51 = vand.u32 65535, %v3750_v37  ;;  %v766_v19 = vand.u32 65535, %v3753_v20  ;;  %2859 = vmatprep.subr.mxu1 %v356_v9 }
 0x310   : > { %5385 = vst [vmem:[#allocation14_spill] sm:$0xff] %v4239_v62  ;;  %5386 = vst [vmem:[#allocation15_spill] sm:$0xff] %v4241_v24  ;;  %v1173_v16 = vshra.s32 %v4244_v41, 16  ;;  %v1945_v1 = vshra.s32 %v4247_v49, 16  ;;  %1190 = vmin.xlane.f32.xlu1 %v4239_v62  ;;  %1962 = vmin.xlane.f32.xlu0 %v4241_v24  ;;  %v1524_v58 = vand.u32 65535, %v3764_v55  ;;  %v752_v24 = vand.u32 65535, %v3767_v38 }
 0x311   : > { %5387 = vst [vmem:[#allocation79_spill] sm:$0xff] %v4247_v49  ;;  %2860 = vmatpush3.msra.mxu1 %v356_v9  ;;  %v768_v20 = vcvt.s32.f32 %v766_v19  ;;  %v1540_v9 = vcvt.s32.f32 %v1538_v51  ;;  %v352_v55 = vld [vmem:[%s5178_s1 + $0xe0] sm:$0xff]  ;;  %v794_v38 = vand.u32 65535, %v3780_v48  ;;  %v1566_v51 = vand.u32 65535, %v3783_v53  ;;  %v351_v48 = vld [vmem:[%s5178_s1 + $0xd8] sm:$0xff] }
 0x312   : > { %v4253_v29 = vcvt.s32.f32 %v1173_v16  ;;  %v4255_v57 = vcvt.s32.f32 %v1945_v1  ;;  %2861 = vmatprep.subr.mxu1 %v355_v56  ;;  %v354_v16 = vld [vmem:[%s5178_s1 + $0xf0] sm:$0xff]  ;;  %v353_v1 = vld [vmem:[%s5178_s1 + $0xe8] sm:$0xff] }
 0x313   : > { %2862 = vmatpush3.msra.mxu1 %v355_v56  ;;  %v5391_v56 = vld [vmem:[#allocation16_spill] sm:$0xff] }
 0x314   : > { %5388 = vst [vmem:[#allocation80_spill] sm:$0xff] %v4253_v29  ;;  %5389 = vst [vmem:[#allocation81_spill] sm:$0xff] %v4255_v57  ;;  %1176 = vmin.xlane.f32.xlu1 %v4253_v29  ;;  %1948 = vmin.xlane.f32.xlu0 %v4255_v57  ;;  %v5392_v57 = vld [vmem:[#allocation17_spill] sm:$0xff] }
 0x315   : > { %2863 = vmatprep.subr.mxu1 %v354_v16 }
 0x316   : > { %2864 = vmatpush3.msra.mxu1 %v354_v16  ;;  %v5393_v16 = vld [vmem:[#allocation19_spill] sm:$0xff] }
 0x317   : > { %2865 = vmatprep.subr.mxu1 %v353_v1 }
 0x318   : > { %2866 = vmatpush3.msra.mxu1 %v353_v1 }
 0x319   : > { %2867 = vmatprep.subr.mxu1 %v352_v55 }
 0x31a   : > { %2868 = vmatpush3.msra.mxu1 %v352_v55  ;;  %v5396_v55 = vld [vmem:[#allocation21_spill] sm:$0xff] }
 0x31b   : > { %2869 = vmatprep.subr.mxu1 %v351_v48 }
 0x31c   : > { %2870 = vmatpush3.msra.mxu1 %v351_v48  ;;  %v5398_v48 = vld [vmem:[#allocation22_spill] sm:$0xff] }
 0x321   : > { %v4275_v62 = vpop.xlane.xlu1 %770  ;;  %v4277_v37 = vpop.xlane.xlu0 %1542 }
 0x322   : > { %5390 = vst [vmem:[#allocation82_spill] sm:$0xff] %v4275_v62  ;;  %vm772_vm2 = vcmp.eq.f32.partialorder %v5391_v56, %v4275_v62  ;;  %vm1544_vm3 = vcmp.eq.f32.partialorder %v5392_v57, %v4277_v37  ;;  %v754_v62 = vcvt.s32.f32 %v752_v24  ;;  %v1526_v57 = vcvt.s32.f32 %v1524_v58  ;;  %v350_v58 = vld [vmem:[%s5178_s1 + $0xd0] sm:$0xff] }
 0x323   : > { %v773_v29 = vsel %vm772_vm2, %v768_v20, inf  ;;  %v1545_v49 = vsel %vm1544_vm3, %v1540_v9, inf  ;;  %v5394_v20 = vld [vmem:[#allocation18_spill] sm:$0xff]  ;;  %v780_v24 = vand.u32 65535, %v3796_v14  ;;  %2871 = vmatprep.subr.mxu1 %v350_v58  ;;  %v822_v14 = vand.u32 65535, %v3812_v26  ;;  %v348_v26 = vld [vmem:[%s5178_s1 + $0xc0] sm:$0xff] }
 0x324   : > { %774 = vmin.xlane.f32.xlu1 %v773_v29  ;;  %1546 = vmin.xlane.f32.xlu0 %v1545_v49  ;;  %v1552_v29 = vand.u32 65535, %v3799_v61  ;;  %v349_v61 = vld [vmem:[%s5178_s1 + $0xc8] sm:$0xff] }
 0x325   : > { %v4288_v19 = vpop.xlane.xlu1 %756  ;;  %v4290_v56 = vpop.xlane.xlu0 %1528  ;;  %2872 = vmatpush3.msra.mxu1 %v350_v58  ;;  %v347_v58 = vld [vmem:[%s5178_s1 + $0xb8] sm:$0xff] }
 0x326   : > { %vm758_vm4 = vcmp.eq.f32.partialorder %v5393_v16, %v4288_v19  ;;  %vm1530_vm5 = vcmp.eq.f32.partialorder %v5394_v20, %v4290_v56  ;;  %v796_v16 = vcvt.s32.f32 %v794_v38  ;;  %v1568_v20 = vcvt.s32.f32 %v1566_v51  ;;  %2873 = vmatprep.subr.mxu1 %v349_v61 }
 0x327   : > { %v759_v49 = vsel %vm758_vm4, %v754_v62, inf  ;;  %v1531_v53 = vsel %vm1530_vm5, %v1526_v57, inf  ;;  %v5395_v62 = vld [vmem:[#allocation20_spill] sm:$0xff]  ;;  %v1594_v38 = vand.u32 65535, %v3815_v27  ;;  %2874 = vmatpush3.msra.mxu1 %v349_v61  ;;  %v5401_v61 = vld [vmem:[#allocation25_spill] sm:$0xff] }
 0x328   : > { %760 = vmin.xlane.f32.xlu1 %v759_v49  ;;  %1532 = vmin.xlane.f32.xlu0 %v1531_v53 }
 0x329   : > { %v4304_v1 = vpop.xlane.xlu1 %798  ;;  %v4306_v9 = vpop.xlane.xlu0 %1570  ;;  %2875 = vmatprep.subr.mxu1 %v348_v26 }
 0x32a   : > { %vm800_vm6 = vcmp.eq.f32.partialorder %v5395_v62, %v4304_v1  ;;  %vm1572_vm7 = vcmp.eq.f32.partialorder %v5396_v55, %v4306_v9  ;;  %v782_v62 = vcvt.s32.f32 %v780_v24  ;;  %v1554_v55 = vcvt.s32.f32 %v1552_v29  ;;  %2876 = vmatpush3.msra.mxu1 %v348_v26  ;;  %v346_v26 = vld [vmem:[%s5178_s1 + $0xb0] sm:$0xff] }
 0x32b   : > { %v801_v57 = vsel %vm800_vm6, %v796_v16, inf  ;;  %v1573_v49 = vsel %vm1572_vm7, %v1568_v20, inf  ;;  %v5399_v16 = vld [vmem:[#allocation23_spill] sm:$0xff]  ;;  %v808_v24 = vand.u32 65535, %v3828_v35  ;;  %v1580_v29 = vand.u32 65535, %v3831_v11  ;;  %2877 = vmatprep.subr.mxu1 %v347_v58 }
 0x32c   : > { %802 = vmin.xlane.f32.xlu1 %v801_v57  ;;  %1574 = vmin.xlane.f32.xlu0 %v1573_v49  ;;  %v850_v11 = vand.u32 65535, %v3844_v46  ;;  %v1622_v35 = vand.u32 65535, %v3847_v4  ;;  %v345_v4 = vld [vmem:[%s5178_s1 + $0xa8] sm:$0xff] }
 0x32d   : > { %v4317_v51 = vpop.xlane.xlu1 %784  ;;  %v4319_v53 = vpop.xlane.xlu0 %1556  ;;  %2878 = vmatpush3.msra.mxu1 %v347_v58  ;;  %v836_v58 = vand.u32 65535, %v3860_v52 }
 0x32e   : > { %5397 = vst [vmem:[#allocation16_spill] sm:$0xff] %v4319_v53  ;;  %vm786_vm8 = vcmp.eq.f32.partialorder %v5398_v48, %v4317_v51  ;;  %vm1558_vm9 = vcmp.eq.f32.partialorder %v5399_v16, %v4319_v53  ;;  %v824_v48 = vcvt.s32.f32 %v822_v14  ;;  %v1596_v16 = vcvt.s32.f32 %v1594_v38  ;;  %2879 = vmatprep.subr.mxu1 %v346_v26 }
 0x32f   : > { %v787_v20 = vsel %vm786_vm8, %v782_v62, inf  ;;  %v1559_v27 = vsel %vm1558_vm9, %v1554_v55, inf  ;;  %v5400_v62 = vld [vmem:[#allocation24_spill] sm:$0xff]  ;;  %v810_v38 = vcvt.s32.f32 %v808_v24  ;;  %v1582_v53 = vcvt.s32.f32 %v1580_v29  ;;  %2880 = vmatpush3.msra.mxu1 %v346_v26 }
 0x330   : > { %788 = vmin.xlane.f32.xlu1 %v787_v20  ;;  %1560 = vmin.xlane.f32.xlu0 %v1559_v27  ;;  %v1608_v24 = vand.u32 65535, %v3863_v13  ;;  %v1650_v26 = vand.u32 65535, %v3879_v22 }
 0x331   : > { %v4333_v57 = vpop.xlane.xlu1 %826  ;;  %v4335_v49 = vpop.xlane.xlu0 %1598  ;;  %2881 = vmatprep.subr.mxu1 %v345_v4 }
 0x332   : > { %vm828_vm10 = vcmp.eq.f32.partialorder %v5400_v62, %v4333_v57  ;;  %vm1600_vm11 = vcmp.eq.f32.partialorder %v5401_v61, %v4335_v49  ;;  %2882 = vmatpush3.msra.mxu1 %v345_v4  ;;  %v5407_v4 = vld [vmem:[#allocation30_spill] sm:$0xff] }
 0x333   : > { %v829_v55 = vsel %vm828_vm10, %v824_v48, inf  ;;  %v1601_v20 = vsel %vm1600_vm11, %v1596_v16, inf  ;;  %v5402_v48 = vld [vmem:[#allocation26_spill] sm:$0xff]  ;;  %v5403_v16 = vld [vmem:[#allocation27_spill] sm:$0xff] }
 0x334   : > { %830 = vmin.xlane.f32.xlu1 %v829_v55  ;;  %1602 = vmin.xlane.f32.xlu0 %v1601_v20  ;;  %v852_v55 = vcvt.s32.f32 %v850_v11  ;;  %v1624_v20 = vcvt.s32.f32 %v1622_v35  ;;  %v343_v11 = vld [vmem:[%s5178_s1 + $0x98] sm:$0xff]  ;;  %v878_v35 = vand.u32 65535, %v3876_v2  ;;  %v342_v2 = vld [vmem:[%s5178_s1 + $0x90] sm:$0xff] }
 0x335   : > { %v4343_v27 = vpop.xlane.xlu1 %812  ;;  %v4345_v14 = vpop.xlane.xlu0 %1584 }
 0x336   : > { %vm814_vm12 = vcmp.eq.f32.partialorder %v5402_v48, %v4343_v27  ;;  %vm1586_vm13 = vcmp.eq.f32.partialorder %v5403_v16, %v4345_v14  ;;  %v344_v48 = vld [vmem:[%s5178_s1 + $0xa0] sm:$0xff] }
 0x337   : > { %v815_v46 = vsel %vm814_vm12, %v810_v38, inf  ;;  %v1587_v62 = vsel %vm1586_vm13, %v1582_v53, inf  ;;  %v5404_v53 = vld [vmem:[#allocation28_spill] sm:$0xff]  ;;  %v5405_v38 = vld [vmem:[#allocation29_spill] sm:$0xff]  ;;  %2883 = vmatprep.subr.mxu1 %v344_v48 }
 0x338   : > { %816 = vmin.xlane.f32.xlu1 %v815_v46  ;;  %1588 = vmin.xlane.f32.xlu0 %v1587_v62  ;;  %v838_v62 = vcvt.s32.f32 %v836_v58  ;;  %v341_v58 = vld [vmem:[%s5178_s1 + $0x88] sm:$0xff] }
 0x339   : > { %v4359_v29 = vpop.xlane.xlu1 %854  ;;  %v4361_v61 = vpop.xlane.xlu0 %1626  ;;  %2884 = vmatpush3.msra.mxu1 %v344_v48  ;;  %v1636_v48 = vand.u32 65535, %v3895_v32  ;;  %v906_v32 = vand.u32 65535, %v3908_v23  ;;  %v5417_v23 = vld [vmem:[#allocation39_spill] sm:$0xff] }
 0x33a   : > { %vm856_vm14 = vcmp.eq.f32.partialorder %v5404_v53, %v4359_v29  ;;  %vm1628_vm15 = vcmp.eq.f32.partialorder %v5405_v38, %v4361_v61  ;;  %v1610_v53 = vcvt.s32.f32 %v1608_v24  ;;  %2885 = vmatprep.subr.mxu1 %v343_v11  ;;  %v864_v24 = vand.u32 65535, %v3892_v7  ;;  %v5412_v7 = vld [vmem:[#allocation36_spill] sm:$0xff] }
 0x33b   : > { %v857_v52 = vsel %vm856_vm14, %v852_v55, inf  ;;  %v1629_v13 = vsel %vm1628_vm15, %v1624_v20, inf  ;;  %v5408_v55 = vld [vmem:[#allocation31_spill] sm:$0xff]  ;;  %2886 = vmatpush3.msra.mxu1 %v343_v11  ;;  %v5411_v11 = vld [vmem:[#allocation33_spill] sm:$0xff] }
 0x33c   : > { %858 = vmin.xlane.f32.xlu1 %v857_v52  ;;  %1630 = vmin.xlane.f32.xlu0 %v1629_v13  ;;  %v880_v13 = vcvt.s32.f32 %v878_v35 }
 0x33d   : > { %v4375_v16 = vpop.xlane.xlu1 %840  ;;  %v4377_v46 = vpop.xlane.xlu0 %1612  ;;  %2887 = vmatprep.subr.mxu1 %v342_v2 }
 0x33e   : > { %5406 = vst [vmem:[#allocation17_spill] sm:$0xff] %v4377_v46  ;;  %vm842_vm0 = vcmp.eq.f32.partialorder %v5407_v4, %v4375_v16  ;;  %vm1614_vm1 = vcmp.eq.f32.partialorder %v5408_v55, %v4377_v46  ;;  %v1652_v4 = vcvt.s32.f32 %v1650_v26  ;;  %2888 = vmatpush3.msra.mxu1 %v342_v2  ;;  %v866_v26 = vcvt.s32.f32 %v864_v24  ;;  %v5416_v2 = vld [vmem:[#allocation35_spill] sm:$0xff] }
 0x33f   : > { %v843_v20 = vsel %vm842_vm0, %v838_v62, inf  ;;  %v1615_v22 = vsel %vm1614_vm1, %v1610_v53, inf  ;;  %v5410_v62 = vld [vmem:[#allocation32_spill] sm:$0xff]  ;;  %2889 = vmatprep.subr.mxu1 %v341_v58  ;;  %v1638_v46 = vcvt.s32.f32 %v1636_v48  ;;  %v908_v24 = vcvt.s32.f32 %v906_v32  ;;  %v5419_v48 = vld [vmem:[#allocation37_spill] sm:$0xff] }
 0x340   : > { %844 = vmin.xlane.f32.xlu1 %v843_v20  ;;  %1616 = vmin.xlane.f32.xlu0 %v1615_v22  ;;  %v1678_v20 = vand.u32 65535, %v5412_v7 }
 0x341   : > { %v4391_v38 = vpop.xlane.xlu1 %882  ;;  %v4393_v52 = vpop.xlane.xlu0 %1654  ;;  %2890 = vmatpush3.msra.mxu1 %v341_v58 }
 0x342   : > { %5409 = vst [vmem:[#allocation19_spill] sm:$0xff] %v4393_v52  ;;  %vm884_vm2 = vcmp.eq.f32.partialorder %v5410_v62, %v4391_v38  ;;  %vm1656_vm3 = vcmp.eq.f32.partialorder %v5411_v11, %v4393_v52  ;;  %v5415_v62 = vld [vmem:[#allocation34_spill] sm:$0xff]  ;;  %v892_v11 = vand.u32 65535, %v5417_v23  ;;  %v1680_v58 = vcvt.s32.f32 %v1678_v20 }
 0x343   : > { %v885_v53 = vsel %vm884_vm2, %v880_v13, inf  ;;  %v1657_v55 = vsel %vm1656_vm3, %v1652_v4, inf }
 0x344   : > { %886 = vmin.xlane.f32.xlu1 %v885_v53  ;;  %1658 = vmin.xlane.f32.xlu0 %v1657_v55  ;;  %v5418_v53 = vld [vmem:[#allocation40_spill] sm:$0xff]  ;;  %v894_v32 = vcvt.s32.f32 %v892_v11 }
 0x345   : > { %v4401_v22 = vpop.xlane.xlu1 %868  ;;  %v4403_v35 = vpop.xlane.xlu0 %1640  ;;  %v1664_v55 = vand.u32 65535, %v5418_v53 }
 0x346   : > { %5413 = vst [vmem:[#allocation18_spill] sm:$0xff] %v4401_v22  ;;  %5414 = vst [vmem:[#allocation20_spill] sm:$0xff] %v4403_v35  ;;  %vm870_vm4 = vcmp.eq.f32.partialorder %v5415_v62, %v4401_v22  ;;  %vm1642_vm5 = vcmp.eq.f32.partialorder %v5416_v2, %v4403_v35  ;;  %v5420_v62 = vld [vmem:[#allocation38_spill] sm:$0xff] }
 0x347   : > { %v871_v13 = vsel %vm870_vm4, %v866_v26, inf  ;;  %v1643_v4 = vsel %vm1642_vm5, %v1638_v46, inf  ;;  %v5421_v2 = vld [vmem:[#allocation42_spill] sm:$0xff]  ;;  %v1666_v20 = vcvt.s32.f32 %v1664_v55 }
 0x348   : > { %872 = vmin.xlane.f32.xlu1 %v871_v13  ;;  %1644 = vmin.xlane.f32.xlu0 %v1643_v4  ;;  %v934_v13 = vand.u32 65535, %v5421_v2  ;;  %v5422_v4 = vld [vmem:[#allocation43_spill] sm:$0xff]  ;;  %v5423_v22 = vld [vmem:[#allocation6_spill] sm:$0xff] }
 0x349   : > { %v4411_v7 = vpop.xlane.xlu1 %910  ;;  %v4413_v52 = vpop.xlane.xlu0 %1682  ;;  %v1706_v23 = vand.u32 65535, %v5422_v4  ;;  %v5425_v4 = vld [vmem:[#allocation7_spill] sm:$0xff] }
 0x34a   : > { %vm912_vm6 = vcmp.eq.f32.partialorder %v5419_v48, %v4411_v7  ;;  %vm1684_vm7 = vcmp.eq.f32.partialorder %v5420_v62, %v4413_v52  ;;  %v5424_v48 = vld [vmem:[#allocation41_spill] sm:$0xff]  ;;  %v920_v62 = vand.u32 65535, %v3956_v44  ;;  %v936_v11 = vcvt.s32.f32 %v934_v13 }
 0x34b   : > { %v913_v26 = vsel %vm912_vm6, %v908_v24, inf  ;;  %v1685_v46 = vsel %vm1684_vm7, %v1680_v58, inf  ;;  %v1708_v55 = vcvt.s32.f32 %v1706_v23  ;;  %v962_v44 = vand.u32 65535, %v3972_v42 }
 0x34c   : > { %914 = vmin.xlane.f32.xlu1 %v913_v26  ;;  %1686 = vmin.xlane.f32.xlu0 %v1685_v46  ;;  %v1692_v26 = vand.u32 65535, %v3959_v63  ;;  %v1734_v63 = vand.u32 65535, %v3975_v5  ;;  %v922_v13 = vcvt.s32.f32 %v920_v62  ;;  %v948_v42 = vand.u32 65535, %v3988_v28 }
 0x34d   : > { %v4421_v53 = vpop.xlane.xlu1 %896  ;;  %v4423_v35 = vpop.xlane.xlu0 %1668  ;;  %v1720_v5 = vand.u32 65535, %v3991_v47  ;;  %v964_v62 = vcvt.s32.f32 %v962_v44  ;;  %v990_v28 = vand.u32 65535, %v4004_v50  ;;  %v976_v50 = vand.u32 65535, %v4020_v6 }
 0x34e   : > { %vm898_vm8 = vcmp.eq.f32.partialorder %v5423_v22, %v4421_v53  ;;  %vm1670_vm9 = vcmp.eq.f32.partialorder %v5424_v48, %v4423_v35  ;;  %v5426_v22 = vld [vmem:[#allocation8_spill] sm:$0xff]  ;;  %v1694_v23 = vcvt.s32.f32 %v1692_v26  ;;  %v1736_v26 = vcvt.s32.f32 %v1734_v63 }
 0x34f   : > { %v899_v24 = vsel %vm898_vm8, %v894_v32, inf  ;;  %v1671_v58 = vsel %vm1670_vm9, %v1666_v20, inf  ;;  %v950_v44 = vcvt.s32.f32 %v948_v42  ;;  %v1722_v63 = vcvt.s32.f32 %v1720_v5 }
 0x350   : > { %900 = vmin.xlane.f32.xlu1 %v899_v24  ;;  %1672 = vmin.xlane.f32.xlu0 %v1671_v58  ;;  %v5428_v58 = vld [vmem:[#allocation9_spill] sm:$0xff]  ;;  %v992_v42 = vcvt.s32.f32 %v990_v28  ;;  %v1018_v6 = vand.u32 65535, %v4036_v40  ;;  %v978_v28 = vcvt.s32.f32 %v976_v50  ;;  %v1004_v40 = vand.u32 65535, %v4052_v33 }
 0x351   : > { %v4431_v46 = vpop.xlane.xlu1 %938  ;;  %v4433_v2 = vpop.xlane.xlu0 %1710  ;;  %v1046_v33 = vand.u32 65535, %v4068_v8  ;;  %v1032_v8 = vand.u32 65535, %v4084_v10  ;;  %v1074_v10 = vand.u32 65535, %v4100_v18  ;;  %v1060_v18 = vand.u32 65535, %v4116_v31 }
 0x352   : > { %vm940_vm10 = vcmp.eq.f32.partialorder %v5425_v4, %v4431_v46  ;;  %vm1712_vm11 = vcmp.eq.f32.partialorder %v5426_v22, %v4433_v2  ;;  %v5429_v4 = vld [vmem:[#allocation10_spill] sm:$0xff]  ;;  %v1020_v50 = vcvt.s32.f32 %v1018_v6  ;;  %v1006_v6 = vcvt.s32.f32 %v1004_v40 }
 0x353   : > { %v941_v32 = vsel %vm940_vm10, %v936_v11, inf  ;;  %v1713_v20 = vsel %vm1712_vm11, %v1708_v55, inf  ;;  %v1048_v40 = vcvt.s32.f32 %v1046_v33  ;;  %v1034_v33 = vcvt.s32.f32 %v1032_v8 }
 0x354   : > { %942 = vmin.xlane.f32.xlu1 %v941_v32  ;;  %1714 = vmin.xlane.f32.xlu0 %v1713_v20  ;;  %v5430_v20 = vld [vmem:[#allocation44_spill] sm:$0xff]  ;;  %v1076_v8 = vcvt.s32.f32 %v1074_v10  ;;  %v1102_v31 = vand.u32 65535, %v4132_v0  ;;  %v1062_v10 = vcvt.s32.f32 %v1060_v18  ;;  %v1088_v0 = vand.u32 65535, %v4148_v12 }
 0x355   : > { %v4441_v48 = vpop.xlane.xlu1 %924  ;;  %v4443_v24 = vpop.xlane.xlu0 %1696  ;;  %v1130_v12 = vand.u32 65535, %v4164_v39  ;;  %v1116_v39 = vand.u32 65535, %v4180_v54 }
 0x356   : > { %5427 = vst [vmem:[#allocation21_spill] sm:$0xff] %v4443_v24  ;;  %vm926_vm12 = vcmp.eq.f32.partialorder %v5428_v58, %v4441_v48  ;;  %vm1698_vm13 = vcmp.eq.f32.partialorder %v5429_v4, %v4443_v24  ;;  %v5431_v58 = vld [vmem:[#allocation45_spill] sm:$0xff]  ;;  %v5432_v4 = vld [vmem:[#allocation48_spill] sm:$0xff]  ;;  %v5433_v24 = vld [vmem:[#allocation46_spill] sm:$0xff]  ;;  %v1104_v18 = vcvt.s32.f32 %v1102_v31  ;;  %v1090_v31 = vcvt.s32.f32 %v1088_v0 }
 0x357   : > { %v927_v11 = vsel %vm926_vm12, %v922_v13, inf  ;;  %v1699_v55 = vsel %vm1698_vm13, %v1694_v23, inf  ;;  %v1762_v47 = vand.u32 65535, %v5432_v4  ;;  %v5435_v4 = vld [vmem:[#allocation49_spill] sm:$0xff]  ;;  %v1132_v0 = vcvt.s32.f32 %v1130_v12 }
 0x358   : > { %928 = vmin.xlane.f32.xlu1 %v927_v11  ;;  %1700 = vmin.xlane.f32.xlu0 %v1699_v55  ;;  %v1118_v12 = vcvt.s32.f32 %v1116_v39 }
 0x359   : > { %v4451_v22 = vpop.xlane.xlu1 %966  ;;  %v4453_v32 = vpop.xlane.xlu0 %1738  ;;  %v1764_v5 = vcvt.s32.f32 %v1762_v47 }
 0x35a   : > { %vm968_vm14 = vcmp.eq.f32.partialorder %v5430_v20, %v4451_v22  ;;  %vm1740_vm15 = vcmp.eq.f32.partialorder %v5431_v58, %v4453_v32  ;;  %v5434_v20 = vld [vmem:[#allocation47_spill] sm:$0xff]  ;;  %v1748_v58 = vand.u32 65535, %v4023_v17  ;;  %v1790_v17 = vand.u32 65535, %v4039_v25 }
 0x35b   : > { %v969_v13 = vsel %vm968_vm14, %v964_v62, inf  ;;  %v1741_v23 = vsel %vm1740_vm15, %v1736_v26, inf  ;;  %v1776_v25 = vand.u32 65535, %v4055_v34  ;;  %v1818_v34 = vand.u32 65535, %v4071_v45 }
 0x35c   : > { %970 = vmin.xlane.f32.xlu1 %v969_v13  ;;  %1742 = vmin.xlane.f32.xlu0 %v1741_v23  ;;  %v1750_v47 = vcvt.s32.f32 %v1748_v58  ;;  %v1792_v58 = vcvt.s32.f32 %v1790_v17  ;;  %v1804_v45 = vand.u32 65535, %v4087_v59  ;;  %v1846_v59 = vand.u32 65535, %v4103_v21 }
 0x35d   : > { %v4461_v11 = vpop.xlane.xlu1 %952  ;;  %v4463_v55 = vpop.xlane.xlu0 %1724  ;;  %v1778_v17 = vcvt.s32.f32 %v1776_v25  ;;  %v1820_v25 = vcvt.s32.f32 %v1818_v34  ;;  %v1832_v21 = vand.u32 65535, %v4119_v36  ;;  %v1874_v36 = vand.u32 65535, %v4135_v3 }
 0x35e   : > { %vm954_vm0 = vcmp.eq.f32.partialorder %v5433_v24, %v4461_v11  ;;  %vm1726_vm1 = vcmp.eq.f32.partialorder %v5434_v20, %v4463_v55  ;;  %v5436_v24 = vld [vmem:[#allocation50_spill] sm:$0xff]  ;;  %v1806_v34 = vcvt.s32.f32 %v1804_v45  ;;  %v1848_v45 = vcvt.s32.f32 %v1846_v59 }
 0x35f   : > { %v955_v62 = vsel %vm954_vm0, %v950_v44, inf  ;;  %v1727_v26 = vsel %vm1726_vm1, %v1722_v63, inf  ;;  %v1834_v59 = vcvt.s32.f32 %v1832_v21  ;;  %v1860_v3 = vand.u32 65535, %v4151_v15 }
 0x360   : > { %956 = vmin.xlane.f32.xlu1 %v955_v62  ;;  %1728 = vmin.xlane.f32.xlu0 %v1727_v26  ;;  %v5437_v26 = vld [vmem:[#allocation51_spill] sm:$0xff]  ;;  %v1876_v21 = vcvt.s32.f32 %v1874_v36  ;;  %v1902_v15 = vand.u32 65535, %v4167_v43  ;;  %v1888_v43 = vand.u32 65535, %v4183_v60 }
 0x361   : > { %v4471_v13 = vpop.xlane.xlu1 %994  ;;  %v4473_v23 = vpop.xlane.xlu0 %1766  ;;  %v1862_v36 = vcvt.s32.f32 %v1860_v3 }
 0x362   : > { %vm996_vm2 = vcmp.eq.f32.partialorder %v5435_v4, %v4471_v13  ;;  %vm1768_vm3 = vcmp.eq.f32.partialorder %v5436_v24, %v4473_v23  ;;  %v5438_v4 = vld [vmem:[#allocation52_spill] sm:$0xff]  ;;  %v1904_v3 = vcvt.s32.f32 %v1902_v15  ;;  %v1890_v15 = vcvt.s32.f32 %v1888_v43 }
 0x363   : > { %v997_v44 = vsel %vm996_vm2, %v992_v42, inf  ;;  %v1769_v63 = vsel %vm1768_vm3, %v1764_v5, inf }
 0x364   : > { %998 = vmin.xlane.f32.xlu1 %v997_v44  ;;  %1770 = vmin.xlane.f32.xlu0 %v1769_v63  ;;  %v5439_v63 = vld [vmem:[#allocation53_spill] sm:$0xff] }
 0x365   : > { %v4481_v20 = vpop.xlane.xlu1 %980  ;;  %v4483_v62 = vpop.xlane.xlu0 %1752 }
 0x366   : > { %vm982_vm4 = vcmp.eq.f32.partialorder %v5437_v26, %v4481_v20  ;;  %vm1754_vm5 = vcmp.eq.f32.partialorder %v5438_v4, %v4483_v62  ;;  %v5440_v26 = vld [vmem:[#allocation54_spill] sm:$0xff] }
 0x367   : > { %v983_v42 = vsel %vm982_vm4, %v978_v28, inf  ;;  %v1755_v5 = vsel %vm1754_vm5, %v1750_v47, inf }
 0x368   : > { %984 = vmin.xlane.f32.xlu1 %v983_v42  ;;  %1756 = vmin.xlane.f32.xlu0 %v1755_v5  ;;  %v5441_v5 = vld [vmem:[#allocation55_spill] sm:$0xff] }
 0x369   : > { %v4491_v24 = vpop.xlane.xlu1 %1022  ;;  %v4493_v44 = vpop.xlane.xlu0 %1794 }
 0x36a   : > { %vm1024_vm6 = vcmp.eq.f32.partialorder %v5439_v63, %v4491_v24  ;;  %vm1796_vm7 = vcmp.eq.f32.partialorder %v5440_v26, %v4493_v44  ;;  %v5442_v63 = vld [vmem:[#allocation56_spill] sm:$0xff] }
 0x36b   : > { %v1025_v28 = vsel %vm1024_vm6, %v1020_v50, inf  ;;  %v1797_v47 = vsel %vm1796_vm7, %v1792_v58, inf }
 0x36c   : > { %1026 = vmin.xlane.f32.xlu1 %v1025_v28  ;;  %1798 = vmin.xlane.f32.xlu0 %v1797_v47  ;;  %v5443_v47 = vld [vmem:[#allocation57_spill] sm:$0xff] }
 0x36d   : > { %v4501_v4 = vpop.xlane.xlu1 %1008  ;;  %v4503_v42 = vpop.xlane.xlu0 %1780 }
 0x36e   : > { %vm1010_vm8 = vcmp.eq.f32.partialorder %v5441_v5, %v4501_v4  ;;  %vm1782_vm9 = vcmp.eq.f32.partialorder %v5442_v63, %v4503_v42  ;;  %v5444_v5 = vld [vmem:[#allocation58_spill] sm:$0xff] }
 0x36f   : > { %v1011_v50 = vsel %vm1010_vm8, %v1006_v6, inf  ;;  %v1783_v58 = vsel %vm1782_vm9, %v1778_v17, inf }
 0x370   : > { %1012 = vmin.xlane.f32.xlu1 %v1011_v50  ;;  %1784 = vmin.xlane.f32.xlu0 %v1783_v58  ;;  %v5445_v58 = vld [vmem:[#allocation59_spill] sm:$0xff] }
 0x371   : > { %v4511_v26 = vpop.xlane.xlu1 %1050  ;;  %v4513_v28 = vpop.xlane.xlu0 %1822 }
 0x372   : > { %vm1052_vm10 = vcmp.eq.f32.partialorder %v5443_v47, %v4511_v26  ;;  %vm1824_vm11 = vcmp.eq.f32.partialorder %v5444_v5, %v4513_v28  ;;  %v5446_v47 = vld [vmem:[#allocation60_spill] sm:$0xff] }
 0x373   : > { %v1053_v6 = vsel %vm1052_vm10, %v1048_v40, inf  ;;  %v1825_v17 = vsel %vm1824_vm11, %v1820_v25, inf }
 0x374   : > { %1054 = vmin.xlane.f32.xlu1 %v1053_v6  ;;  %1826 = vmin.xlane.f32.xlu0 %v1825_v17  ;;  %v5447_v17 = vld [vmem:[#allocation61_spill] sm:$0xff] }
 0x375   : > { %v4521_v63 = vpop.xlane.xlu1 %1036  ;;  %v4523_v50 = vpop.xlane.xlu0 %1808 }
 0x376   : > { %vm1038_vm12 = vcmp.eq.f32.partialorder %v5445_v58, %v4521_v63  ;;  %vm1810_vm13 = vcmp.eq.f32.partialorder %v5446_v47, %v4523_v50  ;;  %v5448_v58 = vld [vmem:[#allocation62_spill] sm:$0xff] }
 0x377   : > { %v1039_v40 = vsel %vm1038_vm12, %v1034_v33, inf  ;;  %v1811_v25 = vsel %vm1810_vm13, %v1806_v34, inf }
 0x378   : > { %1040 = vmin.xlane.f32.xlu1 %v1039_v40  ;;  %1812 = vmin.xlane.f32.xlu0 %v1811_v25  ;;  %v5449_v25 = vld [vmem:[#allocation63_spill] sm:$0xff] }
 0x379   : > { %v4531_v5 = vpop.xlane.xlu1 %1078  ;;  %v4533_v6 = vpop.xlane.xlu0 %1850 }
 0x37a   : > { %vm1080_vm14 = vcmp.eq.f32.partialorder %v5447_v17, %v4531_v5  ;;  %vm1852_vm15 = vcmp.eq.f32.partialorder %v5448_v58, %v4533_v6  ;;  %v5450_v17 = vld [vmem:[#allocation64_spill] sm:$0xff] }
 0x37b   : > { %v1081_v33 = vsel %vm1080_vm14, %v1076_v8, inf  ;;  %v1853_v34 = vsel %vm1852_vm15, %v1848_v45, inf }
 0x37c   : > { %1082 = vmin.xlane.f32.xlu1 %v1081_v33  ;;  %1854 = vmin.xlane.f32.xlu0 %v1853_v34  ;;  %v5451_v34 = vld [vmem:[#allocation65_spill] sm:$0xff] }
 0x37d   : > { %v4541_v47 = vpop.xlane.xlu1 %1064  ;;  %v4543_v40 = vpop.xlane.xlu0 %1836 }
 0x37e   : > { %vm1066_vm0 = vcmp.eq.f32.partialorder %v5449_v25, %v4541_v47  ;;  %vm1838_vm1 = vcmp.eq.f32.partialorder %v5450_v17, %v4543_v40  ;;  %v5452_v25 = vld [vmem:[#allocation66_spill] sm:$0xff] }
 0x37f   : > { %v1067_v8 = vsel %vm1066_vm0, %v1062_v10, inf  ;;  %v1839_v45 = vsel %vm1838_vm1, %v1834_v59, inf }
 0x380   : > { %1068 = vmin.xlane.f32.xlu1 %v1067_v8  ;;  %1840 = vmin.xlane.f32.xlu0 %v1839_v45  ;;  %v5455_v45 = vld [vmem:[#allocation67_spill] sm:$0xff] }
 0x381   : > { %v4551_v58 = vpop.xlane.xlu1 %1106  ;;  %v4553_v33 = vpop.xlane.xlu0 %1878 }
 0x382   : > { %vm1108_vm2 = vcmp.eq.f32.partialorder %v5451_v34, %v4551_v58  ;;  %vm1880_vm3 = vcmp.eq.f32.partialorder %v5452_v25, %v4553_v33  ;;  %v5456_v34 = vld [vmem:[#allocation68_spill] sm:$0xff] }
 0x383   : > { %v1109_v10 = vsel %vm1108_vm2, %v1104_v18, inf  ;;  %v1881_v59 = vsel %vm1880_vm3, %v1876_v21, inf }
 0x384   : > { %1110 = vmin.xlane.f32.xlu1 %v1109_v10  ;;  %1882 = vmin.xlane.f32.xlu0 %v1881_v59  ;;  %v5459_v59 = vld [vmem:[#allocation69_spill] sm:$0xff] }
 0x385   : > { %v4561_v17 = vpop.xlane.xlu1 %1092  ;;  %v4563_v8 = vpop.xlane.xlu0 %1864 }
 0x386   : > { %5453 = vst [vmem:[#allocation22_spill] sm:$0xff] %v4561_v17  ;;  %5454 = vst [vmem:[#allocation23_spill] sm:$0xff] %v4563_v8  ;;  %vm1094_vm4 = vcmp.eq.f32.partialorder %v5455_v45, %v4561_v17  ;;  %vm1866_vm5 = vcmp.eq.f32.partialorder %v5456_v34, %v4563_v8  ;;  %v5460_v45 = vld [vmem:[#allocation70_spill] sm:$0xff]  ;;  %v5461_v34 = vld [vmem:[#allocation73_spill] sm:$0xff] }
 0x387   : > { %v1095_v18 = vsel %vm1094_vm4, %v1090_v31, inf  ;;  %v1867_v21 = vsel %vm1866_vm5, %v1862_v36, inf  ;;  %v1158_v54 = vand.u32 65535, %v5461_v34  ;;  %v5463_v17 = vld [vmem:[#allocation71_spill] sm:$0xff]  ;;  %vm2165_vm4 = vcmask 15360  }
 0x388   : > { %1096 = vmin.xlane.f32.xlu1 %v1095_v18  ;;  %1868 = vmin.xlane.f32.xlu0 %v1867_v21  ;;  %v5462_v18 = vld [vmem:[#allocation74_spill] sm:$0xff] }
 0x389   : > { %v4571_v25 = vpop.xlane.xlu1 %1134  ;;  %v4573_v10 = vpop.xlane.xlu0 %1906  ;;  %v1930_v60 = vand.u32 65535, %v5462_v18  ;;  %v1160_v39 = vcvt.s32.f32 %v1158_v54  ;;  %v5473_v54 = vld [vmem:[#allocation12_spill] sm:$0xff] }
 0x38a   : > { %5457 = vst [vmem:[#allocation24_spill] sm:$0xff] %v4571_v25  ;;  %5458 = vst [vmem:[#allocation25_spill] sm:$0xff] %v4573_v10  ;;  %vm1136_vm6 = vcmp.eq.f32.partialorder %v5459_v59, %v4571_v25  ;;  %vm1908_vm7 = vcmp.eq.f32.partialorder %v5460_v45, %v4573_v10  ;;  %v5464_v59 = vld [vmem:[#allocation72_spill] sm:$0xff]  ;;  %v5469_v25 = vld [vmem:[#allocation11_spill] sm:$0xff] }
 0x38b   : > { %v1137_v31 = vsel %vm1136_vm6, %v1132_v0, inf  ;;  %v1909_v36 = vsel %vm1908_vm7, %v1904_v3, inf  ;;  %v5465_v45 = vld [vmem:[#allocation76_spill] sm:$0xff]  ;;  %v1932_v43 = vcvt.s32.f32 %v1930_v60 }
 0x38c   : > { %1138 = vmin.xlane.f32.xlu1 %v1137_v31  ;;  %1910 = vmin.xlane.f32.xlu0 %v1909_v36  ;;  %v1144_v31 = vand.u32 65535, %v5465_v45  ;;  %v5466_v36 = vld [vmem:[#allocation77_spill] sm:$0xff] }
 0x38d   : > { %v4581_v21 = vpop.xlane.xlu1 %1120  ;;  %v4583_v8 = vpop.xlane.xlu0 %1892  ;;  %v1916_v34 = vand.u32 65535, %v5466_v36  ;;  %v1172_v36 = vand.u32 65535, %v4244_v41  ;;  %v5482_v41 = vld [vmem:[#allocation81_spill] sm:$0xff] }
 0x38e   : > { %vm1122_vm8 = vcmp.eq.f32.partialorder %v5463_v17, %v4581_v21  ;;  %vm1894_vm9 = vcmp.eq.f32.partialorder %v5464_v59, %v4583_v8  ;;  %v5470_v17 = vld [vmem:[#allocation75_spill] sm:$0xff] }
 0x38f   : > { %v1123_v0 = vsel %vm1122_vm8, %v1118_v12, inf  ;;  %v1895_v3 = vsel %vm1894_vm9, %v1890_v15, inf  ;;  %v1918_v45 = vcvt.s32.f32 %v1916_v34 }
 0x390   : > { %1124 = vmin.xlane.f32.xlu1 %v1123_v0  ;;  %1896 = vmin.xlane.f32.xlu0 %v1895_v3  ;;  %v1146_v3 = vcvt.s32.f32 %v1144_v31  ;;  %v5477_v31 = vld [vmem:[#allocation13_spill] sm:$0xff] }
 0x391   : > { %v4591_v18 = vpop.xlane.xlu1 %1162  ;;  %v4593_v10 = vpop.xlane.xlu0 %1934  ;;  %v1186_v34 = vand.u32 65535, %v5477_v31  ;;  %v5484_v31 = vld [vmem:[#allocation15_spill] sm:$0xff] }
 0x392   : > { %5467 = vst [vmem:[#allocation26_spill] sm:$0xff] %v4591_v18  ;;  %5468 = vst [vmem:[#allocation27_spill] sm:$0xff] %v4593_v10  ;;  %vm1164_vm10 = vcmp.eq.f32.partialorder %v5469_v25, %v4591_v18  ;;  %vm1936_vm11 = vcmp.eq.f32.partialorder %v5470_v17, %v4593_v10 }
 0x393   : > { %v1165_v12 = vsel %vm1164_vm10, %v1160_v39, inf  ;;  %v1937_v15 = vsel %vm1936_vm11, %v1932_v43, inf  ;;  %v5474_v39 = vld [vmem:[#allocation79_spill] sm:$0xff] }
 0x394   : > { %1166 = vmin.xlane.f32.xlu1 %v1165_v12  ;;  %1938 = vmin.xlane.f32.xlu0 %v1937_v15  ;;  %v1944_v43 = vand.u32 65535, %v5474_v39  ;;  %v5478_v15 = vld [vmem:[#allocation78_spill] sm:$0xff] }
 0x395   : > { %v4599_v59 = vpop.xlane.xlu1 %1148  ;;  %v4601_v0 = vpop.xlane.xlu0 %1920  ;;  %v1958_v10 = vand.u32 65535, %v5478_v15  ;;  %v5483_v39 = vld [vmem:[#allocation14_spill] sm:$0xff]  ;;  %v1188_v15 = vcvt.s32.f32 %v1186_v34 }
 0x396   : > { %5471 = vst [vmem:[#allocation28_spill] sm:$0xff] %v4599_v59  ;;  %5472 = vst [vmem:[#allocation29_spill] sm:$0xff] %v4601_v0  ;;  %vm1150_vm12 = vcmp.eq.f32.partialorder %v4223_v30, %v4599_v59  ;;  %vm1922_vm13 = vcmp.eq.f32.partialorder %v5473_v54, %v4601_v0  ;;  %v5481_v54 = vld [vmem:[#allocation80_spill] sm:$0xff] }
 0x397   : > { %v1151_v25 = vsel %vm1150_vm12, %v1146_v3, inf  ;;  %v1923_v60 = vsel %vm1922_vm13, %v1918_v45, inf  ;;  %v1174_v3 = vcvt.s32.f32 %v1172_v36  ;;  %v1946_v45 = vcvt.s32.f32 %v1944_v43 }
 0x398   : > { %1152 = vmin.xlane.f32.xlu1 %v1151_v25  ;;  %1924 = vmin.xlane.f32.xlu0 %v1923_v60  ;;  %v1960_v0 = vcvt.s32.f32 %v1958_v10 }
 0x399   : > { %v4609_v17 = vpop.xlane.xlu1 %1190  ;;  %v4611_v12 = vpop.xlane.xlu0 %1962 }
 0x39a   : > { %5475 = vst [vmem:[#allocation30_spill] sm:$0xff] %v4609_v17  ;;  %5476 = vst [vmem:[#allocation31_spill] sm:$0xff] %v4611_v12  ;;  %vm1192_vm0 = vcmp.eq.f32.partialorder %v5483_v39, %v4609_v17  ;;  %vm1964_vm1 = vcmp.eq.f32.partialorder %v5484_v31, %v4611_v12  ;;  %v805_v39 = vcvt.f32.s32 %v4304_v1  ;;  %v1577_v31 = vcvt.f32.s32 %v4306_v9  ;;  %v5487_v1 = vld [vmem:[#allocation16_spill] sm:$0xff] }
 0x39b   : > { %v1193_v36 = vsel %vm1192_vm0, %v1188_v15, inf  ;;  %v1965_v43 = vsel %vm1964_vm1, %v1960_v0, inf }
 0x39c   : > { %v1578_v17 = vshll.u32 %v1577_v31, 16  ;;  %v833_v31 = vcvt.f32.s32 %v4333_v57 }
 0x39d   : > { %v4615_v30 = vpop.xlane.xlu1 %1176  ;;  %v4617_v59 = vpop.xlane.xlu0 %1948 }
 0x39e   : > { %5479 = vst [vmem:[#allocation32_spill] sm:$0xff] %v4615_v30  ;;  %5480 = vst [vmem:[#allocation33_spill] sm:$0xff] %v4617_v59  ;;  %vm1178_vm14 = vcmp.eq.f32.partialorder %v5481_v54, %v4615_v30  ;;  %vm1950_vm15 = vcmp.eq.f32.partialorder %v5482_v41, %v4617_v59  ;;  %v5485_v54 = vld [vmem:[#allocation82_spill] sm:$0xff]  ;;  %v1549_v41 = vcvt.f32.s32 %v4277_v37  ;;  %v791_v37 = vcvt.f32.s32 %v4317_v51 }
 0x39f   : > { %v1179_v25 = vsel %vm1178_vm14, %v1174_v3, inf  ;;  %v1951_v60 = vsel %vm1950_vm15, %v1946_v45, inf  ;;  %v777_v30 = vcvt.f32.s32 %v5485_v54  ;;  %v763_v3 = vcvt.f32.s32 %v4288_v19 }
 0x3a0   : > { %1180 = vmin.xlane.f32.xlu1 %v1179_v25  ;;  %1952 = vmin.xlane.f32.xlu0 %v1951_v60  ;;  %v1535_v45 = vcvt.f32.s32 %v4290_v56  ;;  %v1550_v10 = vshll.u32 %v1549_v41, 16  ;;  %v806_v56 = vshll.u32 %v805_v39, 16  ;;  %v1563_v59 = vcvt.f32.s32 %v5487_v1 }
 0x3a1   : > { %v778_v34 = vshll.u32 %v777_v30, 16  ;;  %v792_v39 = vshll.u32 %v791_v37, 16  ;;  %v3051_v37 = vmov 0.0  }
 0x3a2   : > { %v1536_v54 = vshll.u32 %v1535_v45, 16 }
 0x3a4   : > { %1194 = vmin.xlane.f32.xlu1 %v1193_v36  ;;  %1966 = vmin.xlane.f32.xlu0 %v1965_v43  ;;  %v764_v36 = vshll.u32 %v763_v3, 16  ;;  %v5486_v43 = vld [vmem:[#allocation5_spill] sm:$0xff] }
 0x3a5   : > { %vm1328_vm2 = vcmp.eq.s32.totalorder %v5486_v43, 0  ;;  %vm2100_vm3 = vcmp.eq.s32.totalorder %v5486_v43, 1 }
 0x3ad   : > { %v775_v25 = vpop.xlane.xlu1 %774  ;;  %v1547_v60 = vpop.xlane.xlu0 %1546 }
 0x3ae   : > { %v776_v0 = vcvt.f32.s32 %v775_v25  ;;  %v1548_v15 = vcvt.f32.s32 %v1547_v60  ;;  %v1605_v25 = vcvt.f32.s32 %v4335_v49 }
 0x3b0   : > { %v779_v19 = vadd.s32 %v778_v34, %v776_v0  ;;  %v1551_v12 = vadd.s32 %v1550_v10, %v1548_v15  ;;  %v819_v34 = vcvt.f32.s32 %v4343_v27  ;;  %v1591_v10 = vcvt.f32.s32 %v4345_v14 }
 0x3b1   : > { %v761_v9 = vpop.xlane.xlu1 %760  ;;  %v1533_v30 = vpop.xlane.xlu0 %1532 }
 0x3b2   : > { %v1330_v51 = vsel %vm1328_vm2, %v779_v19, 0  ;;  %v2643_v41 = vadd.s32 4294967232, %v1551_v12  ;;  %vm1201_vm5 = vcmp.eq.s32.totalorder %v5486_v43, %v779_v19  ;;  %vm1973_vm6 = vcmp.eq.s32.totalorder %v5486_v43, %v1551_v12 }
 0x3b3   : > { %v762_v3 = vcvt.f32.s32 %v761_v9  ;;  %v1534_v45 = vcvt.f32.s32 %v1533_v30  ;;  %v2579_v57 = vsel %vm1201_vm5, 1.0, %v3051_v37  ;;  %v2611_v49 = vsel %vm1973_vm6, 1.0, %v3051_v37 }
 0x3b4   : > { %v2134_v60 = vsel %vm2100_vm3, %v2643_v41, %v1330_v51  ;;  %v1564_v51 = vshll.u32 %v1563_v59, 16  ;;  %v834_v41 = vshll.u32 %v833_v31, 16 }
 0x3b5   : > { %2167 = vst.msk [vmem:[%s4642_s11 + $0x8] sm:$0xff] %vm2165_vm4, %v2134_v60  ;;  %v765_v0 = vadd.s32 %v764_v36, %v762_v3  ;;  %v1537_v15 = vadd.s32 %v1536_v54, %v1534_v45  ;;  %v803_v1 = vpop.xlane.xlu1 %802  ;;  %v1575_v18 = vpop.xlane.xlu0 %1574 }
 0x3b6   : > { %v804_v9 = vcvt.f32.s32 %v803_v1  ;;  %v1576_v30 = vcvt.f32.s32 %v1575_v18  ;;  %v1606_v1 = vshll.u32 %v1605_v25, 16 }
 0x3b7   : > { %v1329_v27 = vsel %vm1328_vm2, %v765_v0, 0  ;;  %v2642_v14 = vadd.s32 4294967232, %v1537_v15  ;;  %vm1200_vm7 = vcmp.eq.s32.totalorder %v5486_v43, %v765_v0  ;;  %vm1972_vm8 = vcmp.eq.s32.totalorder %v5486_v43, %v1537_v15 }
 0x3b8   : > { %v807_v36 = vadd.s32 %v806_v56, %v804_v9  ;;  %v1579_v18 = vadd.s32 %v1578_v17, %v1576_v30  ;;  %v2578_v54 = vsel %vm1200_vm7, 1.0, %v3051_v37  ;;  %v2610_v19 = vsel %vm1972_vm8, 1.0, %v3051_v37 }
 0x3b9   : > { %v2133_v12 = vsel %vm2100_vm3, %v2642_v14, %v1329_v27  ;;  %v789_v3 = vpop.xlane.xlu1 %788  ;;  %v1561_v45 = vpop.xlane.xlu0 %1560  ;;  %v2068_v60 = vadd.f32 %v2610_v19, %v2578_v54  ;;  %v2069_v0 = vadd.f32 %v2611_v49, %v2579_v57  ;;  %v820_v15 = vshll.u32 %v819_v34, 16 }
 0x3ba   : > { %2166 = vst.msk [vmem:[%s4642_s11] sm:$0xff] %vm2165_vm4, %v2133_v12  ;;  %v1332_v56 = vsel %vm1328_vm2, %v807_v36, 0  ;;  %v2645_v17 = vadd.s32 4294967232, %v1579_v18  ;;  %vm1203_vm9 = vcmp.eq.s32.totalorder %v5486_v43, %v807_v36  ;;  %vm1975_vm10 = vcmp.eq.s32.totalorder %v5486_v43, %v1579_v18 }
 0x3bb   : > { %v790_v59 = vcvt.f32.s32 %v789_v3  ;;  %v1562_v31 = vcvt.f32.s32 %v1561_v45  ;;  %2891 = vmatprep.mubr.f32.mxu1 %v2068_v60  ;;  %v1592_v9 = vshll.u32 %v1591_v10, 16  ;;  %v861_v30 = vcvt.f32.s32 %v4359_v29 }
 0x3bc   : > { %v2136_v25 = vsel %vm2100_vm3, %v2645_v17, %v1332_v56  ;;  %2892 = vmatmul.mubr.f32.vlgmr.msra.gmra.mxu1 %v2069_v0  ;;  %v1633_v27 = vcvt.f32.s32 %v4361_v61  ;;  %v847_v14 = vcvt.f32.s32 %v4375_v16  ;;  %v2581_v29 = vsel %vm1203_vm9, 1.0, %v3051_v37 }
 0x3bd   : > { %2169 = vst.msk [vmem:[%s4642_s11 + $0x18] sm:$0xff] %vm2165_vm4, %v2136_v25  ;;  %v793_v57 = vadd.s32 %v792_v39, %v790_v59  ;;  %v1565_v49 = vadd.s32 %v1564_v51, %v1562_v31  ;;  %v831_v54 = vpop.xlane.xlu1 %830  ;;  %v1603_v19 = vpop.xlane.xlu0 %1602  ;;  %v2613_v34 = vsel %vm1975_vm10, 1.0, %v3051_v37  ;;  %v862_v45 = vshll.u32 %v861_v30, 16  ;;  %v5488_v59 = vld [vmem:[#allocation17_spill] sm:$0xff] }
 0x3be   : > { %v832_v12 = vcvt.f32.s32 %v831_v54  ;;  %v1604_v3 = vcvt.f32.s32 %v1603_v19  ;;  %v1634_v60 = vshll.u32 %v1633_v27, 16  ;;  %v1619_v31 = vcvt.f32.s32 %v5488_v59  ;;  %v5489_v54 = vld [vmem:[#allocation19_spill] sm:$0xff] }
 0x3bf   : > { %vm1202_vm11 = vcmp.eq.s32.totalorder %v5486_v43, %v793_v57  ;;  %v1331_v61 = vsel %vm1328_vm2, %v793_v57, 0  ;;  %vm1974_vm12 = vcmp.eq.s32.totalorder %v5486_v43, %v1565_v49  ;;  %v2644_v16 = vadd.s32 4294967232, %v1565_v49 }
 0x3c0   : > { %v835_v39 = vadd.s32 %v834_v41, %v832_v12  ;;  %v1607_v10 = vadd.s32 %v1606_v1, %v1604_v3  ;;  %v2580_v51 = vsel %vm1202_vm11, 1.0, %v3051_v37  ;;  %v2612_v36 = vsel %vm1974_vm12, 1.0, %v3051_v37  ;;  %v5490_v3 = vld [vmem:[#allocation18_spill] sm:$0xff] }
 0x3c1   : > { %v2135_v18 = vsel %vm2100_vm3, %v2644_v16, %v1331_v61  ;;  %v817_v56 = vpop.xlane.xlu1 %816  ;;  %v1589_v17 = vpop.xlane.xlu0 %1588  ;;  %v2070_v0 = vadd.f32 %v2612_v36, %v2580_v51  ;;  %v2071_v25 = vadd.f32 %v2613_v34, %v2581_v29  ;;  %v848_v57 = vshll.u32 %v847_v14, 16  ;;  %v5491_v16 = vld [vmem:[#allocation20_spill] sm:$0xff] }
 0x3c2   : > { %2168 = vst.msk [vmem:[%s4642_s11 + $0x10] sm:$0xff] %vm2165_vm4, %v2135_v18  ;;  %v1334_v41 = vsel %vm1328_vm2, %v835_v39, 0  ;;  %v2647_v1 = vadd.s32 4294967232, %v1607_v10  ;;  %vm1205_vm13 = vcmp.eq.s32.totalorder %v5486_v43, %v835_v39  ;;  %vm1977_vm14 = vcmp.eq.s32.totalorder %v5486_v43, %v1607_v10 }
 0x3c3   : > { %v818_v30 = vcvt.f32.s32 %v817_v56  ;;  %v1590_v27 = vcvt.f32.s32 %v1589_v17  ;;  %2894 = vmatprep.mubr.f32.mxu1 %v2070_v0  ;;  %v889_v49 = vcvt.f32.s32 %v4391_v38  ;;  %v1661_v19 = vcvt.f32.s32 %v5489_v54 }
 0x3c4   : > { %v2138_v12 = vsel %vm2100_vm3, %v2647_v1, %v1334_v41  ;;  %2895 = vmatmul.mubr.f32.gmra.mxu1 %v2071_v25  ;;  %v875_v61 = vcvt.f32.s32 %v5490_v3  ;;  %v1647_v29 = vcvt.f32.s32 %v5491_v16  ;;  %v2583_v38 = vsel %vm1205_vm13, 1.0, %v3051_v37 }
 0x3c5   : > { %2171 = vst.msk [vmem:[%s4642_s11 + $0x28] sm:$0xff] %vm2165_vm4, %v2138_v12  ;;  %v821_v34 = vadd.s32 %v820_v15, %v818_v30  ;;  %v1593_v51 = vadd.s32 %v1592_v9, %v1590_v27  ;;  %v859_v36 = vpop.xlane.xlu1 %858  ;;  %v1631_v18 = vpop.xlane.xlu0 %1630  ;;  %v2615_v17 = vsel %vm1977_vm14, 1.0, %v3051_v37  ;;  %v1620_v1 = vshll.u32 %v1619_v31, 16 }
 0x3c6   : > { %v860_v56 = vcvt.f32.s32 %v859_v36  ;;  %v1632_v14 = vcvt.f32.s32 %v1631_v18  ;;  %v890_v25 = vshll.u32 %v889_v49, 16  ;;  %v1662_v12 = vshll.u32 %v1661_v19, 16 }
 0x3c7   : > { %vm1204_vm15 = vcmp.eq.s32.totalorder %v5486_v43, %v821_v34  ;;  %v1333_v0 = vsel %vm1328_vm2, %v821_v34, 0  ;;  %vm1976_vm0 = vcmp.eq.s32.totalorder %v5486_v43, %v1593_v51  ;;  %v2646_v15 = vadd.s32 4294967232, %v1593_v51 }
 0x3c8   : > { %v863_v9 = vadd.s32 %v862_v45, %v860_v56  ;;  %v1635_v59 = vadd.s32 %v1634_v60, %v1632_v14  ;;  %v2582_v41 = vsel %vm1204_vm15, 1.0, %v3051_v37  ;;  %v2614_v39 = vsel %vm1976_vm0, 1.0, %v3051_v37 }
 0x3c9   : > { %v2137_v10 = vsel %vm2100_vm3, %v2646_v15, %v1333_v0  ;;  %v845_v30 = vpop.xlane.xlu1 %844  ;;  %v1617_v27 = vpop.xlane.xlu0 %1616  ;;  %v2072_v54 = vadd.f32 %v2614_v39, %v2582_v41  ;;  %v2073_v3 = vadd.f32 %v2615_v17, %v2583_v38  ;;  %v876_v16 = vshll.u32 %v875_v61, 16 }
 0x3ca   : > { %2170 = vst.msk [vmem:[%s4642_s11 + $0x20] sm:$0xff] %vm2165_vm4, %v2137_v10  ;;  %v1336_v45 = vsel %vm1328_vm2, %v863_v9, 0  ;;  %v2649_v60 = vadd.s32 4294967232, %v1635_v59  ;;  %vm1207_vm1 = vcmp.eq.s32.totalorder %v5486_v43, %v863_v9  ;;  %vm1979_vm5 = vcmp.eq.s32.totalorder %v5486_v43, %v1635_v59 }
 0x3cb   : > { %v846_v31 = vcvt.f32.s32 %v845_v30  ;;  %v1618_v49 = vcvt.f32.s32 %v1617_v27  ;;  %2897 = vmatprep.mubr.f32.mxu1 %v2072_v54  ;;  %v1648_v34 = vshll.u32 %v1647_v29, 16  ;;  %v917_v51 = vcvt.f32.s32 %v4411_v7 }
 0x3cc   : > { %v2140_v19 = vsel %vm2100_vm3, %v2649_v60, %v1336_v45  ;;  %2898 = vmatmul.mubr.f32.gmra.mxu1 %v2073_v3  ;;  %v1689_v36 = vcvt.f32.s32 %v4413_v52  ;;  %v903_v18 = vcvt.f32.s32 %v4421_v53  ;;  %v2585_v7 = vsel %vm1207_vm1, 1.0, %v3051_v37 }
 0x3cd   : > { %2173 = vst.msk [vmem:[%s4642_s11 + $0x38] sm:$0xff] %vm2165_vm4, %v2140_v19  ;;  %v849_v56 = vadd.s32 %v848_v57, %v846_v31  ;;  %v1621_v14 = vadd.s32 %v1620_v1, %v1618_v49  ;;  %v887_v38 = vpop.xlane.xlu1 %886  ;;  %v1659_v17 = vpop.xlane.xlu0 %1658  ;;  %v2617_v61 = vsel %vm1979_vm5, 1.0, %v3051_v37  ;;  %v918_v39 = vshll.u32 %v917_v51, 16 }
 0x3ce   : > { %v888_v0 = vcvt.f32.s32 %v887_v38  ;;  %v1660_v15 = vcvt.f32.s32 %v1659_v17  ;;  %v1690_v1 = vshll.u32 %v1689_v36, 16  ;;  %v1675_v54 = vcvt.f32.s32 %v4423_v35  ;;  %v5492_v36 = vld [vmem:[#allocation21_spill] sm:$0xff] }
 0x3cf   : > { %vm1206_vm6 = vcmp.eq.s32.totalorder %v5486_v43, %v849_v56  ;;  %v1335_v52 = vsel %vm1328_vm2, %v849_v56, 0  ;;  %vm1978_vm7 = vcmp.eq.s32.totalorder %v5486_v43, %v1621_v14  ;;  %v2648_v53 = vadd.s32 4294967232, %v1621_v14 }
 0x3d0   : > { %v891_v57 = vadd.s32 %v890_v25, %v888_v0  ;;  %v1663_v29 = vadd.s32 %v1662_v12, %v1660_v15  ;;  %v2584_v41 = vsel %vm1206_vm6, 1.0, %v3051_v37  ;;  %v2616_v9 = vsel %vm1978_vm7, 1.0, %v3051_v37 }
 0x3d1   : > { %v2139_v59 = vsel %vm2100_vm3, %v2648_v53, %v1335_v52  ;;  %v873_v10 = vpop.xlane.xlu1 %872  ;;  %v1645_v30 = vpop.xlane.xlu0 %1644  ;;  %v2074_v27 = vadd.f32 %v2616_v9, %v2584_v41  ;;  %v2075_v45 = vadd.f32 %v2617_v61, %v2585_v7  ;;  %v904_v31 = vshll.u32 %v903_v18, 16 }
 0x3d2   : > { %2172 = vst.msk [vmem:[%s4642_s11 + $0x30] sm:$0xff] %vm2165_vm4, %v2139_v59  ;;  %v1338_v25 = vsel %vm1328_vm2, %v891_v57, 0  ;;  %v2651_v12 = vadd.s32 4294967232, %v1663_v29  ;;  %vm1209_vm8 = vcmp.eq.s32.totalorder %v5486_v43, %v891_v57  ;;  %vm1981_vm9 = vcmp.eq.s32.totalorder %v5486_v43, %v1663_v29 }
 0x3d3   : > { %v874_v60 = vcvt.f32.s32 %v873_v10  ;;  %v1646_v3 = vcvt.f32.s32 %v1645_v30  ;;  %2900 = vmatprep.mubr.f32.mxu1 %v2074_v27  ;;  %v945_v49 = vcvt.f32.s32 %v4431_v46  ;;  %v1717_v35 = vcvt.f32.s32 %v4433_v2 }
 0x3d4   : > { %v2142_v51 = vsel %vm2100_vm3, %v2651_v12, %v1338_v25  ;;  %2901 = vmatmul.mubr.f32.gmra.mxu1 %v2075_v45  ;;  %v931_v19 = vcvt.f32.s32 %v4441_v48  ;;  %v1703_v56 = vcvt.f32.s32 %v5492_v36  ;;  %v2587_v46 = vsel %vm1209_vm8, 1.0, %v3051_v37 }
 0x3d5   : > { %2175 = vst.msk [vmem:[%s4642_s11 + $0x48] sm:$0xff] %vm2165_vm4, %v2142_v51  ;;  %v877_v14 = vadd.s32 %v876_v16, %v874_v60  ;;  %v1649_v38 = vadd.s32 %v1648_v34, %v1646_v3  ;;  %v915_v17 = vpop.xlane.xlu1 %914  ;;  %v1687_v0 = vpop.xlane.xlu0 %1686  ;;  %v2619_v2 = vsel %vm1981_vm9, 1.0, %v3051_v37  ;;  %v1676_v53 = vshll.u32 %v1675_v54, 16 }
 0x3d6   : > { %v916_v15 = vcvt.f32.s32 %v915_v17  ;;  %v1688_v18 = vcvt.f32.s32 %v1687_v0  ;;  %v946_v57 = vshll.u32 %v945_v49, 16  ;;  %v1718_v10 = vshll.u32 %v1717_v35, 16 }
 0x3d7   : > { %vm1208_vm10 = vcmp.eq.s32.totalorder %v5486_v43, %v877_v14  ;;  %v1337_v48 = vsel %vm1328_vm2, %v877_v14, 0  ;;  %vm1980_vm11 = vcmp.eq.s32.totalorder %v5486_v43, %v1649_v38  ;;  %v2650_v16 = vadd.s32 4294967232, %v1649_v38 }
 0x3d8   : > { %v919_v34 = vadd.s32 %v918_v39, %v916_v15  ;;  %v1691_v7 = vadd.s32 %v1690_v1, %v1688_v18  ;;  %v2586_v61 = vsel %vm1208_vm10, 1.0, %v3051_v37  ;;  %v2618_v52 = vsel %vm1980_vm11, 1.0, %v3051_v37 }
 0x3d9   : > { %v2141_v29 = vsel %vm2100_vm3, %v2650_v16, %v1337_v48  ;;  %v901_v41 = vpop.xlane.xlu1 %900  ;;  %v1673_v9 = vpop.xlane.xlu0 %1672  ;;  %v2076_v59 = vadd.f32 %v2618_v52, %v2586_v61  ;;  %v2077_v30 = vadd.f32 %v2619_v2, %v2587_v46  ;;  %v932_v25 = vshll.u32 %v931_v19, 16 }
 0x3da   : > { %2174 = vst.msk [vmem:[%s4642_s11 + $0x40] sm:$0xff] %vm2165_vm4, %v2141_v29  ;;  %v1340_v39 = vsel %vm1328_vm2, %v919_v34, 0  ;;  %v2653_v1 = vadd.s32 4294967232, %v1691_v7  ;;  %vm1211_vm12 = vcmp.eq.s32.totalorder %v5486_v43, %v919_v34  ;;  %vm1983_vm13 = vcmp.eq.s32.totalorder %v5486_v43, %v1691_v7 }
 0x3db   : > { %v902_v27 = vcvt.f32.s32 %v901_v41  ;;  %v1674_v54 = vcvt.f32.s32 %v1673_v9  ;;  %2903 = vmatprep.mubr.f32.mxu1 %v2076_v59  ;;  %v1704_v12 = vshll.u32 %v1703_v56, 16  ;;  %v973_v45 = vcvt.f32.s32 %v4451_v22 }
 0x3dc   : > { %v2144_v60 = vsel %vm2100_vm3, %v2653_v1, %v1340_v39  ;;  %2904 = vmatmul.mubr.f32.gmra.mxu1 %v2077_v30  ;;  %v1745_v3 = vcvt.f32.s32 %v4453_v32  ;;  %v959_v49 = vcvt.f32.s32 %v4461_v11  ;;  %v2589_v22 = vsel %vm1211_vm12, 1.0, %v3051_v37 }
 0x3dd   : > { %2177 = vst.msk [vmem:[%s4642_s11 + $0x58] sm:$0xff] %vm2165_vm4, %v2144_v60  ;;  %v905_v35 = vadd.s32 %v904_v31, %v902_v27  ;;  %v1677_v51 = vadd.s32 %v1676_v53, %v1674_v54  ;;  %v943_v36 = vpop.xlane.xlu1 %942  ;;  %v1715_v14 = vpop.xlane.xlu0 %1714  ;;  %v2621_v19 = vsel %vm1983_vm13, 1.0, %v3051_v37  ;;  %v974_v18 = vshll.u32 %v973_v45, 16 }
 0x3de   : > { %v944_v38 = vcvt.f32.s32 %v943_v36  ;;  %v1716_v17 = vcvt.f32.s32 %v1715_v14  ;;  %v1746_v46 = vshll.u32 %v1745_v3, 16  ;;  %v1731_v7 = vcvt.f32.s32 %v4463_v55 }
 0x3df   : > { %vm1210_vm14 = vcmp.eq.s32.totalorder %v5486_v43, %v905_v35  ;;  %v1339_v32 = vsel %vm1328_vm2, %v905_v35, 0  ;;  %vm1982_vm15 = vcmp.eq.s32.totalorder %v5486_v43, %v1677_v51  ;;  %v2652_v11 = vadd.s32 4294967232, %v1677_v51 }
 0x3e0   : > { %v947_v31 = vadd.s32 %v946_v57, %v944_v38  ;;  %v1719_v56 = vadd.s32 %v1718_v10, %v1716_v17  ;;  %v2588_v0 = vsel %vm1210_vm14, 1.0, %v3051_v37  ;;  %v2620_v15 = vsel %vm1982_vm15, 1.0, %v3051_v37 }
 0x3e1   : > { %v2143_v2 = vsel %vm2100_vm3, %v2652_v11, %v1339_v32  ;;  %v929_v48 = vpop.xlane.xlu1 %928  ;;  %v1701_v16 = vpop.xlane.xlu0 %1700  ;;  %v2078_v34 = vadd.f32 %v2620_v15, %v2588_v0  ;;  %v2079_v53 = vadd.f32 %v2621_v19, %v2589_v22  ;;  %v960_v41 = vshll.u32 %v959_v49, 16 }
 0x3e2   : > { %2176 = vst.msk [vmem:[%s4642_s11 + $0x50] sm:$0xff] %vm2165_vm4, %v2143_v2  ;;  %v1342_v61 = vsel %vm1328_vm2, %v947_v31, 0  ;;  %v2655_v52 = vadd.s32 4294967232, %v1719_v56  ;;  %vm1213_vm0 = vcmp.eq.s32.totalorder %v5486_v43, %v947_v31  ;;  %vm1985_vm1 = vcmp.eq.s32.totalorder %v5486_v43, %v1719_v56 }
 0x3e3   : > { %v930_v57 = vcvt.f32.s32 %v929_v48  ;;  %v1702_v29 = vcvt.f32.s32 %v1701_v16  ;;  %2906 = vmatprep.mubr.f32.mxu1 %v2078_v34  ;;  %v1001_v9 = vcvt.f32.s32 %v4471_v13  ;;  %v1773_v55 = vcvt.f32.s32 %v4473_v23 }
 0x3e4   : > { %v2146_v59 = vsel %vm2100_vm3, %v2655_v52, %v1342_v61  ;;  %2907 = vmatmul.mubr.f32.gmra.mxu1 %v2079_v53  ;;  %v987_v10 = vcvt.f32.s32 %v4481_v20  ;;  %v1759_v39 = vcvt.f32.s32 %v4483_v62  ;;  %v2591_v13 = vsel %vm1213_vm0, 1.0, %v3051_v37 }
 0x3e5   : > { %2179 = vst.msk [vmem:[%s4642_s11 + $0x68] sm:$0xff] %vm2165_vm4, %v2146_v59  ;;  %v933_v1 = vadd.s32 %v932_v25, %v930_v57  ;;  %v1705_v30 = vadd.s32 %v1704_v12, %v1702_v29  ;;  %v971_v27 = vpop.xlane.xlu1 %970  ;;  %v1743_v54 = vpop.xlane.xlu0 %1742  ;;  %v2623_v23 = vsel %vm1985_vm1, 1.0, %v3051_v37  ;;  %v1732_v35 = vshll.u32 %v1731_v7, 16 }
 0x3e6   : > { %v972_v45 = vcvt.f32.s32 %v971_v27  ;;  %v1744_v60 = vcvt.f32.s32 %v1743_v54  ;;  %v1002_v51 = vshll.u32 %v1001_v9, 16  ;;  %v1774_v22 = vshll.u32 %v1773_v55, 16 }
 0x3e7   : > { %vm1212_vm5 = vcmp.eq.s32.totalorder %v5486_v43, %v933_v1  ;;  %v1341_v20 = vsel %vm1328_vm2, %v933_v1, 0  ;;  %vm1984_vm6 = vcmp.eq.s32.totalorder %v5486_v43, %v1705_v30  ;;  %v2654_v62 = vadd.s32 4294967232, %v1705_v30 }
 0x3e8   : > { %v975_v25 = vadd.s32 %v974_v18, %v972_v45  ;;  %v1747_v12 = vadd.s32 %v1746_v46, %v1744_v60  ;;  %v2590_v3 = vsel %vm1212_vm5, 1.0, %v3051_v37  ;;  %v2622_v49 = vsel %vm1984_vm6, 1.0, %v3051_v37 }
 0x3e9   : > { %v2145_v36 = vsel %vm2100_vm3, %v2654_v62, %v1341_v20  ;;  %v957_v14 = vpop.xlane.xlu1 %956  ;;  %v1729_v38 = vpop.xlane.xlu0 %1728  ;;  %v2080_v17 = vadd.f32 %v2622_v49, %v2590_v3  ;;  %v2081_v11 = vadd.f32 %v2623_v23, %v2591_v13  ;;  %v988_v0 = vshll.u32 %v987_v10, 16 }
 0x3ea   : > { %2178 = vst.msk [vmem:[%s4642_s11 + $0x60] sm:$0xff] %vm2165_vm4, %v2145_v36  ;;  %v1344_v19 = vsel %vm1328_vm2, %v975_v25, 0  ;;  %v2657_v32 = vadd.s32 4294967232, %v1747_v12  ;;  %vm1215_vm7 = vcmp.eq.s32.totalorder %v5486_v43, %v975_v25  ;;  %vm1987_vm8 = vcmp.eq.s32.totalorder %v5486_v43, %v1747_v12 }
 0x3eb   : > { %v958_v31 = vcvt.f32.s32 %v957_v14  ;;  %v1730_v56 = vcvt.f32.s32 %v1729_v38  ;;  %2909 = vmatprep.mubr.f32.mxu1 %v2080_v17  ;;  %v1760_v15 = vshll.u32 %v1759_v39, 16  ;;  %v1029_v18 = vcvt.f32.s32 %v4491_v24 }
 0x3ec   : > { %v2148_v46 = vsel %vm2100_vm3, %v2657_v32, %v1344_v19  ;;  %2910 = vmatmul.mubr.f32.gmra.mxu1 %v2081_v11  ;;  %v1801_v2 = vcvt.f32.s32 %v4493_v44  ;;  %v1015_v48 = vcvt.f32.s32 %v4501_v4  ;;  %v2593_v24 = vsel %vm1215_vm7, 1.0, %v3051_v37 }
 0x3ed   : > { %2181 = vst.msk [vmem:[%s4642_s11 + $0x78] sm:$0xff] %vm2165_vm4, %v2148_v46  ;;  %v961_v16 = vadd.s32 %v960_v41, %v958_v31  ;;  %v1733_v34 = vadd.s32 %v1732_v35, %v1730_v56  ;;  %v999_v7 = vpop.xlane.xlu1 %998  ;;  %v1771_v61 = vpop.xlane.xlu0 %1770  ;;  %v2625_v57 = vsel %vm1987_vm8, 1.0, %v3051_v37  ;;  %v1787_v59 = vcvt.f32.s32 %v4503_v42 }
 0x3ee   : > { %v1000_v52 = vcvt.f32.s32 %v999_v7  ;;  %v1772_v53 = vcvt.f32.s32 %v1771_v61  ;;  %v2083_v27 = vadd.f32 %v2625_v57, %v2593_v24  ;;  %v1030_v20 = vshll.u32 %v1029_v18, 16 }
 0x3ef   : > { %vm1214_vm9 = vcmp.eq.s32.totalorder %v5486_v43, %v961_v16  ;;  %v1343_v44 = vsel %vm1328_vm2, %v961_v16, 0  ;;  %vm1986_vm10 = vcmp.eq.s32.totalorder %v5486_v43, %v1733_v34  ;;  %v2656_v4 = vadd.s32 4294967232, %v1733_v34 }
 0x3f0   : > { %v1003_v29 = vadd.s32 %v1002_v51, %v1000_v52  ;;  %v1775_v41 = vadd.s32 %v1774_v22, %v1772_v53  ;;  %v2592_v9 = vsel %vm1214_vm9, 1.0, %v3051_v37  ;;  %v2624_v55 = vsel %vm1986_vm10, 1.0, %v3051_v37 }
 0x3f1   : > { %v2147_v10 = vsel %vm2100_vm3, %v2656_v4, %v1343_v44  ;;  %v985_v39 = vpop.xlane.xlu1 %984  ;;  %v1757_v1 = vpop.xlane.xlu0 %1756  ;;  %v2082_v30 = vadd.f32 %v2624_v55, %v2592_v9  ;;  %v1802_v62 = vshll.u32 %v1801_v2, 16  ;;  %v1016_v3 = vshll.u32 %v1015_v48, 16 }
 0x3f2   : > { %2180 = vst.msk [vmem:[%s4642_s11 + $0x70] sm:$0xff] %vm2165_vm4, %v2147_v10  ;;  %vm1217_vm11 = vcmp.eq.s32.totalorder %v5486_v43, %v1003_v29  ;;  %v1346_v54 = vsel %vm1328_vm2, %v1003_v29, 0  ;;  %vm1989_vm12 = vcmp.eq.s32.totalorder %v5486_v43, %v1775_v41  ;;  %v2659_v45 = vadd.s32 4294967232, %v1775_v41 }
 0x3f3   : > { %v986_v60 = vcvt.f32.s32 %v985_v39  ;;  %v1758_v42 = vcvt.f32.s32 %v1757_v1  ;;  %2912 = vmatprep.mubr.f32.mxu1 %v2082_v30  ;;  %v2595_v13 = vsel %vm1217_vm11, 1.0, %v3051_v37  ;;  %v2627_v23 = vsel %vm1989_vm12, 1.0, %v3051_v37 }
 0x3f4   : > { %v2150_v25 = vsel %vm2100_vm3, %v2659_v45, %v1346_v54  ;;  %2913 = vmatmul.mubr.f32.gmra.mxu1 %v2083_v27  ;;  %v2085_v12 = vadd.f32 %v2627_v23, %v2595_v13  ;;  %v1788_v49 = vshll.u32 %v1787_v59, 16  ;;  %v1057_v38 = vcvt.f32.s32 %v4511_v26 }
 0x3f5   : > { %2183 = vst.msk [vmem:[%s4642_s11 + $0x88] sm:$0xff] %vm2165_vm4, %v2150_v25  ;;  %v989_v35 = vadd.s32 %v988_v0, %v986_v60  ;;  %v1761_v51 = vadd.s32 %v1760_v15, %v1758_v42  ;;  %v1027_v36 = vpop.xlane.xlu1 %1026  ;;  %v1799_v14 = vpop.xlane.xlu0 %1798  ;;  %v1829_v17 = vcvt.f32.s32 %v4513_v28  ;;  %v1043_v26 = vcvt.f32.s32 %v4521_v63 }
 0x3f6   : > { %v1028_v22 = vcvt.f32.s32 %v1027_v36  ;;  %v1800_v19 = vcvt.f32.s32 %v1799_v14  ;;  %v1815_v28 = vcvt.f32.s32 %v4523_v50  ;;  %v1058_v52 = vshll.u32 %v1057_v38, 16 }
 0x3f7   : > { %vm1216_vm13 = vcmp.eq.s32.totalorder %v5486_v43, %v989_v35  ;;  %v1345_v32 = vsel %vm1328_vm2, %v989_v35, 0  ;;  %vm1988_vm14 = vcmp.eq.s32.totalorder %v5486_v43, %v1761_v51  ;;  %v2658_v11 = vadd.s32 4294967232, %v1761_v51 }
 0x3f8   : > { %v1031_v31 = vadd.s32 %v1030_v20, %v1028_v22  ;;  %v1803_v56 = vadd.s32 %v1802_v62, %v1800_v19  ;;  %v2594_v0 = vsel %vm1216_vm13, 1.0, %v3051_v37  ;;  %v2626_v15 = vsel %vm1988_vm14, 1.0, %v3051_v37 }
 0x3f9   : > { %v2149_v18 = vsel %vm2100_vm3, %v2658_v11, %v1345_v32  ;;  %v1013_v46 = vpop.xlane.xlu1 %1012  ;;  %v1785_v2 = vpop.xlane.xlu0 %1784  ;;  %v2084_v48 = vadd.f32 %v2626_v15, %v2594_v0  ;;  %v1830_v53 = vshll.u32 %v1829_v17, 16  ;;  %v1044_v44 = vshll.u32 %v1043_v26, 16 }
 0x3fa   : > { %2182 = vst.msk [vmem:[%s4642_s11 + $0x80] sm:$0xff] %vm2165_vm4, %v2149_v18  ;;  %vm1219_vm15 = vcmp.eq.s32.totalorder %v5486_v43, %v1031_v31  ;;  %v1348_v16 = vsel %vm1328_vm2, %v1031_v31, 0  ;;  %vm1991_vm0 = vcmp.eq.s32.totalorder %v5486_v43, %v1803_v56  ;;  %v2661_v34 = vadd.s32 4294967232, %v1803_v56 }
 0x3fb   : > { %v1014_v63 = vcvt.f32.s32 %v1013_v46  ;;  %v1786_v7 = vcvt.f32.s32 %v1785_v2  ;;  %2915 = vmatprep.mubr.f32.mxu1 %v2084_v48  ;;  %v2597_v50 = vsel %vm1219_vm15, 1.0, %v3051_v37  ;;  %v2629_v61 = vsel %vm1991_vm0, 1.0, %v3051_v37 }
 0x3fc   : > { %v2152_v24 = vsel %vm2100_vm3, %v2661_v34, %v1348_v16  ;;  %2916 = vmatmul.mubr.f32.gmra.mxu1 %v2085_v12  ;;  %v2087_v57 = vadd.f32 %v2629_v61, %v2597_v50  ;;  %v1816_v4 = vshll.u32 %v1815_v28, 16  ;;  %v1085_v59 = vcvt.f32.s32 %v4531_v5 }
 0x3fd   : > { %2185 = vst.msk [vmem:[%s4642_s11 + $0x98] sm:$0xff] %vm2165_vm4, %v2152_v24  ;;  %v1017_v29 = vadd.s32 %v1016_v3, %v1014_v63  ;;  %v1789_v41 = vadd.s32 %v1788_v49, %v1786_v7  ;;  %v1055_v9 = vpop.xlane.xlu1 %1054  ;;  %v1827_v55 = vpop.xlane.xlu0 %1826  ;;  %v1857_v10 = vcvt.f32.s32 %v4533_v6  ;;  %v1071_v5 = vcvt.f32.s32 %v4541_v47 }
 0x3fe   : > { %v1056_v39 = vcvt.f32.s32 %v1055_v9  ;;  %v1828_v1 = vcvt.f32.s32 %v1827_v55  ;;  %v1843_v6 = vcvt.f32.s32 %v4543_v40  ;;  %v1086_v35 = vshll.u32 %v1085_v59, 16 }
 0x3ff   : > { %vm1218_vm1 = vcmp.eq.s32.totalorder %v5486_v43, %v1017_v29  ;;  %v1347_v30 = vsel %vm1328_vm2, %v1017_v29, 0  ;;  %vm1990_vm5 = vcmp.eq.s32.totalorder %v5486_v43, %v1789_v41  ;;  %v2660_v27 = vadd.s32 4294967232, %v1789_v41 }
 0x400   : > { %v1059_v54 = vadd.s32 %v1058_v52, %v1056_v39  ;;  %v1831_v45 = vadd.s32 %v1830_v53, %v1828_v1  ;;  %v2596_v60 = vsel %vm1218_vm1, 1.0, %v3051_v37  ;;  %v2628_v42 = vsel %vm1990_vm5, 1.0, %v3051_v37 }
 0x401   : > { %v2151_v13 = vsel %vm2100_vm3, %v2660_v27, %v1347_v30  ;;  %v1041_v23 = vpop.xlane.xlu1 %1040  ;;  %v1813_v20 = vpop.xlane.xlu0 %1812  ;;  %v2086_v62 = vadd.f32 %v2628_v42, %v2596_v60  ;;  %v1858_v51 = vshll.u32 %v1857_v10, 16  ;;  %v1072_v38 = vshll.u32 %v1071_v5, 16  ;;  %v5496_v60 = vld [vmem:[#allocation25_spill] sm:$0xff] }
 0x402   : > { %2184 = vst.msk [vmem:[%s4642_s11 + $0x90] sm:$0xff] %vm2165_vm4, %v2151_v13  ;;  %vm1221_vm6 = vcmp.eq.s32.totalorder %v5486_v43, %v1059_v54  ;;  %v1350_v25 = vsel %vm1328_vm2, %v1059_v54, 0  ;;  %vm1993_vm7 = vcmp.eq.s32.totalorder %v5486_v43, %v1831_v45  ;;  %v2663_v12 = vadd.s32 4294967232, %v1831_v45  ;;  %v5495_v54 = vld [vmem:[#allocation24_spill] sm:$0xff] }
 0x403   : > { %v1042_v47 = vcvt.f32.s32 %v1041_v23  ;;  %v1814_v3 = vcvt.f32.s32 %v1813_v20  ;;  %2918 = vmatprep.mubr.f32.mxu1 %v2086_v62  ;;  %v2599_v40 = vsel %vm1221_vm6, 1.0, %v3051_v37  ;;  %v2631_v49 = vsel %vm1993_vm7, 1.0, %v3051_v37 }
 0x404   : > { %v2154_v36 = vsel %vm2100_vm3, %v2663_v12, %v1350_v25  ;;  %2919 = vmatmul.mubr.f32.gmra.mxu1 %v2087_v57  ;;  %v2089_v14 = vadd.f32 %v2631_v49, %v2599_v40  ;;  %v1844_v17 = vshll.u32 %v1843_v6, 16  ;;  %v1113_v31 = vcvt.f32.s32 %v4551_v58  ;;  %v5493_v58 = vld [vmem:[#allocation22_spill] sm:$0xff] }
 0x405   : > { %2187 = vst.msk [vmem:[%s4642_s11 + $0xa8] sm:$0xff] %vm2165_vm4, %v2154_v36  ;;  %v1045_v22 = vadd.s32 %v1044_v44, %v1042_v47  ;;  %v1817_v19 = vadd.s32 %v1816_v4, %v1814_v3  ;;  %v1083_v32 = vpop.xlane.xlu1 %1082  ;;  %v1855_v11 = vpop.xlane.xlu0 %1854  ;;  %v1885_v56 = vcvt.f32.s32 %v4553_v33  ;;  %v1099_v16 = vcvt.f32.s32 %v5493_v58  ;;  %v5494_v33 = vld [vmem:[#allocation23_spill] sm:$0xff] }
 0x406   : > { %v1084_v0 = vcvt.f32.s32 %v1083_v32  ;;  %v1856_v15 = vcvt.f32.s32 %v1855_v11  ;;  %v1871_v34 = vcvt.f32.s32 %v5494_v33  ;;  %v1114_v29 = vshll.u32 %v1113_v31, 16 }
 0x407   : > { %vm1220_vm8 = vcmp.eq.s32.totalorder %v5486_v43, %v1045_v22  ;;  %v1349_v26 = vsel %vm1328_vm2, %v1045_v22, 0  ;;  %vm1992_vm9 = vcmp.eq.s32.totalorder %v5486_v43, %v1817_v19  ;;  %v2662_v28 = vadd.s32 4294967232, %v1817_v19 }
 0x408   : > { %v1087_v18 = vadd.s32 %v1086_v35, %v1084_v0  ;;  %v1859_v46 = vadd.s32 %v1858_v51, %v1856_v15  ;;  %v2598_v2 = vsel %vm1220_vm8, 1.0, %v3051_v37  ;;  %v2630_v48 = vsel %vm1992_vm9, 1.0, %v3051_v37 }
 0x409   : > { %v2153_v63 = vsel %vm2100_vm3, %v2662_v28, %v1349_v26  ;;  %v1069_v7 = vpop.xlane.xlu1 %1068  ;;  %v1841_v50 = vpop.xlane.xlu0 %1840  ;;  %v2088_v61 = vadd.f32 %v2630_v48, %v2598_v2  ;;  %v1886_v41 = vshll.u32 %v1885_v56, 16  ;;  %v1100_v59 = vshll.u32 %v1099_v16, 16 }
 0x40a   : > { %2186 = vst.msk [vmem:[%s4642_s11 + $0xa0] sm:$0xff] %vm2165_vm4, %v2153_v63  ;;  %vm1223_vm10 = vcmp.eq.s32.totalorder %v5486_v43, %v1087_v18  ;;  %v1352_v52 = vsel %vm1328_vm2, %v1087_v18, 0  ;;  %vm1995_vm11 = vcmp.eq.s32.totalorder %v5486_v43, %v1859_v46  ;;  %v2665_v53 = vadd.s32 4294967232, %v1859_v46  ;;  %v5497_v63 = vld [vmem:[#allocation26_spill] sm:$0xff] }
 0x40b   : > { %v1070_v24 = vcvt.f32.s32 %v1069_v7  ;;  %v1842_v57 = vcvt.f32.s32 %v1841_v50  ;;  %2921 = vmatprep.mubr.f32.mxu1 %v2088_v61  ;;  %v2601_v44 = vsel %vm1223_vm10, 1.0, %v3051_v37  ;;  %v2633_v4 = vsel %vm1995_vm11, 1.0, %v3051_v37  ;;  %v5498_v50 = vld [vmem:[#allocation27_spill] sm:$0xff] }
 0x40c   : > { %v2156_v9 = vsel %vm2100_vm3, %v2665_v53, %v1352_v52  ;;  %2922 = vmatmul.mubr.f32.gmra.mxu1 %v2089_v14  ;;  %v2091_v55 = vadd.f32 %v2633_v4, %v2601_v44  ;;  %v1872_v10 = vshll.u32 %v1871_v34, 16  ;;  %v1141_v45 = vcvt.f32.s32 %v5495_v54 }
 0x40d   : > { %2189 = vst.msk [vmem:[%s4642_s11 + $0xb8] sm:$0xff] %vm2165_vm4, %v2156_v9  ;;  %v1073_v39 = vadd.s32 %v1072_v38, %v1070_v24  ;;  %v1845_v1 = vadd.s32 %v1844_v17, %v1842_v57  ;;  %v1111_v30 = vpop.xlane.xlu1 %1110  ;;  %v1883_v27 = vpop.xlane.xlu0 %1882  ;;  %v1913_v42 = vcvt.f32.s32 %v5496_v60  ;;  %v1127_v47 = vcvt.f32.s32 %v4581_v21 }
 0x40e   : > { %v1112_v5 = vcvt.f32.s32 %v1111_v30  ;;  %v1884_v6 = vcvt.f32.s32 %v1883_v27  ;;  %v1899_v3 = vcvt.f32.s32 %v4583_v8  ;;  %v1142_v32 = vshll.u32 %v1141_v45, 16  ;;  %v5500_v30 = vld [vmem:[#allocation29_spill] sm:$0xff] }
 0x40f   : > { %vm1222_vm12 = vcmp.eq.s32.totalorder %v5486_v43, %v1073_v39  ;;  %v1351_v13 = vsel %vm1328_vm2, %v1073_v39, 0  ;;  %vm1994_vm13 = vcmp.eq.s32.totalorder %v5486_v43, %v1845_v1  ;;  %v2664_v23 = vadd.s32 4294967232, %v1845_v1  ;;  %v5499_v39 = vld [vmem:[#allocation28_spill] sm:$0xff] }
 0x410   : > { %v1115_v20 = vadd.s32 %v1114_v29, %v1112_v5  ;;  %v1887_v62 = vadd.s32 %v1886_v41, %v1884_v6  ;;  %v2600_v25 = vsel %vm1222_vm12, 1.0, %v3051_v37  ;;  %v2632_v12 = vsel %vm1994_vm13, 1.0, %v3051_v37 }
 0x411   : > { %v2155_v40 = vsel %vm2100_vm3, %v2664_v23, %v1351_v13  ;;  %v1097_v49 = vpop.xlane.xlu1 %1096  ;;  %v1869_v35 = vpop.xlane.xlu0 %1868  ;;  %v2090_v51 = vadd.f32 %v2632_v12, %v2600_v25  ;;  %v1914_v11 = vshll.u32 %v1913_v42, 16  ;;  %v1128_v26 = vshll.u32 %v1127_v47, 16 }
 0x412   : > { %2188 = vst.msk [vmem:[%s4642_s11 + $0xb0] sm:$0xff] %vm2165_vm4, %v2155_v40  ;;  %vm1225_vm14 = vcmp.eq.s32.totalorder %v5486_v43, %v1115_v20  ;;  %v1354_v36 = vsel %vm1328_vm2, %v1115_v20, 0  ;;  %vm1997_vm15 = vcmp.eq.s32.totalorder %v5486_v43, %v1887_v62  ;;  %v2667_v14 = vadd.s32 4294967232, %v1887_v62 }
 0x413   : > { %v1098_v21 = vcvt.f32.s32 %v1097_v49  ;;  %v1870_v38 = vcvt.f32.s32 %v1869_v35  ;;  %2924 = vmatprep.mubr.f32.mxu1 %v2090_v51  ;;  %v2603_v8 = vsel %vm1225_vm14, 1.0, %v3051_v37  ;;  %v2635_v17 = vsel %vm1997_vm15, 1.0, %v3051_v37 }
 0x414   : > { %v2158_v22 = vsel %vm2100_vm3, %v2667_v14, %v1354_v36  ;;  %2925 = vmatmul.mubr.f32.gmra.mxu1 %v2091_v55  ;;  %v2093_v19 = vadd.f32 %v2635_v17, %v2603_v8  ;;  %v1900_v28 = vshll.u32 %v1899_v3, 16  ;;  %v1169_v7 = vcvt.f32.s32 %v5497_v63 }
 0x415   : > { %2191 = vst.msk [vmem:[%s4642_s11 + $0xc8] sm:$0xff] %vm2165_vm4, %v2158_v22  ;;  %v1101_v31 = vadd.s32 %v1100_v59, %v1098_v21  ;;  %v1873_v56 = vadd.s32 %v1872_v10, %v1870_v38  ;;  %v1139_v0 = vpop.xlane.xlu1 %1138  ;;  %v1911_v15 = vpop.xlane.xlu0 %1910  ;;  %v1941_v61 = vcvt.f32.s32 %v5498_v50  ;;  %v1155_v1 = vcvt.f32.s32 %v5499_v39 }
 0x416   : > { %v1140_v18 = vcvt.f32.s32 %v1139_v0  ;;  %v1912_v46 = vcvt.f32.s32 %v1911_v15  ;;  %v1927_v27 = vcvt.f32.s32 %v5500_v30  ;;  %v1170_v5 = vshll.u32 %v1169_v7, 16  ;;  %v5501_v0 = vld [vmem:[#allocation32_spill] sm:$0xff] }
 0x417   : > { %vm1224_vm0 = vcmp.eq.s32.totalorder %v5486_v43, %v1101_v31  ;;  %v1353_v2 = vsel %vm1328_vm2, %v1101_v31, 0  ;;  %vm1996_vm1 = vcmp.eq.s32.totalorder %v5486_v43, %v1873_v56  ;;  %v2666_v48 = vadd.s32 4294967232, %v1873_v56 }
 0x418   : > { %v1143_v58 = vadd.s32 %v1142_v32, %v1140_v18  ;;  %v1915_v16 = vadd.s32 %v1914_v11, %v1912_v46  ;;  %v2602_v33 = vsel %vm1224_vm0, 1.0, %v3051_v37  ;;  %v2634_v34 = vsel %vm1996_vm1, 1.0, %v3051_v37 }
 0x419   : > { %v2157_v52 = vsel %vm2100_vm3, %v2666_v48, %v1353_v2  ;;  %v1125_v53 = vpop.xlane.xlu1 %1124  ;;  %v1897_v24 = vpop.xlane.xlu0 %1896  ;;  %v2092_v57 = vadd.f32 %v2634_v34, %v2602_v33  ;;  %v1942_v6 = vshll.u32 %v1941_v61, 16  ;;  %v1156_v40 = vshll.u32 %v1155_v1, 16  ;;  %v5504_v33 = vld [vmem:[#allocation31_spill] sm:$0xff] }
 0x41a   : > { %2190 = vst.msk [vmem:[%s4642_s11 + $0xc0] sm:$0xff] %vm2165_vm4, %v2157_v52  ;;  %vm1227_vm5 = vcmp.eq.s32.totalorder %v5486_v43, %v1143_v58  ;;  %v1356_v44 = vsel %vm1328_vm2, %v1143_v58, 0  ;;  %vm1999_vm6 = vcmp.eq.s32.totalorder %v5486_v43, %v1915_v16  ;;  %v2669_v4 = vadd.s32 4294967232, %v1915_v16  ;;  %v5503_v58 = vld [vmem:[#allocation30_spill] sm:$0xff] }
 0x41b   : > { %v1126_v29 = vcvt.f32.s32 %v1125_v53  ;;  %v1898_v41 = vcvt.f32.s32 %v1897_v24  ;;  %2927 = vmatprep.mubr.f32.mxu1 %v2092_v57  ;;  %v2605_v9 = vsel %vm1227_vm5, 1.0, %v3051_v37  ;;  %v2637_v55 = vsel %vm1999_vm6, 1.0, %v3051_v37 }
 0x41c   : > { %v2160_v59 = vsel %vm2100_vm3, %v2669_v4, %v1356_v44  ;;  %2928 = vmatmul.mubr.f32.gmra.mxu1 %v2093_v19  ;;  %v2095_v10 = vadd.f32 %v2637_v55, %v2605_v9  ;;  %v1928_v49 = vshll.u32 %v1927_v27, 16  ;;  %v1183_v15 = vcvt.f32.s32 %v5501_v0 }
 0x41d   : > { %2193 = vst.msk [vmem:[%s4642_s11 + $0xd8] sm:$0xff] %vm2165_vm4, %v2160_v59  ;;  %v1129_v54 = vadd.s32 %v1128_v26, %v1126_v29  ;;  %v1901_v45 = vadd.s32 %v1900_v28, %v1898_v41  ;;  %v1167_v60 = vpop.xlane.xlu1 %1166  ;;  %v1939_v42 = vpop.xlane.xlu0 %1938  ;;  %v5502_v26 = vld [vmem:[#allocation33_spill] sm:$0xff]  ;;  %v1197_v16 = vcvt.f32.s32 %v5503_v58  ;;  %v1969_v34 = vcvt.f32.s32 %v5504_v33 }
 0x41e   : > { %v1168_v13 = vcvt.f32.s32 %v1167_v60  ;;  %v1940_v23 = vcvt.f32.s32 %v1939_v42  ;;  %v1955_v28 = vcvt.f32.s32 %v5502_v26  ;;  %v1184_v52 = vshll.u32 %v1183_v15, 16 }
 0x41f   : > { %vm1226_vm7 = vcmp.eq.s32.totalorder %v5486_v43, %v1129_v54  ;;  %v1355_v20 = vsel %vm1328_vm2, %v1129_v54, 0  ;;  %vm1998_vm8 = vcmp.eq.s32.totalorder %v5486_v43, %v1901_v45  ;;  %v2668_v62 = vadd.s32 4294967232, %v1901_v45 }
 0x420   : > { %v1171_v25 = vadd.s32 %v1170_v5, %v1168_v13  ;;  %v1943_v12 = vadd.s32 %v1942_v6, %v1940_v23  ;;  %v2604_v47 = vsel %vm1226_vm7, 1.0, %v3051_v37  ;;  %v2636_v3 = vsel %vm1998_vm8, 1.0, %v3051_v37 }
 0x421   : > { %v2159_v35 = vsel %vm2100_vm3, %v2668_v62, %v1355_v20  ;;  %v1153_v51 = vpop.xlane.xlu1 %1152  ;;  %v1925_v36 = vpop.xlane.xlu0 %1924  ;;  %v2094_v14 = vadd.f32 %v2636_v3, %v2604_v47  ;;  %v1956_v53 = vshll.u32 %v1955_v28, 16  ;;  %v1198_v29 = vshll.u32 %v1197_v16, 16 }
 0x422   : > { %2192 = vst.msk [vmem:[%s4642_s11 + $0xd0] sm:$0xff] %vm2165_vm4, %v2159_v35  ;;  %vm1229_vm9 = vcmp.eq.s32.totalorder %v5486_v43, %v1171_v25  ;;  %v1358_v21 = vsel %vm1328_vm2, %v1171_v25, 0  ;;  %vm2001_vm10 = vcmp.eq.s32.totalorder %v5486_v43, %v1943_v12  ;;  %v2671_v38 = vadd.s32 4294967232, %v1943_v12  ;;  %v5058_v25 = vld [vmem:[%s5178_s1 + $0x108] ss:$0 sm:$0xff] }
 0x423   : > { %v1154_v8 = vcvt.f32.s32 %v1153_v51  ;;  %v1926_v17 = vcvt.f32.s32 %v1925_v36  ;;  %2930 = vmatprep.mubr.f32.mxu1 %v2094_v14  ;;  %v2607_v22 = vsel %vm1229_vm9, 1.0, %v3051_v37  ;;  %v2639_v19 = vsel %vm2001_vm10, 1.0, %v3051_v37 }
 0x424   : > { %v2162_v32 = vsel %vm2100_vm3, %v2671_v38, %v1358_v21  ;;  %2931 = vmatmul.mubr.f32.gmra.mxu1 %v2095_v10  ;;  %v2097_v11 = vadd.f32 %v2639_v19, %v2607_v22  ;;  %v1970_v41 = vshll.u32 %v1969_v34, 16 }
 0x425   : > { %2195 = vst.msk [vmem:[%s4642_s11 + $0xe8] sm:$0xff] %vm2165_vm4, %v2162_v32  ;;  %v1157_v31 = vadd.s32 %v1156_v40, %v1154_v8  ;;  %v1929_v56 = vadd.s32 %v1928_v49, %v1926_v17 }
 0x427   : > { %vm1228_vm11 = vcmp.eq.s32.totalorder %v5486_v43, %v1157_v31  ;;  %v1357_v18 = vsel %vm1328_vm2, %v1157_v31, 0  ;;  %vm2000_vm12 = vcmp.eq.s32.totalorder %v5486_v43, %v1929_v56  ;;  %v2670_v46 = vadd.s32 4294967232, %v1929_v56 }
 0x428   : > { %v2606_v2 = vsel %vm1228_vm11, 1.0, %v3051_v37  ;;  %v2638_v48 = vsel %vm2000_vm12, 1.0, %v3051_v37 }
 0x429   : > { %v2161_v63 = vsel %vm2100_vm3, %v2670_v46, %v1357_v18  ;;  %v1181_v7 = vpop.xlane.xlu1 %1180  ;;  %v1953_v50 = vpop.xlane.xlu0 %1952  ;;  %v2096_v61 = vadd.f32 %v2638_v48, %v2606_v2 }
 0x42a   : > { %2194 = vst.msk [vmem:[%s4642_s11 + $0xe0] sm:$0xff] %vm2165_vm4, %v2161_v63  ;;  %v1182_v24 = vcvt.f32.s32 %v1181_v7  ;;  %v1954_v57 = vcvt.f32.s32 %v1953_v50 }
 0x42b   : > { %2933 = vmatprep.mubr.f32.mxu1 %v2096_v61 }
 0x42c   : > { %v1185_v44 = vadd.s32 %v1184_v52, %v1182_v24  ;;  %v1957_v4 = vadd.s32 %v1956_v53, %v1954_v57  ;;  %2934 = vmatmul.mubr.f32.gmra.mxu1 %v2097_v11 }
 0x42d   : > { %v1195_v9 = vpop.xlane.xlu1 %1194  ;;  %v1967_v55 = vpop.xlane.xlu0 %1966 }
 0x42e   : > { %vm1230_vm13 = vcmp.eq.s32.totalorder %v5486_v43, %v1185_v44  ;;  %v1359_v59 = vsel %vm1328_vm2, %v1185_v44, 0  ;;  %vm2002_vm14 = vcmp.eq.s32.totalorder %v5486_v43, %v1957_v4  ;;  %v2672_v10 = vadd.s32 4294967232, %v1957_v4 }
 0x42f   : > { %v1196_v39 = vcvt.f32.s32 %v1195_v9  ;;  %v1968_v1 = vcvt.f32.s32 %v1967_v55  ;;  %v2608_v30 = vsel %vm1230_vm13, 1.0, %v3051_v37  ;;  %v2640_v27 = vsel %vm2002_vm14, 1.0, %v3051_v37 }
 0x430   : > { %v2163_v54 = vsel %vm2100_vm3, %v2672_v10, %v1359_v59  ;;  %v2098_v45 = vadd.f32 %v2640_v27, %v2608_v30 }
 0x431   : > { %2196 = vst.msk [vmem:[%s4642_s11 + $0xf0] sm:$0xff] %vm2165_vm4, %v2163_v54  ;;  %v1199_v60 = vadd.s32 %v1198_v29, %v1196_v39  ;;  %v1971_v42 = vadd.s32 %v1970_v41, %v1968_v1 }
 0x432   : > { %2936 = vmatprep.mubr.f32.mxu1 %v2098_v45 }
 0x433   : > { %vm1231_vm15 = vcmp.eq.s32.totalorder %v5486_v43, %v1199_v60  ;;  %v1360_v5 = vsel %vm1328_vm2, %v1199_v60, 0  ;;  %vm2003_vm0 = vcmp.eq.s32.totalorder %v5486_v43, %v1971_v42  ;;  %v2673_v6 = vadd.s32 4294967232, %v1971_v42 }
 0x434   : > { %v2609_v13 = vsel %vm1231_vm15, 1.0, %v3051_v37  ;;  %v2641_v23 = vsel %vm2003_vm0, 1.0, %v3051_v37 }
 0x435   : > { %v2164_v20 = vsel %vm2100_vm3, %v2673_v6, %v1360_v5  ;;  %v2099_v62 = vadd.f32 %v2641_v23, %v2609_v13 }
 0x436   : > { %2197 = vst.msk [vmem:[%s4642_s11 + $0xf8] sm:$0xff] %vm2165_vm4, %v2164_v20 }
 0x437   : > { %2937 = vmatmul.mubr.f32.gmra.mxu1 %v2099_v62 }
 0x47c   : > { %v2893_v12 = vpop.f32.mrf.mxu1 }
 0x47d   : > { %v2274_v47 = vadd.f32 %v2893_v12, %v5058_v25 }
 0x47e   : > { %v2268_v3 = vpop.f32.mrf.mxu1 }
 0x47f   : > { %2428 = vst [vmem:[%s5061_s20 + $0x8] sm:$0xff] %v2274_v47  ;;  %v2269_v43 = vadd.f32 %v5058_v25, %v2268_v3 }
 0x481   : > { %2427 = vst [vmem:[%s5061_s20] sm:$0xff] %v2269_v43 }
 0x484   : > { %v2896_v37 = vpop.f32.mrf.mxu1 }
 0x485   : > { %v2284_v40 = vadd.f32 %v2896_v37, %v5058_v25 }
 0x486   : > { %v2278_v49 = vpop.f32.mrf.mxu1 }
 0x487   : > { %2430 = vst [vmem:[%s5061_s20 + $0x18] sm:$0xff] %v2284_v40  ;;  %v2279_v35 = vadd.f32 %v5058_v25, %v2278_v49 }
 0x489   : > { %2429 = vst [vmem:[%s5061_s20 + $0x10] sm:$0xff] %v2279_v35 }
 0x48c   : > { %v2899_v51 = vpop.f32.mrf.mxu1 }
 0x48d   : > { %v2294_v36 = vadd.f32 %v2899_v51, %v5058_v25 }
 0x48e   : > { %v2288_v14 = vpop.f32.mrf.mxu1 }
 0x48f   : > { %2432 = vst [vmem:[%s5061_s20 + $0x28] sm:$0xff] %v2294_v36  ;;  %v2289_v21 = vadd.f32 %v5058_v25, %v2288_v14 }
 0x491   : > { %2431 = vst [vmem:[%s5061_s20 + $0x20] sm:$0xff] %v2289_v21 }
 0x494   : > { %v2902_v38 = vpop.f32.mrf.mxu1 }
 0x495   : > { %v2304_v8 = vadd.f32 %v2902_v38, %v5058_v25 }
 0x496   : > { %v2298_v17 = vpop.f32.mrf.mxu1 }
 0x497   : > { %2434 = vst [vmem:[%s5061_s20 + $0x38] sm:$0xff] %v2304_v8  ;;  %v2299_v22 = vadd.f32 %v5058_v25, %v2298_v17 }
 0x499   : > { %2433 = vst [vmem:[%s5061_s20 + $0x30] sm:$0xff] %v2299_v22 }
 0x49c   : > { %v2905_v19 = vpop.f32.mrf.mxu1 }
 0x49d   : > { %v2314_v32 = vadd.f32 %v2905_v19, %v5058_v25 }
 0x49e   : > { %v2308_v11 = vpop.f32.mrf.mxu1 }
 0x49f   : > { %2436 = vst [vmem:[%s5061_s20 + $0x48] sm:$0xff] %v2314_v32  ;;  %v2309_v31 = vadd.f32 %v5058_v25, %v2308_v11 }
 0x4a1   : > { %2435 = vst [vmem:[%s5061_s20 + $0x40] sm:$0xff] %v2309_v31 }
 0x4a4   : > { %v2908_v56 = vpop.f32.mrf.mxu1 }
 0x4a5   : > { %v2324_v0 = vadd.f32 %v2908_v56, %v5058_v25 }
 0x4a6   : > { %v2318_v15 = vpop.f32.mrf.mxu1 }
 0x4a7   : > { %2438 = vst [vmem:[%s5061_s20 + $0x58] sm:$0xff] %v2324_v0  ;;  %v2319_v26 = vadd.f32 %v5058_v25, %v2318_v15 }
 0x4a9   : > { %2437 = vst [vmem:[%s5061_s20 + $0x50] sm:$0xff] %v2319_v26 }
 0x4ac   : > { %v2911_v28 = vpop.f32.mrf.mxu1 }
 0x4ad   : > { %v2334_v18 = vadd.f32 %v2911_v28, %v5058_v25 }
 0x4ae   : > { %v2328_v46 = vpop.f32.mrf.mxu1 }
 0x4af   : > { %2440 = vst [vmem:[%s5061_s20 + $0x68] sm:$0xff] %v2334_v18  ;;  %v2329_v2 = vadd.f32 %v5058_v25, %v2328_v46 }
 0x4b1   : > { %2439 = vst [vmem:[%s5061_s20 + $0x60] sm:$0xff] %v2329_v2 }
 0x4b4   : > { %v2914_v48 = vpop.f32.mrf.mxu1 }
 0x4b5   : > { %v2344_v58 = vadd.f32 %v2914_v48, %v5058_v25 }
 0x4b6   : > { %v2338_v16 = vpop.f32.mrf.mxu1 }
 0x4b7   : > { %2442 = vst [vmem:[%s5061_s20 + $0x78] sm:$0xff] %v2344_v58  ;;  %v2339_v33 = vadd.f32 %v5058_v25, %v2338_v16 }
 0x4b9   : > { %2441 = vst [vmem:[%s5061_s20 + $0x70] sm:$0xff] %v2339_v33 }
 0x4bc   : > { %v2917_v34 = vpop.f32.mrf.mxu1 }
 0x4bd   : > { %v2354_v63 = vadd.f32 %v2917_v34, %v5058_v25 }
 0x4be   : > { %v2348_v7 = vpop.f32.mrf.mxu1 }
 0x4bf   : > { %2444 = vst [vmem:[%s5061_s20 + $0x88] sm:$0xff] %v2354_v63  ;;  %v2349_v50 = vadd.f32 %v5058_v25, %v2348_v7 }
 0x4c1   : > { %2443 = vst [vmem:[%s5061_s20 + $0x80] sm:$0xff] %v2349_v50 }
 0x4c4   : > { %v2920_v61 = vpop.f32.mrf.mxu1 }
 0x4c5   : > { %v2364_v52 = vadd.f32 %v2920_v61, %v5058_v25 }
 0x4c6   : > { %v2358_v53 = vpop.f32.mrf.mxu1 }
 0x4c7   : > { %2446 = vst [vmem:[%s5061_s20 + $0x98] sm:$0xff] %v2364_v52  ;;  %v2359_v24 = vadd.f32 %v5058_v25, %v2358_v53 }
 0x4c9   : > { %2445 = vst [vmem:[%s5061_s20 + $0x90] sm:$0xff] %v2359_v24 }
 0x4cc   : > { %v2923_v57 = vpop.f32.mrf.mxu1 }
 0x4cd   : > { %v2374_v44 = vadd.f32 %v2923_v57, %v5058_v25 }
 0x4ce   : > { %v2368_v4 = vpop.f32.mrf.mxu1 }
 0x4cf   : > { %2448 = vst [vmem:[%s5061_s20 + $0xa8] sm:$0xff] %v2374_v44  ;;  %v2369_v29 = vadd.f32 %v5058_v25, %v2368_v4 }
 0x4d1   : > { %2447 = vst [vmem:[%s5061_s20 + $0xa0] sm:$0xff] %v2369_v29 }
 0x4d4   : > { %v2926_v41 = vpop.f32.mrf.mxu1 }
 0x4d5   : > { %v2384_v9 = vadd.f32 %v2926_v41, %v5058_v25 }
 0x4d6   : > { %v2378_v55 = vpop.f32.mrf.mxu1 }
 0x4d7   : > { %2450 = vst [vmem:[%s5061_s20 + $0xb8] sm:$0xff] %v2384_v9  ;;  %v2379_v59 = vadd.f32 %v5058_v25, %v2378_v55 }
 0x4d9   : > { %2449 = vst [vmem:[%s5061_s20 + $0xb0] sm:$0xff] %v2379_v59 }
 0x4dc   : > { %v2929_v10 = vpop.f32.mrf.mxu1 }
 0x4dd   : > { %v2394_v39 = vadd.f32 %v2929_v10, %v5058_v25 }
 0x4de   : > { %v2388_v1 = vpop.f32.mrf.mxu1 }
 0x4df   : > { %2452 = vst [vmem:[%s5061_s20 + $0xc8] sm:$0xff] %v2394_v39  ;;  %v2389_v30 = vadd.f32 %v5058_v25, %v2388_v1 }
 0x4e1   : > { %2451 = vst [vmem:[%s5061_s20 + $0xc0] sm:$0xff] %v2389_v30 }
 0x4e4   : > { %v2932_v27 = vpop.f32.mrf.mxu1 }
 0x4e5   : > { %v2404_v54 = vadd.f32 %v2932_v27, %v5058_v25 }
 0x4e6   : > { %v2398_v45 = vpop.f32.mrf.mxu1 }
 0x4e7   : > { %2454 = vst [vmem:[%s5061_s20 + $0xd8] sm:$0xff] %v2404_v54  ;;  %v2399_v60 = vadd.f32 %v5058_v25, %v2398_v45 }
 0x4e9   : > { %2453 = vst [vmem:[%s5061_s20 + $0xd0] sm:$0xff] %v2399_v60 }
 0x4ec   : > { %v2935_v42 = vpop.f32.mrf.mxu1 }
 0x4ed   : > { %v2414_v5 = vadd.f32 %v2935_v42, %v5058_v25 }
 0x4ee   : > { %v2408_v6 = vpop.f32.mrf.mxu1 }
 0x4ef   : > { %2456 = vst [vmem:[%s5061_s20 + $0xe8] sm:$0xff] %v2414_v5  ;;  %v2409_v13 = vadd.f32 %v5058_v25, %v2408_v6 }
 0x4f1   : > { %2455 = vst [vmem:[%s5061_s20 + $0xe0] sm:$0xff] %v2409_v13 }
 0x4f7   : > { %v2938_v23 = vpop.f32.mrf.mxu1 }
 0x4f8   : > { %v2424_v20 = vadd.f32 %v2938_v23, %v5058_v25 }
 0x4f9   : > { %v2418_v62 = vpop.f32.mrf.mxu1 }
 0x4fa   : > { %2458 = vst [vmem:[%s5061_s20 + $0xf8] sm:$0xff] %v2424_v20  ;;  %v2419_v12 = vadd.f32 %v5058_v25, %v2418_v62 }
 0x4fc   : > { %2457 = vst [vmem:[%s5061_s20 + $0xf0] sm:$0xff] %v2419_v12 }
 0x4fd   : > { %3001 = shalt.err (!%p2998_p3)
}
 0x4fe   : > { %s3002_s8 = scalar_lea.hbm %s5128_s30, 4096  ;;  %s3006_s11 = scalar_lea.hbm %s5180_s3, 16384 }
 0x4ff   : > { %p3003_p4 = scmp.ne.s32.totalorder %s5128_s30, %s3002_s8  ;;  %p3007_p9 = scmp.lt.s32.totalorder %s5128_s30, %s5180_s3 }
 0x500   : > { %p3008_p10 = scmp.lt.s32.totalorder %s3006_s11, %s3002_s8 }
 0x501   : > { %p3004_p7 = pnand %p3003_p4, %p3113_p5 }
 0x502   : > { %p3009_p11 = por %p3008_p10, %p3007_p9 }
 0x503   : > { %p3005_p8 = pneg %p3004_p7 }
 0x505   : > { %p3010_p12 = pnand %p3009_p11, %p3005_p8 }
 0x507   : > { %3013 = shalt.err (!%p3010_p12)
}
 0x508   : > { %s3053_s17 = smov 128   ;;  %s3054_s19 = smov 8  }
 0x509   : > { %2943 = dma.vmem_to_hbm [thread:$0]  (%p3113_p5), %s5130_s27, 4096, %s5128_s30, %s5137_s16, %s3053_s17, %s3053_s17, %s3054_s19  }
 0x50a PF: > { %p2949_p13 = scmp.ge.s32.totalorder %s3048_s15, 2  ;;  %s2504_s20 = sand.u32 1, %s3036_s12  }
 0x50b   : > { %s2505_s26 = scalar_lea.sflag [#allocation3], %s2504_s20 }
 0x50c   : > { %p2946_p0 = pnand %p2949_p13, %p3117_p6 }
 0x50e   : > { %p2947_p1 = pneg %p2946_p0 }
 0x510   : > { %3031 = dma.done.wait (%p2947_p1), %s2505_s26, 4096  }
 0x511   : > { %3033 = vsyncadd (%p2947_p1), %s2505_s26, 4294963200  ;;  %p14_p2 = scmp.ge.s32.totalorder %s3100_s18, 6   ;;  %s5505_s12 = smov %s3040_s13 }
 0x512   : > { %s5506_s13 = smov %s3044_s14  ;;  %s5507_s14 = smov %s3111_s21 }
 0x513   : > { %s5508_s15 = smov %s3100_s18  ;;  %16 = sbr.rel (!%p14_p2) target bundleno = 3 (0x3), region = 75 }
 0x518   :  { %2510 = vsyncpa [#allocation3], 1 }
 0x519   :  { %2512 = vsyncpa [#allocation3 + $0x1], 1 }

</bundles_post_ra>
